<compile_context>
chip_gen: v6e
topology: v6e:2x2x1
jax: 0.10.0
libtpu: 0.0.40
codegen_flags: <defaults>
</compile_context>

<pallas_src>
import functools

import jax
import jax.numpy as jnp
import numpy as np
from jax import lax
from jax.experimental import pallas as pl
from jax.experimental.pallas import tpu as pltpu

H = 4            # hidden_size
L = 5            # num_layers
OUT = 4          # Linear output features
HP = 128         # lane width (h / c / state vectors)
GP = 4 * HP      # fused gate width: [ i | f | g | o ], each 128 lanes holding all 5 layers
X_ROW = 4 * L    # wg row stashing layer-0 w_ih (scalar-input weights)    (h lane 20 == 0 always)
BG_ROW = X_ROW + 1   # wg row stashing the fused gate bias b_ih + b_hh    (h lane 21 == 0 always)
BFC_ROW = 4 * L      # wfc row stashing the Linear bias                   (h lane 20 == 0 always)
BB = 8           # windows per grid step (one f32 sublane tile)


def _lstm_linear_kernel(x_ref, wg_ref, wfc_ref, o_ref, *, seq_len):
    T = seq_len
    lane = lax.broadcasted_iota(jnp.int32, (1, HP), 1)

    x = x_ref[...]                              # (BB, 128), window values in lanes [0:T)
    wx = wg_ref[pl.ds(X_ROW, 1), :]             # (1, GP)  layer-0 input weights
    bg = wg_ref[pl.ds(BG_ROW, 1), :]            # (1, GP)  fused gate bias

    # h/c layout: lanes [4l : 4l+4) hold layer l; lanes >= 20 stay zero forever.
    h = jnp.zeros((BB, HP), jnp.float32)
    c = jnp.zeros((BB, HP), jnp.float32)

    # Layer/time wavefront: step s runs cell (t = s - l, layer l) for all active layers.
    # Fully unrolled (T + L - 1 = 12 steps).
    for s in range(T + L - 1):
        # Per-step bias (gate bias + x injection) depends only on inputs, so the compiler can
        # schedule it off the serial h -> MXU -> EUP -> h chain; only one add stays on-chain.
        step_bias = bg
        if s < T:
            step_bias = step_bias + x[:, s:s + 1] * wx          # (BB, GP)

        # Single fused MXU dot: all layers, all gates, w_ih + w_hh combined.
        gates = jnp.dot(h, wg_ref[...], preferred_element_type=jnp.float32) + step_bias

        i_g = jax.nn.sigmoid(gates[:, 0 * HP:1 * HP])  # lane 4l+k == gate of layer l, unit k
        f_g = jax.nn.sigmoid(gates[:, 1 * HP:2 * HP])
        g_g = jnp.tanh(gates[:, 2 * HP:3 * HP])
        o_g = jax.nn.sigmoid(gates[:, 3 * HP:4 * HP])

        c_new = f_g * c + i_g * g_g
        h_new = o_g * jnp.tanh(c_new)

        # Static active-layer window for this wavefront step: l in [lo, hi].
        lo = max(0, s - T + 1)
        hi = min(L - 1, s)
        if lo > 0 or hi < L - 1:
            active = (lane >= 4 * lo) & (lane < 4 * (hi + 1))
            c = jnp.where(active, c_new, c)
            h = jnp.where(active, h_new, h)
        else:
            # All layers active; lanes >= 4L keep themselves at exactly zero
            # (zero weight columns + zero bias), so no select is needed.
            c = c_new
            h = h_new

    # Linear(L*H -> OUT) on h.reshape([-1]) (torch flat index l*H+k == lane 4l+k).
    # Output kept lane-dense (BB, 128); real logits live in lanes [0:OUT).
    bfc = wfc_ref[pl.ds(BFC_ROW, 1), :]
    o_ref[...] = jnp.dot(h, wfc_ref[...], preferred_element_type=jnp.float32) + bfc


def init_params(key):
    """Deterministic parameters with PyTorch-default-style uniform init."""
    params = {"w_ih": [], "w_hh": [], "b_ih": [], "b_hh": []}
    k_lstm = 1.0 / np.sqrt(H)
    for l in range(L):
        in_l = 1 if l == 0 else H
        key, k1, k2, k3, k4 = jax.random.split(key, 5)
        params["w_ih"].append(jax.random.uniform(k1, (4 * H, in_l), jnp.float32, -k_lstm, k_lstm))
        params["w_hh"].append(jax.random.uniform(k2, (4 * H, H), jnp.float32, -k_lstm, k_lstm))
        params["b_ih"].append(jax.random.uniform(k3, (4 * H,), jnp.float32, -k_lstm, k_lstm))
        params["b_hh"].append(jax.random.uniform(k4, (4 * H,), jnp.float32, -k_lstm, k_lstm))
    k_fc = 1.0 / np.sqrt(L * H)
    key, k5, k6 = jax.random.split(key, 3)
    params["w_fc"] = jax.random.uniform(k5, (OUT, L * H), jnp.float32, -k_fc, k_fc)
    params["b_fc"] = jax.random.uniform(k6, (OUT,), jnp.float32, -k_fc, k_fc)
    return params


def prepare_params(params):
    """One-time host-side packing into the fused kernel layout (hoisted out of the call path)."""
    wg = np.zeros((HP, GP), np.float32)     # rows: state features, cols: [i|f|g|o] x (layer, unit)
    for l in range(L):
        w_ih = np.asarray(params["w_ih"][l])                      # (4H, in_l)
        w_hh = np.asarray(params["w_hh"][l])                      # (4H, H)
        bias = np.asarray(params["b_ih"][l]) + np.asarray(params["b_hh"][l])
        for gt in range(4):                                       # torch gate order: i, f, g, o
            col = gt * HP + 4 * l
            rows = slice(gt * H, (gt + 1) * H)
            # recurrent contribution (h_l lives at state lanes [4l : 4l+4))
            wg[4 * l:4 * l + H, col:col + H] = w_hh[rows, :].T
            # input contribution: stash row for layer 0 (applied outside the dot), h_{l-1} else
            if l == 0:
                wg[X_ROW, col:col + H] = w_ih[rows, 0]
            else:
                wg[4 * (l - 1):4 * (l - 1) + H, col:col + H] = w_ih[rows, :].T
            wg[BG_ROW, col:col + H] = bias[rows]                  # fused bias stash row

    w_fc = np.asarray(params["w_fc"])                             # (OUT, L*H), flat idx = l*H + k
    wfc = np.zeros((HP, HP), np.float32)
    wfc[:L * H, :OUT] = w_fc.T
    wfc[BFC_ROW, :OUT] = np.asarray(params["b_fc"])               # Linear bias stash row
    return {"wg": jnp.asarray(wg), "wfc": jnp.asarray(wfc)}


@jax.jit
def outlier_detect_forward(x, prepped):
    """x: (N, T, 1) float32 — N independent windows, each the module's batch-1 forward.

    Returns (N, OUT) logits.
    """
    assert x.ndim == 3 and x.shape[2] == 1
    N, T, _ = x.shape
    assert T <= HP
    n_pad = (-N) % BB
    n_total = N + n_pad

    # Compact, lane-padded input (no per-value scatter): window n's sequence in lanes [0:T).
    x2 = jnp.pad(x[:, :, 0].astype(jnp.float32), ((0, n_pad), (0, HP - T)))

    out = pl.pallas_call(
        functools.partial(_lstm_linear_kernel, seq_len=T),
        out_shape=jax.ShapeDtypeStruct((n_total, HP), jnp.float32),
        grid_spec=pltpu.PrefetchScalarGridSpec(
            num_scalar_prefetch=0,
            grid=(n_total // BB,),
            in_specs=[
                pl.BlockSpec((BB, HP), lambda i: (i, 0)),      # per-block window inputs
                pl.BlockSpec((HP, GP), lambda i: (0, 0)),      # fused LSTM weights (VMEM-resident)
                pl.BlockSpec((HP, HP), lambda i: (0, 0)),      # Linear weights (VMEM-resident)
            ],
            out_specs=pl.BlockSpec((BB, HP), lambda i: (i, 0)),
        ),
        compiler_params=pltpu.CompilerParams(
            dimension_semantics=("parallel",)),                # v7x: split blocks across 2 TCs
    )(x2, prepped["wg"], prepped["wfc"])
    return out[:N, :OUT]


def reference_forward(x, params):
    """NumPy reference of the intended forward for one window (x: (1, T, 1))."""
    def sigmoid(v):
        return 1.0 / (1.0 + np.exp(-v))

    x = np.asarray(x, np.float64)
    T = x.shape[1]
    h = [np.zeros((H,), np.float64) for _ in range(L)]
    c = [np.zeros((H,), np.float64) for _ in range(L)]
    for t in range(T):
        layer_in = x[0, t, :]                                     # (1,) for layer 0
        for l in range(L):
            w_ih = np.asarray(params["w_ih"][l], np.float64)
            w_hh = np.asarray(params["w_hh"][l], np.float64)
            gates = (w_ih @ layer_in + w_hh @ h[l]
                     + np.asarray(params["b_ih"][l], np.float64)
                     + np.asarray(params["b_hh"][l], np.float64))
            i = sigmoid(gates[0:H])
            f = sigmoid(gates[H:2 * H])
            g = np.tanh(gates[2 * H:3 * H])
            o = sigmoid(gates[3 * H:4 * H])
            c[l] = f * c[l] + i * g
            h[l] = o * np.tanh(c[l])
            layer_in = h[l]
    h_flat = np.concatenate(h)                                    # == torch h.reshape([-1]) for batch 1
    return np.asarray(params["w_fc"], np.float64) @ h_flat + np.asarray(params["b_fc"], np.float64)


if __name__ == "__main__":
    key = jax.random.PRNGKey(0)
    pkey, xkey = jax.random.split(key)
    params = init_params(pkey)
    prepped = prepare_params(params)                              # one-time weight packing

    N, T = 16, 8                                                  # 16 windows, seq=8, input_size=1
    x = jax.random.normal(xkey, (N, T, 1), jnp.float32)

    out = jax.block_until_ready(outlier_detect_forward(x, prepped))
    assert out.shape == (N, OUT)

    ref = np.stack([reference_forward(np.asarray(x[n:n + 1]), params) for n in range(N)])
    np.testing.assert_allclose(np.asarray(out), ref, rtol=1e-4, atol=1e-4)
    print("KERNEL_OK")
</pallas_src>

<mosaic_0001>
module attributes {stable_mosaic.version = 11 : i64} {
  func.func @_lstm_linear_kernel(%arg0: i32, %arg1: memref<8x128xf32, #tpu.memory_space<vmem>>, %arg2: memref<128x512xf32, #tpu.memory_space<vmem>>, %arg3: memref<128x128xf32, #tpu.memory_space<vmem>>, %arg4: memref<8x128xf32, #tpu.memory_space<vmem>>) attributes {dimension_semantics = [#tpu.dimension_semantics<parallel>], iteration_bounds = array<i64: 2>, scalar_prefetch = 0 : i64, scratch_operands = 0 : i64, tpu.core_type = #tpu.core_type<tc>, window_params = [{transform_indices = @transform_0, window_bounds = array<i64: 8, 128>}, {pipeline_mode = #tpu.pipeline_mode<synchronous>, transform_indices = @transform_1, window_bounds = array<i64: 128, 512>}, {pipeline_mode = #tpu.pipeline_mode<synchronous>, transform_indices = @transform_2, window_bounds = array<i64: 128, 128>}, {transform_indices = @transform_3, window_bounds = array<i64: 8, 128>}]} {
    %0 = tpu.iota {dimensions = array<i32: 1>} : vector<1x128xi32>
    %c0 = arith.constant 0 : index
    %c0_0 = arith.constant 0 : index
    %1 = vector.load %arg1[%c0, %c0_0] : memref<8x128xf32, #tpu.memory_space<vmem>>, vector<8x128xf32>
    %c20 = arith.constant 20 : index
    %c0_1 = arith.constant 0 : index
    %2 = vector.load %arg2[%c20, %c0_1] : memref<128x512xf32, #tpu.memory_space<vmem>>, vector<1x512xf32>
    %c21 = arith.constant 21 : index
    %c0_2 = arith.constant 0 : index
    %3 = vector.load %arg2[%c21, %c0_2] : memref<128x512xf32, #tpu.memory_space<vmem>>, vector<1x512xf32>
    %cst = arith.constant 0.000000e+00 : f32
    %4 = vector.broadcast %cst : f32 to vector<8x128xf32>
    %cst_3 = arith.constant 0.000000e+00 : f32
    %5 = vector.broadcast %cst_3 : f32 to vector<8x128xf32>
    %6 = vector.extract_strided_slice %1 {offsets = [0, 0], sizes = [8, 1], strides = [1, 1]} : vector<8x128xf32> to vector<8x1xf32>
    %7 = vector.broadcast %6 : vector<8x1xf32> to vector<8x512xf32>
    %8 = vector.broadcast %2 : vector<1x512xf32> to vector<8x512xf32>
    %9 = arith.mulf %7, %8 : vector<8x512xf32>
    %10 = vector.broadcast %3 : vector<1x512xf32> to vector<8x512xf32>
    %11 = arith.addf %10, %9 : vector<8x512xf32>
    %c0_4 = arith.constant 0 : index
    %c0_5 = arith.constant 0 : index
    %12 = vector.load %arg2[%c0_4, %c0_5] : memref<128x512xf32, #tpu.memory_space<vmem>>, vector<128x512xf32>
    %cst_6 = arith.constant dense<0.000000e+00> : vector<8x512xf32>
    %13 = tpu.matmul %4, %12, %cst_6 {dimension_numbers = #tpu.dot_dimension_numbers<[1], [0], [0], [1], [0, 0, 1, 1], [], []>} : vector<8x128xf32>, vector<128x512xf32>, vector<8x512xf32> -> vector<8x512xf32>
    %14 = arith.addf %13, %11 : vector<8x512xf32>
    %15 = vector.extract_strided_slice %14 {offsets = [0, 0], sizes = [8, 128], strides = [1, 1]} : vector<8x512xf32> to vector<8x128xf32>
    %16 = arith.negf %15 : vector<8x128xf32>
    %17 = math.exp %16 : vector<8x128xf32>
    %cst_7 = arith.constant 1.000000e+00 : f32
    %18 = vector.broadcast %cst_7 : f32 to vector<8x128xf32>
    %19 = arith.addf %18, %17 : vector<8x128xf32>
    %20 = arith.divf %18, %19 : vector<8x128xf32>
    %21 = vector.extract_strided_slice %14 {offsets = [0, 128], sizes = [8, 128], strides = [1, 1]} : vector<8x512xf32> to vector<8x128xf32>
    %22 = arith.negf %21 : vector<8x128xf32>
    %23 = math.exp %22 : vector<8x128xf32>
    %cst_8 = arith.constant 1.000000e+00 : f32
    %24 = vector.broadcast %cst_8 : f32 to vector<8x128xf32>
    %25 = arith.addf %24, %23 : vector<8x128xf32>
    %26 = arith.divf %24, %25 : vector<8x128xf32>
    %27 = vector.extract_strided_slice %14 {offsets = [0, 256], sizes = [8, 128], strides = [1, 1]} : vector<8x512xf32> to vector<8x128xf32>
    %28 = math.tanh %27 : vector<8x128xf32>
    %29 = vector.extract_strided_slice %14 {offsets = [0, 384], sizes = [8, 128], strides = [1, 1]} : vector<8x512xf32> to vector<8x128xf32>
    %30 = arith.negf %29 : vector<8x128xf32>
    %31 = math.exp %30 : vector<8x128xf32>
    %cst_9 = arith.constant 1.000000e+00 : f32
    %32 = vector.broadcast %cst_9 : f32 to vector<8x128xf32>
    %33 = arith.addf %32, %31 : vector<8x128xf32>
    %34 = arith.divf %32, %33 : vector<8x128xf32>
    %35 = arith.mulf %26, %5 : vector<8x128xf32>
    %36 = arith.mulf %20, %28 : vector<8x128xf32>
    %37 = arith.addf %35, %36 : vector<8x128xf32>
    %38 = math.tanh %37 : vector<8x128xf32>
    %39 = arith.mulf %34, %38 : vector<8x128xf32>
    %c0_i32 = arith.constant 0 : i32
    %40 = vector.broadcast %c0_i32 : i32 to vector<1x128xi32>
    %41 = arith.cmpi sge, %0, %40 : vector<1x128xi32>
    %c4_i32 = arith.constant 4 : i32
    %42 = vector.broadcast %c4_i32 : i32 to vector<1x128xi32>
    %43 = arith.cmpi slt, %0, %42 : vector<1x128xi32>
    %44 = arith.andi %41, %43 : vector<1x128xi1>
    %45 = vector.shape_cast %44 : vector<1x128xi1> to vector<1x128xi1>
    %46 = vector.broadcast %45 : vector<1x128xi1> to vector<8x128xi1>
    %47 = arith.select %46, %37, %5 : vector<8x128xi1>, vector<8x128xf32>
    %48 = vector.shape_cast %44 : vector<1x128xi1> to vector<1x128xi1>
    %49 = vector.broadcast %48 : vector<1x128xi1> to vector<8x128xi1>
    %50 = arith.select %49, %39, %4 : vector<8x128xi1>, vector<8x128xf32>
    %51 = vector.extract_strided_slice %1 {offsets = [0, 1], sizes = [8, 1], strides = [1, 1]} : vector<8x128xf32> to vector<8x1xf32>
    %52 = vector.broadcast %51 : vector<8x1xf32> to vector<8x512xf32>
    %53 = vector.broadcast %2 : vector<1x512xf32> to vector<8x512xf32>
    %54 = arith.mulf %52, %53 : vector<8x512xf32>
    %55 = vector.broadcast %3 : vector<1x512xf32> to vector<8x512xf32>
    %56 = arith.addf %55, %54 : vector<8x512xf32>
    %c0_10 = arith.constant 0 : index
    %c0_11 = arith.constant 0 : index
    %57 = vector.load %arg2[%c0_10, %c0_11] : memref<128x512xf32, #tpu.memory_space<vmem>>, vector<128x512xf32>
    %cst_12 = arith.constant dense<0.000000e+00> : vector<8x512xf32>
    %58 = tpu.matmul %50, %57, %cst_12 {dimension_numbers = #tpu.dot_dimension_numbers<[1], [0], [0], [1], [0, 0, 1, 1], [], []>} : vector<8x128xf32>, vector<128x512xf32>, vector<8x512xf32> -> vector<8x512xf32>
    %59 = arith.addf %58, %56 : vector<8x512xf32>
    %60 = vector.extract_strided_slice %59 {offsets = [0, 0], sizes = [8, 128], strides = [1, 1]} : vector<8x512xf32> to vector<8x128xf32>
    %61 = arith.negf %60 : vector<8x128xf32>
    %62 = math.exp %61 : vector<8x128xf32>
    %cst_13 = arith.constant 1.000000e+00 : f32
    %63 = vector.broadcast %cst_13 : f32 to vector<8x128xf32>
    %64 = arith.addf %63, %62 : vector<8x128xf32>
    %65 = arith.divf %63, %64 : vector<8x128xf32>
    %66 = vector.extract_strided_slice %59 {offsets = [0, 128], sizes = [8, 128], strides = [1, 1]} : vector<8x512xf32> to vector<8x128xf32>
    %67 = arith.negf %66 : vector<8x128xf32>
    %68 = math.exp %67 : vector<8x128xf32>
    %cst_14 = arith.constant 1.000000e+00 : f32
    %69 = vector.broadcast %cst_14 : f32 to vector<8x128xf32>
    %70 = arith.addf %69, %68 : vector<8x128xf32>
    %71 = arith.divf %69, %70 : vector<8x128xf32>
    %72 = vector.extract_strided_slice %59 {offsets = [0, 256], sizes = [8, 128], strides = [1, 1]} : vector<8x512xf32> to vector<8x128xf32>
    %73 = math.tanh %72 : vector<8x128xf32>
    %74 = vector.extract_strided_slice %59 {offsets = [0, 384], sizes = [8, 128], strides = [1, 1]} : vector<8x512xf32> to vector<8x128xf32>
    %75 = arith.negf %74 : vector<8x128xf32>
    %76 = math.exp %75 : vector<8x128xf32>
    %cst_15 = arith.constant 1.000000e+00 : f32
    %77 = vector.broadcast %cst_15 : f32 to vector<8x128xf32>
    %78 = arith.addf %77, %76 : vector<8x128xf32>
    %79 = arith.divf %77, %78 : vector<8x128xf32>
    %80 = arith.mulf %71, %47 : vector<8x128xf32>
    %81 = arith.mulf %65, %73 : vector<8x128xf32>
    %82 = arith.addf %80, %81 : vector<8x128xf32>
    %83 = math.tanh %82 : vector<8x128xf32>
    %84 = arith.mulf %79, %83 : vector<8x128xf32>
    %c0_i32_16 = arith.constant 0 : i32
    %85 = vector.broadcast %c0_i32_16 : i32 to vector<1x128xi32>
    %86 = arith.cmpi sge, %0, %85 : vector<1x128xi32>
    %c8_i32 = arith.constant 8 : i32
    %87 = vector.broadcast %c8_i32 : i32 to vector<1x128xi32>
    %88 = arith.cmpi slt, %0, %87 : vector<1x128xi32>
    %89 = arith.andi %86, %88 : vector<1x128xi1>
    %90 = vector.shape_cast %89 : vector<1x128xi1> to vector<1x128xi1>
    %91 = vector.broadcast %90 : vector<1x128xi1> to vector<8x128xi1>
    %92 = arith.select %91, %82, %47 : vector<8x128xi1>, vector<8x128xf32>
    %93 = vector.shape_cast %89 : vector<1x128xi1> to vector<1x128xi1>
    %94 = vector.broadcast %93 : vector<1x128xi1> to vector<8x128xi1>
    %95 = arith.select %94, %84, %50 : vector<8x128xi1>, vector<8x128xf32>
    %96 = vector.extract_strided_slice %1 {offsets = [0, 2], sizes = [8, 1], strides = [1, 1]} : vector<8x128xf32> to vector<8x1xf32>
    %97 = vector.broadcast %96 : vector<8x1xf32> to vector<8x512xf32>
    %98 = vector.broadcast %2 : vector<1x512xf32> to vector<8x512xf32>
    %99 = arith.mulf %97, %98 : vector<8x512xf32>
    %100 = vector.broadcast %3 : vector<1x512xf32> to vector<8x512xf32>
    %101 = arith.addf %100, %99 : vector<8x512xf32>
    %c0_17 = arith.constant 0 : index
    %c0_18 = arith.constant 0 : index
    %102 = vector.load %arg2[%c0_17, %c0_18] : memref<128x512xf32, #tpu.memory_space<vmem>>, vector<128x512xf32>
    %cst_19 = arith.constant dense<0.000000e+00> : vector<8x512xf32>
    %103 = tpu.matmul %95, %102, %cst_19 {dimension_numbers = #tpu.dot_dimension_numbers<[1], [0], [0], [1], [0, 0, 1, 1], [], []>} : vector<8x128xf32>, vector<128x512xf32>, vector<8x512xf32> -> vector<8x512xf32>
    %104 = arith.addf %103, %101 : vector<8x512xf32>
    %105 = vector.extract_strided_slice %104 {offsets = [0, 0], sizes = [8, 128], strides = [1, 1]} : vector<8x512xf32> to vector<8x128xf32>
    %106 = arith.negf %105 : vector<8x128xf32>
    %107 = math.exp %106 : vector<8x128xf32>
    %cst_20 = arith.constant 1.000000e+00 : f32
    %108 = vector.broadcast %cst_20 : f32 to vector<8x128xf32>
    %109 = arith.addf %108, %107 : vector<8x128xf32>
    %110 = arith.divf %108, %109 : vector<8x128xf32>
    %111 = vector.extract_strided_slice %104 {offsets = [0, 128], sizes = [8, 128], strides = [1, 1]} : vector<8x512xf32> to vector<8x128xf32>
    %112 = arith.negf %111 : vector<8x128xf32>
    %113 = math.exp %112 : vector<8x128xf32>
    %cst_21 = arith.constant 1.000000e+00 : f32
    %114 = vector.broadcast %cst_21 : f32 to vector<8x128xf32>
    %115 = arith.addf %114, %113 : vector<8x128xf32>
    %116 = arith.divf %114, %115 : vector<8x128xf32>
    %117 = vector.extract_strided_slice %104 {offsets = [0, 256], sizes = [8, 128], strides = [1, 1]} : vector<8x512xf32> to vector<8x128xf32>
    %118 = math.tanh %117 : vector<8x128xf32>
    %119 = vector.extract_strided_slice %104 {offsets = [0, 384], sizes = [8, 128], strides = [1, 1]} : vector<8x512xf32> to vector<8x128xf32>
    %120 = arith.negf %119 : vector<8x128xf32>
    %121 = math.exp %120 : vector<8x128xf32>
    %cst_22 = arith.constant 1.000000e+00 : f32
    %122 = vector.broadcast %cst_22 : f32 to vector<8x128xf32>
    %123 = arith.addf %122, %121 : vector<8x128xf32>
    %124 = arith.divf %122, %123 : vector<8x128xf32>
    %125 = arith.mulf %116, %92 : vector<8x128xf32>
    %126 = arith.mulf %110, %118 : vector<8x128xf32>
    %127 = arith.addf %125, %126 : vector<8x128xf32>
    %128 = math.tanh %127 : vector<8x128xf32>
    %129 = arith.mulf %124, %128 : vector<8x128xf32>
    %c0_i32_23 = arith.constant 0 : i32
    %130 = vector.broadcast %c0_i32_23 : i32 to vector<1x128xi32>
    %131 = arith.cmpi sge, %0, %130 : vector<1x128xi32>
    %c12_i32 = arith.constant 12 : i32
    %132 = vector.broadcast %c12_i32 : i32 to vector<1x128xi32>
    %133 = arith.cmpi slt, %0, %132 : vector<1x128xi32>
    %134 = arith.andi %131, %133 : vector<1x128xi1>
    %135 = vector.shape_cast %134 : vector<1x128xi1> to vector<1x128xi1>
    %136 = vector.broadcast %135 : vector<1x128xi1> to vector<8x128xi1>
    %137 = arith.select %136, %127, %92 : vector<8x128xi1>, vector<8x128xf32>
    %138 = vector.shape_cast %134 : vector<1x128xi1> to vector<1x128xi1>
    %139 = vector.broadcast %138 : vector<1x128xi1> to vector<8x128xi1>
    %140 = arith.select %139, %129, %95 : vector<8x128xi1>, vector<8x128xf32>
    %141 = vector.extract_strided_slice %1 {offsets = [0, 3], sizes = [8, 1], strides = [1, 1]} : vector<8x128xf32> to vector<8x1xf32>
    %142 = vector.broadcast %141 : vector<8x1xf32> to vector<8x512xf32>
    %143 = vector.broadcast %2 : vector<1x512xf32> to vector<8x512xf32>
    %144 = arith.mulf %142, %143 : vector<8x512xf32>
    %145 = vector.broadcast %3 : vector<1x512xf32> to vector<8x512xf32>
    %146 = arith.addf %145, %144 : vector<8x512xf32>
    %c0_24 = arith.constant 0 : index
    %c0_25 = arith.constant 0 : index
    %147 = vector.load %arg2[%c0_24, %c0_25] : memref<128x512xf32, #tpu.memory_space<vmem>>, vector<128x512xf32>
    %cst_26 = arith.constant dense<0.000000e+00> : vector<8x512xf32>
    %148 = tpu.matmul %140, %147, %cst_26 {dimension_numbers = #tpu.dot_dimension_numbers<[1], [0], [0], [1], [0, 0, 1, 1], [], []>} : vector<8x128xf32>, vector<128x512xf32>, vector<8x512xf32> -> vector<8x512xf32>
    %149 = arith.addf %148, %146 : vector<8x512xf32>
    %150 = vector.extract_strided_slice %149 {offsets = [0, 0], sizes = [8, 128], strides = [1, 1]} : vector<8x512xf32> to vector<8x128xf32>
    %151 = arith.negf %150 : vector<8x128xf32>
    %152 = math.exp %151 : vector<8x128xf32>
    %cst_27 = arith.constant 1.000000e+00 : f32
    %153 = vector.broadcast %cst_27 : f32 to vector<8x128xf32>
    %154 = arith.addf %153, %152 : vector<8x128xf32>
    %155 = arith.divf %153, %154 : vector<8x128xf32>
    %156 = vector.extract_strided_slice %149 {offsets = [0, 128], sizes = [8, 128], strides = [1, 1]} : vector<8x512xf32> to vector<8x128xf32>
    %157 = arith.negf %156 : vector<8x128xf32>
    %158 = math.exp %157 : vector<8x128xf32>
    %cst_28 = arith.constant 1.000000e+00 : f32
    %159 = vector.broadcast %cst_28 : f32 to vector<8x128xf32>
    %160 = arith.addf %159, %158 : vector<8x128xf32>
    %161 = arith.divf %159, %160 : vector<8x128xf32>
    %162 = vector.extract_strided_slice %149 {offsets = [0, 256], sizes = [8, 128], strides = [1, 1]} : vector<8x512xf32> to vector<8x128xf32>
    %163 = math.tanh %162 : vector<8x128xf32>
    %164 = vector.extract_strided_slice %149 {offsets = [0, 384], sizes = [8, 128], strides = [1, 1]} : vector<8x512xf32> to vector<8x128xf32>
    %165 = arith.negf %164 : vector<8x128xf32>
    %166 = math.exp %165 : vector<8x128xf32>
    %cst_29 = arith.constant 1.000000e+00 : f32
    %167 = vector.broadcast %cst_29 : f32 to vector<8x128xf32>
    %168 = arith.addf %167, %166 : vector<8x128xf32>
    %169 = arith.divf %167, %168 : vector<8x128xf32>
    %170 = arith.mulf %161, %137 : vector<8x128xf32>
    %171 = arith.mulf %155, %163 : vector<8x128xf32>
    %172 = arith.addf %170, %171 : vector<8x128xf32>
    %173 = math.tanh %172 : vector<8x128xf32>
    %174 = arith.mulf %169, %173 : vector<8x128xf32>
    %c0_i32_30 = arith.constant 0 : i32
    %175 = vector.broadcast %c0_i32_30 : i32 to vector<1x128xi32>
    %176 = arith.cmpi sge, %0, %175 : vector<1x128xi32>
    %c16_i32 = arith.constant 16 : i32
    %177 = vector.broadcast %c16_i32 : i32 to vector<1x128xi32>
    %178 = arith.cmpi slt, %0, %177 : vector<1x128xi32>
    %179 = arith.andi %176, %178 : vector<1x128xi1>
    %180 = vector.shape_cast %179 : vector<1x128xi1> to vector<1x128xi1>
    %181 = vector.broadcast %180 : vector<1x128xi1> to vector<8x128xi1>
    %182 = arith.select %181, %172, %137 : vector<8x128xi1>, vector<8x128xf32>
    %183 = vector.shape_cast %179 : vector<1x128xi1> to vector<1x128xi1>
    %184 = vector.broadcast %183 : vector<1x128xi1> to vector<8x128xi1>
    %185 = arith.select %184, %174, %140 : vector<8x128xi1>, vector<8x128xf32>
    %186 = vector.extract_strided_slice %1 {offsets = [0, 4], sizes = [8, 1], strides = [1, 1]} : vector<8x128xf32> to vector<8x1xf32>
    %187 = vector.broadcast %186 : vector<8x1xf32> to vector<8x512xf32>
    %188 = vector.broadcast %2 : vector<1x512xf32> to vector<8x512xf32>
    %189 = arith.mulf %187, %188 : vector<8x512xf32>
    %190 = vector.broadcast %3 : vector<1x512xf32> to vector<8x512xf32>
    %191 = arith.addf %190, %189 : vector<8x512xf32>
    %c0_31 = arith.constant 0 : index
    %c0_32 = arith.constant 0 : index
    %192 = vector.load %arg2[%c0_31, %c0_32] : memref<128x512xf32, #tpu.memory_space<vmem>>, vector<128x512xf32>
    %cst_33 = arith.constant dense<0.000000e+00> : vector<8x512xf32>
    %193 = tpu.matmul %185, %192, %cst_33 {dimension_numbers = #tpu.dot_dimension_numbers<[1], [0], [0], [1], [0, 0, 1, 1], [], []>} : vector<8x128xf32>, vector<128x512xf32>, vector<8x512xf32> -> vector<8x512xf32>
    %194 = arith.addf %193, %191 : vector<8x512xf32>
    %195 = vector.extract_strided_slice %194 {offsets = [0, 0], sizes = [8, 128], strides = [1, 1]} : vector<8x512xf32> to vector<8x128xf32>
    %196 = arith.negf %195 : vector<8x128xf32>
    %197 = math.exp %196 : vector<8x128xf32>
    %cst_34 = arith.constant 1.000000e+00 : f32
    %198 = vector.broadcast %cst_34 : f32 to vector<8x128xf32>
    %199 = arith.addf %198, %197 : vector<8x128xf32>
    %200 = arith.divf %198, %199 : vector<8x128xf32>
    %201 = vector.extract_strided_slice %194 {offsets = [0, 128], sizes = [8, 128], strides = [1, 1]} : vector<8x512xf32> to vector<8x128xf32>
    %202 = arith.negf %201 : vector<8x128xf32>
    %203 = math.exp %202 : vector<8x128xf32>
    %cst_35 = arith.constant 1.000000e+00 : f32
    %204 = vector.broadcast %cst_35 : f32 to vector<8x128xf32>
    %205 = arith.addf %204, %203 : vector<8x128xf32>
    %206 = arith.divf %204, %205 : vector<8x128xf32>
    %207 = vector.extract_strided_slice %194 {offsets = [0, 256], sizes = [8, 128], strides = [1, 1]} : vector<8x512xf32> to vector<8x128xf32>
    %208 = math.tanh %207 : vector<8x128xf32>
    %209 = vector.extract_strided_slice %194 {offsets = [0, 384], sizes = [8, 128], strides = [1, 1]} : vector<8x512xf32> to vector<8x128xf32>
    %210 = arith.negf %209 : vector<8x128xf32>
    %211 = math.exp %210 : vector<8x128xf32>
    %cst_36 = arith.constant 1.000000e+00 : f32
    %212 = vector.broadcast %cst_36 : f32 to vector<8x128xf32>
    %213 = arith.addf %212, %211 : vector<8x128xf32>
    %214 = arith.divf %212, %213 : vector<8x128xf32>
    %215 = arith.mulf %206, %182 : vector<8x128xf32>
    %216 = arith.mulf %200, %208 : vector<8x128xf32>
    %217 = arith.addf %215, %216 : vector<8x128xf32>
    %218 = math.tanh %217 : vector<8x128xf32>
    %219 = arith.mulf %214, %218 : vector<8x128xf32>
    %220 = vector.extract_strided_slice %1 {offsets = [0, 5], sizes = [8, 1], strides = [1, 1]} : vector<8x128xf32> to vector<8x1xf32>
    %221 = vector.broadcast %220 : vector<8x1xf32> to vector<8x512xf32>
    %222 = vector.broadcast %2 : vector<1x512xf32> to vector<8x512xf32>
    %223 = arith.mulf %221, %222 : vector<8x512xf32>
    %224 = vector.broadcast %3 : vector<1x512xf32> to vector<8x512xf32>
    %225 = arith.addf %224, %223 : vector<8x512xf32>
    %c0_37 = arith.constant 0 : index
    %c0_38 = arith.constant 0 : index
    %226 = vector.load %arg2[%c0_37, %c0_38] : memref<128x512xf32, #tpu.memory_space<vmem>>, vector<128x512xf32>
    %cst_39 = arith.constant dense<0.000000e+00> : vector<8x512xf32>
    %227 = tpu.matmul %219, %226, %cst_39 {dimension_numbers = #tpu.dot_dimension_numbers<[1], [0], [0], [1], [0, 0, 1, 1], [], []>} : vector<8x128xf32>, vector<128x512xf32>, vector<8x512xf32> -> vector<8x512xf32>
    %228 = arith.addf %227, %225 : vector<8x512xf32>
    %229 = vector.extract_strided_slice %228 {offsets = [0, 0], sizes = [8, 128], strides = [1, 1]} : vector<8x512xf32> to vector<8x128xf32>
    %230 = arith.negf %229 : vector<8x128xf32>
    %231 = math.exp %230 : vector<8x128xf32>
    %cst_40 = arith.constant 1.000000e+00 : f32
    %232 = vector.broadcast %cst_40 : f32 to vector<8x128xf32>
    %233 = arith.addf %232, %231 : vector<8x128xf32>
    %234 = arith.divf %232, %233 : vector<8x128xf32>
    %235 = vector.extract_strided_slice %228 {offsets = [0, 128], sizes = [8, 128], strides = [1, 1]} : vector<8x512xf32> to vector<8x128xf32>
    %236 = arith.negf %235 : vector<8x128xf32>
    %237 = math.exp %236 : vector<8x128xf32>
    %cst_41 = arith.constant 1.000000e+00 : f32
    %238 = vector.broadcast %cst_41 : f32 to vector<8x128xf32>
    %239 = arith.addf %238, %237 : vector<8x128xf32>
    %240 = arith.divf %238, %239 : vector<8x128xf32>
    %241 = vector.extract_strided_slice %228 {offsets = [0, 256], sizes = [8, 128], strides = [1, 1]} : vector<8x512xf32> to vector<8x128xf32>
    %242 = math.tanh %241 : vector<8x128xf32>
    %243 = vector.extract_strided_slice %228 {offsets = [0, 384], sizes = [8, 128], strides = [1, 1]} : vector<8x512xf32> to vector<8x128xf32>
    %244 = arith.negf %243 : vector<8x128xf32>
    %245 = math.exp %244 : vector<8x128xf32>
    %cst_42 = arith.constant 1.000000e+00 : f32
    %246 = vector.broadcast %cst_42 : f32 to vector<8x128xf32>
    %247 = arith.addf %246, %245 : vector<8x128xf32>
    %248 = arith.divf %246, %247 : vector<8x128xf32>
    %249 = arith.mulf %240, %217 : vector<8x128xf32>
    %250 = arith.mulf %234, %242 : vector<8x128xf32>
    %251 = arith.addf %249, %250 : vector<8x128xf32>
    %252 = math.tanh %251 : vector<8x128xf32>
    %253 = arith.mulf %248, %252 : vector<8x128xf32>
    %254 = vector.extract_strided_slice %1 {offsets = [0, 6], sizes = [8, 1], strides = [1, 1]} : vector<8x128xf32> to vector<8x1xf32>
    %255 = vector.broadcast %254 : vector<8x1xf32> to vector<8x512xf32>
    %256 = vector.broadcast %2 : vector<1x512xf32> to vector<8x512xf32>
    %257 = arith.mulf %255, %256 : vector<8x512xf32>
    %258 = vector.broadcast %3 : vector<1x512xf32> to vector<8x512xf32>
    %259 = arith.addf %258, %257 : vector<8x512xf32>
    %c0_43 = arith.constant 0 : index
    %c0_44 = arith.constant 0 : index
    %260 = vector.load %arg2[%c0_43, %c0_44] : memref<128x512xf32, #tpu.memory_space<vmem>>, vector<128x512xf32>
    %cst_45 = arith.constant dense<0.000000e+00> : vector<8x512xf32>
    %261 = tpu.matmul %253, %260, %cst_45 {dimension_numbers = #tpu.dot_dimension_numbers<[1], [0], [0], [1], [0, 0, 1, 1], [], []>} : vector<8x128xf32>, vector<128x512xf32>, vector<8x512xf32> -> vector<8x512xf32>
    %262 = arith.addf %261, %259 : vector<8x512xf32>
    %263 = vector.extract_strided_slice %262 {offsets = [0, 0], sizes = [8, 128], strides = [1, 1]} : vector<8x512xf32> to vector<8x128xf32>
    %264 = arith.negf %263 : vector<8x128xf32>
    %265 = math.exp %264 : vector<8x128xf32>
    %cst_46 = arith.constant 1.000000e+00 : f32
    %266 = vector.broadcast %cst_46 : f32 to vector<8x128xf32>
    %267 = arith.addf %266, %265 : vector<8x128xf32>
    %268 = arith.divf %266, %267 : vector<8x128xf32>
    %269 = vector.extract_strided_slice %262 {offsets = [0, 128], sizes = [8, 128], strides = [1, 1]} : vector<8x512xf32> to vector<8x128xf32>
    %270 = arith.negf %269 : vector<8x128xf32>
    %271 = math.exp %270 : vector<8x128xf32>
    %cst_47 = arith.constant 1.000000e+00 : f32
    %272 = vector.broadcast %cst_47 : f32 to vector<8x128xf32>
    %273 = arith.addf %272, %271 : vector<8x128xf32>
    %274 = arith.divf %272, %273 : vector<8x128xf32>
    %275 = vector.extract_strided_slice %262 {offsets = [0, 256], sizes = [8, 128], strides = [1, 1]} : vector<8x512xf32> to vector<8x128xf32>
    %276 = math.tanh %275 : vector<8x128xf32>
    %277 = vector.extract_strided_slice %262 {offsets = [0, 384], sizes = [8, 128], strides = [1, 1]} : vector<8x512xf32> to vector<8x128xf32>
    %278 = arith.negf %277 : vector<8x128xf32>
    %279 = math.exp %278 : vector<8x128xf32>
    %cst_48 = arith.constant 1.000000e+00 : f32
    %280 = vector.broadcast %cst_48 : f32 to vector<8x128xf32>
    %281 = arith.addf %280, %279 : vector<8x128xf32>
    %282 = arith.divf %280, %281 : vector<8x128xf32>
    %283 = arith.mulf %274, %251 : vector<8x128xf32>
    %284 = arith.mulf %268, %276 : vector<8x128xf32>
    %285 = arith.addf %283, %284 : vector<8x128xf32>
    %286 = math.tanh %285 : vector<8x128xf32>
    %287 = arith.mulf %282, %286 : vector<8x128xf32>
    %288 = vector.extract_strided_slice %1 {offsets = [0, 7], sizes = [8, 1], strides = [1, 1]} : vector<8x128xf32> to vector<8x1xf32>
    %289 = vector.broadcast %288 : vector<8x1xf32> to vector<8x512xf32>
    %290 = vector.broadcast %2 : vector<1x512xf32> to vector<8x512xf32>
    %291 = arith.mulf %289, %290 : vector<8x512xf32>
    %292 = vector.broadcast %3 : vector<1x512xf32> to vector<8x512xf32>
    %293 = arith.addf %292, %291 : vector<8x512xf32>
    %c0_49 = arith.constant 0 : index
    %c0_50 = arith.constant 0 : index
    %294 = vector.load %arg2[%c0_49, %c0_50] : memref<128x512xf32, #tpu.memory_space<vmem>>, vector<128x512xf32>
    %cst_51 = arith.constant dense<0.000000e+00> : vector<8x512xf32>
    %295 = tpu.matmul %287, %294, %cst_51 {dimension_numbers = #tpu.dot_dimension_numbers<[1], [0], [0], [1], [0, 0, 1, 1], [], []>} : vector<8x128xf32>, vector<128x512xf32>, vector<8x512xf32> -> vector<8x512xf32>
    %296 = arith.addf %295, %293 : vector<8x512xf32>
    %297 = vector.extract_strided_slice %296 {offsets = [0, 0], sizes = [8, 128], strides = [1, 1]} : vector<8x512xf32> to vector<8x128xf32>
    %298 = arith.negf %297 : vector<8x128xf32>
    %299 = math.exp %298 : vector<8x128xf32>
    %cst_52 = arith.constant 1.000000e+00 : f32
    %300 = vector.broadcast %cst_52 : f32 to vector<8x128xf32>
    %301 = arith.addf %300, %299 : vector<8x128xf32>
    %302 = arith.divf %300, %301 : vector<8x128xf32>
    %303 = vector.extract_strided_slice %296 {offsets = [0, 128], sizes = [8, 128], strides = [1, 1]} : vector<8x512xf32> to vector<8x128xf32>
    %304 = arith.negf %303 : vector<8x128xf32>
    %305 = math.exp %304 : vector<8x128xf32>
    %cst_53 = arith.constant 1.000000e+00 : f32
    %306 = vector.broadcast %cst_53 : f32 to vector<8x128xf32>
    %307 = arith.addf %306, %305 : vector<8x128xf32>
    %308 = arith.divf %306, %307 : vector<8x128xf32>
    %309 = vector.extract_strided_slice %296 {offsets = [0, 256], sizes = [8, 128], strides = [1, 1]} : vector<8x512xf32> to vector<8x128xf32>
    %310 = math.tanh %309 : vector<8x128xf32>
    %311 = vector.extract_strided_slice %296 {offsets = [0, 384], sizes = [8, 128], strides = [1, 1]} : vector<8x512xf32> to vector<8x128xf32>
    %312 = arith.negf %311 : vector<8x128xf32>
    %313 = math.exp %312 : vector<8x128xf32>
    %cst_54 = arith.constant 1.000000e+00 : f32
    %314 = vector.broadcast %cst_54 : f32 to vector<8x128xf32>
    %315 = arith.addf %314, %313 : vector<8x128xf32>
    %316 = arith.divf %314, %315 : vector<8x128xf32>
    %317 = arith.mulf %308, %285 : vector<8x128xf32>
    %318 = arith.mulf %302, %310 : vector<8x128xf32>
    %319 = arith.addf %317, %318 : vector<8x128xf32>
    %320 = math.tanh %319 : vector<8x128xf32>
    %321 = arith.mulf %316, %320 : vector<8x128xf32>
    %c0_55 = arith.constant 0 : index
    %c0_56 = arith.constant 0 : index
    %322 = vector.load %arg2[%c0_55, %c0_56] : memref<128x512xf32, #tpu.memory_space<vmem>>, vector<128x512xf32>
    %cst_57 = arith.constant dense<0.000000e+00> : vector<8x512xf32>
    %323 = tpu.matmul %321, %322, %cst_57 {dimension_numbers = #tpu.dot_dimension_numbers<[1], [0], [0], [1], [0, 0, 1, 1], [], []>} : vector<8x128xf32>, vector<128x512xf32>, vector<8x512xf32> -> vector<8x512xf32>
    %324 = vector.broadcast %3 : vector<1x512xf32> to vector<8x512xf32>
    %325 = arith.addf %323, %324 : vector<8x512xf32>
    %326 = vector.extract_strided_slice %325 {offsets = [0, 0], sizes = [8, 128], strides = [1, 1]} : vector<8x512xf32> to vector<8x128xf32>
    %327 = arith.negf %326 : vector<8x128xf32>
    %328 = math.exp %327 : vector<8x128xf32>
    %cst_58 = arith.constant 1.000000e+00 : f32
    %329 = vector.broadcast %cst_58 : f32 to vector<8x128xf32>
    %330 = arith.addf %329, %328 : vector<8x128xf32>
    %331 = arith.divf %329, %330 : vector<8x128xf32>
    %332 = vector.extract_strided_slice %325 {offsets = [0, 128], sizes = [8, 128], strides = [1, 1]} : vector<8x512xf32> to vector<8x128xf32>
    %333 = arith.negf %332 : vector<8x128xf32>
    %334 = math.exp %333 : vector<8x128xf32>
    %cst_59 = arith.constant 1.000000e+00 : f32
    %335 = vector.broadcast %cst_59 : f32 to vector<8x128xf32>
    %336 = arith.addf %335, %334 : vector<8x128xf32>
    %337 = arith.divf %335, %336 : vector<8x128xf32>
    %338 = vector.extract_strided_slice %325 {offsets = [0, 256], sizes = [8, 128], strides = [1, 1]} : vector<8x512xf32> to vector<8x128xf32>
    %339 = math.tanh %338 : vector<8x128xf32>
    %340 = vector.extract_strided_slice %325 {offsets = [0, 384], sizes = [8, 128], strides = [1, 1]} : vector<8x512xf32> to vector<8x128xf32>
    %341 = arith.negf %340 : vector<8x128xf32>
    %342 = math.exp %341 : vector<8x128xf32>
    %cst_60 = arith.constant 1.000000e+00 : f32
    %343 = vector.broadcast %cst_60 : f32 to vector<8x128xf32>
    %344 = arith.addf %343, %342 : vector<8x128xf32>
    %345 = arith.divf %343, %344 : vector<8x128xf32>
    %346 = arith.mulf %337, %319 : vector<8x128xf32>
    %347 = arith.mulf %331, %339 : vector<8x128xf32>
    %348 = arith.addf %346, %347 : vector<8x128xf32>
    %349 = math.tanh %348 : vector<8x128xf32>
    %350 = arith.mulf %345, %349 : vector<8x128xf32>
    %c4_i32_61 = arith.constant 4 : i32
    %351 = vector.broadcast %c4_i32_61 : i32 to vector<1x128xi32>
    %352 = arith.cmpi sge, %0, %351 : vector<1x128xi32>
    %c20_i32 = arith.constant 20 : i32
    %353 = vector.broadcast %c20_i32 : i32 to vector<1x128xi32>
    %354 = arith.cmpi slt, %0, %353 : vector<1x128xi32>
    %355 = arith.andi %352, %354 : vector<1x128xi1>
    %356 = vector.shape_cast %355 : vector<1x128xi1> to vector<1x128xi1>
    %357 = vector.broadcast %356 : vector<1x128xi1> to vector<8x128xi1>
    %358 = arith.select %357, %348, %319 : vector<8x128xi1>, vector<8x128xf32>
    %359 = vector.shape_cast %355 : vector<1x128xi1> to vector<1x128xi1>
    %360 = vector.broadcast %359 : vector<1x128xi1> to vector<8x128xi1>
    %361 = arith.select %360, %350, %321 : vector<8x128xi1>, vector<8x128xf32>
    %c0_62 = arith.constant 0 : index
    %c0_63 = arith.constant 0 : index
    %362 = vector.load %arg2[%c0_62, %c0_63] : memref<128x512xf32, #tpu.memory_space<vmem>>, vector<128x512xf32>
    %cst_64 = arith.constant dense<0.000000e+00> : vector<8x512xf32>
    %363 = tpu.matmul %361, %362, %cst_64 {dimension_numbers = #tpu.dot_dimension_numbers<[1], [0], [0], [1], [0, 0, 1, 1], [], []>} : vector<8x128xf32>, vector<128x512xf32>, vector<8x512xf32> -> vector<8x512xf32>
    %364 = vector.broadcast %3 : vector<1x512xf32> to vector<8x512xf32>
    %365 = arith.addf %363, %364 : vector<8x512xf32>
    %366 = vector.extract_strided_slice %365 {offsets = [0, 0], sizes = [8, 128], strides = [1, 1]} : vector<8x512xf32> to vector<8x128xf32>
    %367 = arith.negf %366 : vector<8x128xf32>
    %368 = math.exp %367 : vector<8x128xf32>
    %cst_65 = arith.constant 1.000000e+00 : f32
    %369 = vector.broadcast %cst_65 : f32 to vector<8x128xf32>
    %370 = arith.addf %369, %368 : vector<8x128xf32>
    %371 = arith.divf %369, %370 : vector<8x128xf32>
    %372 = vector.extract_strided_slice %365 {offsets = [0, 128], sizes = [8, 128], strides = [1, 1]} : vector<8x512xf32> to vector<8x128xf32>
    %373 = arith.negf %372 : vector<8x128xf32>
    %374 = math.exp %373 : vector<8x128xf32>
    %cst_66 = arith.constant 1.000000e+00 : f32
    %375 = vector.broadcast %cst_66 : f32 to vector<8x128xf32>
    %376 = arith.addf %375, %374 : vector<8x128xf32>
    %377 = arith.divf %375, %376 : vector<8x128xf32>
    %378 = vector.extract_strided_slice %365 {offsets = [0, 256], sizes = [8, 128], strides = [1, 1]} : vector<8x512xf32> to vector<8x128xf32>
    %379 = math.tanh %378 : vector<8x128xf32>
    %380 = vector.extract_strided_slice %365 {offsets = [0, 384], sizes = [8, 128], strides = [1, 1]} : vector<8x512xf32> to vector<8x128xf32>
    %381 = arith.negf %380 : vector<8x128xf32>
    %382 = math.exp %381 : vector<8x128xf32>
    %cst_67 = arith.constant 1.000000e+00 : f32
    %383 = vector.broadcast %cst_67 : f32 to vector<8x128xf32>
    %384 = arith.addf %383, %382 : vector<8x128xf32>
    %385 = arith.divf %383, %384 : vector<8x128xf32>
    %386 = arith.mulf %377, %358 : vector<8x128xf32>
    %387 = arith.mulf %371, %379 : vector<8x128xf32>
    %388 = arith.addf %386, %387 : vector<8x128xf32>
    %389 = math.tanh %388 : vector<8x128xf32>
    %390 = arith.mulf %385, %389 : vector<8x128xf32>
    %c8_i32_68 = arith.constant 8 : i32
    %391 = vector.broadcast %c8_i32_68 : i32 to vector<1x128xi32>
    %392 = arith.cmpi sge, %0, %391 : vector<1x128xi32>
    %c20_i32_69 = arith.constant 20 : i32
    %393 = vector.broadcast %c20_i32_69 : i32 to vector<1x128xi32>
    %394 = arith.cmpi slt, %0, %393 : vector<1x128xi32>
    %395 = arith.andi %392, %394 : vector<1x128xi1>
    %396 = vector.shape_cast %395 : vector<1x128xi1> to vector<1x128xi1>
    %397 = vector.broadcast %396 : vector<1x128xi1> to vector<8x128xi1>
    %398 = arith.select %397, %388, %358 : vector<8x128xi1>, vector<8x128xf32>
    %399 = vector.shape_cast %395 : vector<1x128xi1> to vector<1x128xi1>
    %400 = vector.broadcast %399 : vector<1x128xi1> to vector<8x128xi1>
    %401 = arith.select %400, %390, %361 : vector<8x128xi1>, vector<8x128xf32>
    %c0_70 = arith.constant 0 : index
    %c0_71 = arith.constant 0 : index
    %402 = vector.load %arg2[%c0_70, %c0_71] : memref<128x512xf32, #tpu.memory_space<vmem>>, vector<128x512xf32>
    %cst_72 = arith.constant dense<0.000000e+00> : vector<8x512xf32>
    %403 = tpu.matmul %401, %402, %cst_72 {dimension_numbers = #tpu.dot_dimension_numbers<[1], [0], [0], [1], [0, 0, 1, 1], [], []>} : vector<8x128xf32>, vector<128x512xf32>, vector<8x512xf32> -> vector<8x512xf32>
    %404 = vector.broadcast %3 : vector<1x512xf32> to vector<8x512xf32>
    %405 = arith.addf %403, %404 : vector<8x512xf32>
    %406 = vector.extract_strided_slice %405 {offsets = [0, 0], sizes = [8, 128], strides = [1, 1]} : vector<8x512xf32> to vector<8x128xf32>
    %407 = arith.negf %406 : vector<8x128xf32>
    %408 = math.exp %407 : vector<8x128xf32>
    %cst_73 = arith.constant 1.000000e+00 : f32
    %409 = vector.broadcast %cst_73 : f32 to vector<8x128xf32>
    %410 = arith.addf %409, %408 : vector<8x128xf32>
    %411 = arith.divf %409, %410 : vector<8x128xf32>
    %412 = vector.extract_strided_slice %405 {offsets = [0, 128], sizes = [8, 128], strides = [1, 1]} : vector<8x512xf32> to vector<8x128xf32>
    %413 = arith.negf %412 : vector<8x128xf32>
    %414 = math.exp %413 : vector<8x128xf32>
    %cst_74 = arith.constant 1.000000e+00 : f32
    %415 = vector.broadcast %cst_74 : f32 to vector<8x128xf32>
    %416 = arith.addf %415, %414 : vector<8x128xf32>
    %417 = arith.divf %415, %416 : vector<8x128xf32>
    %418 = vector.extract_strided_slice %405 {offsets = [0, 256], sizes = [8, 128], strides = [1, 1]} : vector<8x512xf32> to vector<8x128xf32>
    %419 = math.tanh %418 : vector<8x128xf32>
    %420 = vector.extract_strided_slice %405 {offsets = [0, 384], sizes = [8, 128], strides = [1, 1]} : vector<8x512xf32> to vector<8x128xf32>
    %421 = arith.negf %420 : vector<8x128xf32>
    %422 = math.exp %421 : vector<8x128xf32>
    %cst_75 = arith.constant 1.000000e+00 : f32
    %423 = vector.broadcast %cst_75 : f32 to vector<8x128xf32>
    %424 = arith.addf %423, %422 : vector<8x128xf32>
    %425 = arith.divf %423, %424 : vector<8x128xf32>
    %426 = arith.mulf %417, %398 : vector<8x128xf32>
    %427 = arith.mulf %411, %419 : vector<8x128xf32>
    %428 = arith.addf %426, %427 : vector<8x128xf32>
    %429 = math.tanh %428 : vector<8x128xf32>
    %430 = arith.mulf %425, %429 : vector<8x128xf32>
    %c12_i32_76 = arith.constant 12 : i32
    %431 = vector.broadcast %c12_i32_76 : i32 to vector<1x128xi32>
    %432 = arith.cmpi sge, %0, %431 : vector<1x128xi32>
    %c20_i32_77 = arith.constant 20 : i32
    %433 = vector.broadcast %c20_i32_77 : i32 to vector<1x128xi32>
    %434 = arith.cmpi slt, %0, %433 : vector<1x128xi32>
    %435 = arith.andi %432, %434 : vector<1x128xi1>
    %436 = vector.shape_cast %435 : vector<1x128xi1> to vector<1x128xi1>
    %437 = vector.broadcast %436 : vector<1x128xi1> to vector<8x128xi1>
    %438 = arith.select %437, %428, %398 : vector<8x128xi1>, vector<8x128xf32>
    %439 = vector.shape_cast %435 : vector<1x128xi1> to vector<1x128xi1>
    %440 = vector.broadcast %439 : vector<1x128xi1> to vector<8x128xi1>
    %441 = arith.select %440, %430, %401 : vector<8x128xi1>, vector<8x128xf32>
    %c0_78 = arith.constant 0 : index
    %c0_79 = arith.constant 0 : index
    %442 = vector.load %arg2[%c0_78, %c0_79] : memref<128x512xf32, #tpu.memory_space<vmem>>, vector<128x512xf32>
    %cst_80 = arith.constant dense<0.000000e+00> : vector<8x512xf32>
    %443 = tpu.matmul %441, %442, %cst_80 {dimension_numbers = #tpu.dot_dimension_numbers<[1], [0], [0], [1], [0, 0, 1, 1], [], []>} : vector<8x128xf32>, vector<128x512xf32>, vector<8x512xf32> -> vector<8x512xf32>
    %444 = vector.broadcast %3 : vector<1x512xf32> to vector<8x512xf32>
    %445 = arith.addf %443, %444 : vector<8x512xf32>
    %446 = vector.extract_strided_slice %445 {offsets = [0, 0], sizes = [8, 128], strides = [1, 1]} : vector<8x512xf32> to vector<8x128xf32>
    %447 = arith.negf %446 : vector<8x128xf32>
    %448 = math.exp %447 : vector<8x128xf32>
    %cst_81 = arith.constant 1.000000e+00 : f32
    %449 = vector.broadcast %cst_81 : f32 to vector<8x128xf32>
    %450 = arith.addf %449, %448 : vector<8x128xf32>
    %451 = arith.divf %449, %450 : vector<8x128xf32>
    %452 = vector.extract_strided_slice %445 {offsets = [0, 128], sizes = [8, 128], strides = [1, 1]} : vector<8x512xf32> to vector<8x128xf32>
    %453 = arith.negf %452 : vector<8x128xf32>
    %454 = math.exp %453 : vector<8x128xf32>
    %cst_82 = arith.constant 1.000000e+00 : f32
    %455 = vector.broadcast %cst_82 : f32 to vector<8x128xf32>
    %456 = arith.addf %455, %454 : vector<8x128xf32>
    %457 = arith.divf %455, %456 : vector<8x128xf32>
    %458 = vector.extract_strided_slice %445 {offsets = [0, 256], sizes = [8, 128], strides = [1, 1]} : vector<8x512xf32> to vector<8x128xf32>
    %459 = math.tanh %458 : vector<8x128xf32>
    %460 = vector.extract_strided_slice %445 {offsets = [0, 384], sizes = [8, 128], strides = [1, 1]} : vector<8x512xf32> to vector<8x128xf32>
    %461 = arith.negf %460 : vector<8x128xf32>
    %462 = math.exp %461 : vector<8x128xf32>
    %cst_83 = arith.constant 1.000000e+00 : f32
    %463 = vector.broadcast %cst_83 : f32 to vector<8x128xf32>
    %464 = arith.addf %463, %462 : vector<8x128xf32>
    %465 = arith.divf %463, %464 : vector<8x128xf32>
    %466 = arith.mulf %457, %438 : vector<8x128xf32>
    %467 = arith.mulf %451, %459 : vector<8x128xf32>
    %468 = arith.addf %466, %467 : vector<8x128xf32>
    %469 = math.tanh %468 : vector<8x128xf32>
    %470 = arith.mulf %465, %469 : vector<8x128xf32>
    %c16_i32_84 = arith.constant 16 : i32
    %471 = vector.broadcast %c16_i32_84 : i32 to vector<1x128xi32>
    %472 = arith.cmpi sge, %0, %471 : vector<1x128xi32>
    %c20_i32_85 = arith.constant 20 : i32
    %473 = vector.broadcast %c20_i32_85 : i32 to vector<1x128xi32>
    %474 = arith.cmpi slt, %0, %473 : vector<1x128xi32>
    %475 = arith.andi %472, %474 : vector<1x128xi1>
    %476 = vector.shape_cast %475 : vector<1x128xi1> to vector<1x128xi1>
    %477 = vector.broadcast %476 : vector<1x128xi1> to vector<8x128xi1>
    %478 = arith.select %477, %470, %441 : vector<8x128xi1>, vector<8x128xf32>
    %c20_86 = arith.constant 20 : index
    %c0_87 = arith.constant 0 : index
    %479 = vector.load %arg3[%c20_86, %c0_87] : memref<128x128xf32, #tpu.memory_space<vmem>>, vector<1x128xf32>
    %c0_88 = arith.constant 0 : index
    %c0_89 = arith.constant 0 : index
    %480 = vector.load %arg3[%c0_88, %c0_89] : memref<128x128xf32, #tpu.memory_space<vmem>>, vector<128x128xf32>
    %cst_90 = arith.constant dense<0.000000e+00> : vector<8x128xf32>
    %481 = tpu.matmul %478, %480, %cst_90 {dimension_numbers = #tpu.dot_dimension_numbers<[1], [0], [0], [1], [0, 0, 1, 1], [], []>} : vector<8x128xf32>, vector<128x128xf32>, vector<8x128xf32> -> vector<8x128xf32>
    %482 = vector.broadcast %479 : vector<1x128xf32> to vector<8x128xf32>
    %483 = arith.addf %481, %482 : vector<8x128xf32>
    %c0_91 = arith.constant 0 : index
    %c0_92 = arith.constant 0 : index
    %484 = vector.load %arg4[%c0_91, %c0_92] : memref<8x128xf32, #tpu.memory_space<vmem>>, vector<8x128xf32>
    tpu.vector_store %arg4[%c0_91, %c0_92], %483 {strides = array<i32>} : memref<8x128xf32, #tpu.memory_space<vmem>>, vector<8x128xf32>,
    return
  }
  func.func @transform_0(%arg0: i32) -> (i32, i32) {
    %c0_i32 = arith.constant 0 : i32
    %c0_i32_0 = arith.constant 0 : i32
    return %arg0, %c0_i32 : i32, i32
  }
  func.func @transform_1(%arg0: i32) -> (i32, i32) {
    %c0_i32 = arith.constant 0 : i32
    %c0_i32_0 = arith.constant 0 : i32
    %c0_i32_1 = arith.constant 0 : i32
    return %c0_i32, %c0_i32_0 : i32, i32
  }
  func.func @transform_2(%arg0: i32) -> (i32, i32) {
    %c0_i32 = arith.constant 0 : i32
    %c0_i32_0 = arith.constant 0 : i32
    %c0_i32_1 = arith.constant 0 : i32
    return %c0_i32, %c0_i32_0 : i32, i32
  }
  func.func @transform_3(%arg0: i32) -> (i32, i32) {
    %c0_i32 = arith.constant 0 : i32
    %c0_i32_0 = arith.constant 0 : i32
    return %arg0, %c0_i32 : i32, i32
  }
}

</mosaic_0001>

<bundles_post_ra>
// kernel: outlier_detect_forward.1
= control target key start
LH: loop header
LB: loop body
LE: loop exit
PB: predicated region body
PF: predicated region fallthrough
CT: control target
= control target key end

     0   :  { %8 = vsyncpa [#allocation3], 0  ;;  %s4682_s0 = inlined_call_operand.vmem [shape: f32[16,128], index: 0, kind: input, shape index: {}]   ;;  %s4683_s1 = inlined_call_operand.hbm [shape: f32[128,512], index: 1, kind: input, shape index: {}]   ;;  %s4684_s2 = inlined_call_operand.hbm [shape: f32[128,128], index: 2, kind: input, shape index: {}]   ;;  %s4685_s3 = inlined_call_operand.vmem [shape: f32[16,128], index: 3, kind: output, shape index: {}]  }
   0x1   :  { %9 = vsyncpa [#allocation5], 0  ;;  %s3195_s12 = smov 0  }
   0x2 LB: > { %s3159_s13 = smov [#allocation2]   ;;  %s3201_s15 = sadd.s32 4294967295, %s3157_s12   ;;  %s3157_s12 = sphi %s3195_s12, %s15_s12  }
   0x3   : > { %s126_s14 = sshll.u32 %s3159_s13, 4  ;;  %p2616_p0 = scmp.ge.s32.totalorder %s3157_s12, 1  ;;  %s127_s14 = int_to_ptr.vmem [resolvable:$true] %s126_s14 }
   0x4   : > { %p114_p1 = scmp.lt.s32.totalorder %s3157_s12, 3  ;;  %p2733_p3 = scmp.eq.s32.totalorder %s3201_s15, 0 }
   0x5   : > { %s3160_s17 = smov [#allocation4]   ;;  %s3102_s20 = scalar_lea.vmem %s127_s14, 8192 }
   0x6   : > { %p3205_p2 = pnand %p2616_p0, %p114_p1  ;;  %s139_s18 = sshll.u32 %s3160_s17, 4  ;;  %s140_s18 = int_to_ptr.vmem [resolvable:$true] %s139_s18 }
   0x7   : > { %p3103_p7 = scmp.ne.s32.totalorder %s127_s14, %s3102_s20  ;;  %p3110_p10 = scmp.lt.s32.totalorder %s127_s14, %s127_s14 }
   0x8   : > { %p2726_p4 = pneg %p3205_p2  ;;  %p3111_p11 = scmp.lt.s32.totalorder %s3102_s20, %s3102_s20 }
   0xa   : > { %p3214_p5 = pnand %p2733_p3, %p2726_p4  ;;  %p3112_p12 = por %p3111_p11, %p3110_p10 }
   0xc   : > { %p3093_p6 = pneg %p3214_p5 }
   0xe   : > { %p3105_p8 = pnand %p3103_p7, %p3093_p6 }
  0x10   : > { %p3106_p9 = pneg %p3105_p8 }
  0x12   : > { %p3113_p13 = pnand %p3112_p12, %p3106_p9 }
  0x14   : > { %3116 = shalt.err (!%p3113_p13)
}
  0x15   : > { %s3161_s21 = smov 512   ;;  %s3162_s22 = smov 32  }
  0x16   : > { %2729 = dma.hbm_to_vmem [thread:$0]  (!%p3214_p5), %s4683_s1, 8192, %s127_s14, [#allocation3], %s3161_s21, %s3161_s21, %s3162_s22  }
  0x17   : > { %s3128_s25 = scalar_lea.vmem %s140_s18, 2048  ;;  %p3136_p7 = scmp.lt.s32.totalorder %s140_s18, %s140_s18 }
  0x18   : > { %p3129_p0 = scmp.ne.s32.totalorder %s140_s18, %s3128_s25  ;;  %p3137_p8 = scmp.lt.s32.totalorder %s3128_s25, %s3128_s25 }
  0x1a   : > { %p3131_p1 = pnand %p3129_p0, %p3093_p6  ;;  %p3138_p10 = por %p3137_p8, %p3136_p7 }
  0x1c   : > { %p3132_p4 = pneg %p3131_p1 }
  0x1e   : > { %p3139_p9 = pnand %p3138_p10, %p3132_p4 }
  0x20   : > { %3142 = shalt.err (!%p3139_p9)
}
  0x21   : > { %s3163_s26 = smov 128   ;;  %s3164_s27 = smov 8  }
  0x22   : > { %2732 = dma.hbm_to_vmem [thread:$0]  (!%p3214_p5), %s4684_s2, 2048, %s140_s18, [#allocation5], %s3163_s26, %s3163_s26, %s3164_s27  }
  0x23   : > { %162 = sbr.rel (%p3205_p2) target bundleno = 3268 (0xcc4), region = 32 }
  0x28   : > { %3148 = dma.done.wait (%p2733_p3), [#allocation3], 8192  }
  0x29   : > { %3150 = vsyncadd (%p2733_p3), [#allocation3], 4294959104 }
  0x2a   : > { %3152 = dma.done.wait (%p2733_p3), [#allocation5], 2048  }
  0x2b   : > { %3154 = vsyncadd (%p2733_p3), [#allocation5], 4294965248  ;;  %v4686_v0 = vmov 0.0   ;;  %v3166_v1 = vmov 0   ;;  %v3248_v2 = vld [vmem:[#allocation2 + $0x1e8] sm:$0xff]  ;;  %v3250_v3 = vld [vmem:[#allocation2 + $0x1f8] sm:$0xff] }
  0x2c   : > { %386 = vmatprep.mubr.f32.mxu0 %v4686_v0  ;;  %457 = vmatprep.mubr.f32.mxu1 %v4686_v0  ;;  %4834 = vst [vmem:[#allocation8_spill] sm:$0xff] %v3248_v2  ;;  %4835 = vst [vmem:[#allocation9_spill] sm:$0xff] %v3250_v3  ;;  %v3252_v4 = vld [vmem:[#allocation2 + $0x1e0] sm:$0xff]  ;;  %v3256_v5 = vld [vmem:[#allocation2 + $0x1f0] sm:$0xff]  ;;  %p188_p2 = scmp.lt.s32.totalorder %s3201_s15, 1  ;;  %vm3174_vm11 = vmmov 0  }
  0x2d   : > { %2761 = vset.pattern.permute.xlu0 %v3166_v1  ;;  %322 = vmatprep.subr.mxu0 %v3248_v2  ;;  %v3258_v6 = vld [vmem:[#allocation2 + $0x1c8] sm:$0xff]  ;;  %v3260_v7 = vld [vmem:[#allocation2 + $0x1d8] sm:$0xff]  ;;  %v3264_v8 = vld [vmem:[#allocation2 + $0x1c0] sm:$0xff] }
  0x2e   : > { %393 = vmatprep.subr.mxu1 %v3250_v3  ;;  %323 = vmatpush1.msra.mxu0 %v3252_v4  ;;  %v3266_v9 = vld [vmem:[#allocation2 + $0x1d0] sm:$0xff]  ;;  %v3268_v10 = vld [vmem:[#allocation2 + $0x1a8] sm:$0xff]  ;;  %v3272_v11 = vld [vmem:[#allocation2 + $0x1b8] sm:$0xff]  ;;  %s5139_s15 = smov (!%p188_p2, %s3201_s15), 1 }
  0x2f   : > { %394 = vmatpush1.msra.mxu1 %v3256_v5  ;;  %324 = vmatprep.subr.mxu0 %v3258_v6  ;;  %v3274_v12 = vld [vmem:[#allocation2 + $0x1a0] sm:$0xff]  ;;  %v3276_v13 = vld [vmem:[#allocation2 + $0x1b0] sm:$0xff]  ;;  %v3280_v14 = vld [vmem:[#allocation2 + $0x188] sm:$0xff]  ;;  %s2623_s30 = sshll.u32 %s5139_s15, 3 }
  0x30   : > { %395 = vmatprep.subr.mxu1 %v3260_v7  ;;  %325 = vmatpush1.msra.mxu0 %v3264_v8  ;;  %v3282_v15 = vld [vmem:[#allocation2 + $0x198] sm:$0xff]  ;;  %v3286_v16 = vld [vmem:[#allocation2 + $0x180] sm:$0xff]  ;;  %v3288_v17 = vld [vmem:[#allocation2 + $0x190] sm:$0xff]  ;;  %s3440_s6 = scalar_lea.vmem %s4682_s0, %s2623_s30  ;;  %s195_s9 = scalar_lea.vmem %s4685_s3, %s2623_s30 }
  0x31   : > { %396 = vmatpush1.msra.mxu1 %v3266_v9  ;;  %326 = vmatprep.subr.mxu0 %v3268_v10  ;;  %v3292_v18 = vld [vmem:[#allocation2 + $0x168] sm:$0xff]  ;;  %v3294_v19 = vld [vmem:[#allocation2 + $0x178] sm:$0xff]  ;;  %v3298_v20 = vld [vmem:[#allocation2 + $0x160] sm:$0xff] }
  0x32   : > { %397 = vmatprep.subr.mxu1 %v3272_v11  ;;  %327 = vmatpush1.msra.mxu0 %v3274_v12  ;;  %v3300_v21 = vld [vmem:[#allocation2 + $0x170] sm:$0xff]  ;;  %v3304_v22 = vld [vmem:[#allocation2 + $0x148] sm:$0xff]  ;;  %v3306_v23 = vld [vmem:[#allocation2 + $0x158] sm:$0xff] }
  0x33   : > { %398 = vmatpush1.msra.mxu1 %v3276_v13  ;;  %328 = vmatprep.subr.mxu0 %v3280_v14  ;;  %v3310_v24 = vld [vmem:[#allocation2 + $0x140] sm:$0xff]  ;;  %v3312_v25 = vld [vmem:[#allocation2 + $0x150] sm:$0xff]  ;;  %v3316_v26 = vld [vmem:[#allocation2 + $0x128] sm:$0xff] }
  0x34   : > { %399 = vmatprep.subr.mxu1 %v3282_v15  ;;  %329 = vmatpush1.msra.mxu0 %v3286_v16  ;;  %v3318_v27 = vld [vmem:[#allocation2 + $0x138] sm:$0xff]  ;;  %v3322_v28 = vld [vmem:[#allocation2 + $0x120] sm:$0xff]  ;;  %v3324_v29 = vld [vmem:[#allocation2 + $0x130] sm:$0xff] }
  0x35   : > { %400 = vmatpush1.msra.mxu1 %v3288_v17  ;;  %330 = vmatprep.subr.mxu0 %v3292_v18  ;;  %v3328_v30 = vld [vmem:[#allocation2 + $0x108] sm:$0xff]  ;;  %v3330_v31 = vld [vmem:[#allocation2 + $0x118] sm:$0xff]  ;;  %v3334_v32 = vld [vmem:[#allocation2 + $0x100] sm:$0xff] }
  0x36   : > { %401 = vmatprep.subr.mxu1 %v3294_v19  ;;  %331 = vmatpush1.msra.mxu0 %v3298_v20  ;;  %v3336_v33 = vld [vmem:[#allocation2 + $0x110] sm:$0xff]  ;;  %v3340_v34 = vld [vmem:[#allocation2 + $0xe8] sm:$0xff]  ;;  %v3342_v35 = vld [vmem:[#allocation2 + $0xf8] sm:$0xff] }
  0x37   : > { %402 = vmatpush1.msra.mxu1 %v3300_v21  ;;  %332 = vmatprep.subr.mxu0 %v3304_v22  ;;  %v3346_v36 = vld [vmem:[#allocation2 + $0xe0] sm:$0xff]  ;;  %v3348_v37 = vld [vmem:[#allocation2 + $0xf0] sm:$0xff]  ;;  %v3352_v38 = vld [vmem:[#allocation2 + $0xc8] sm:$0xff] }
  0x38   : > { %403 = vmatprep.subr.mxu1 %v3306_v23  ;;  %333 = vmatpush1.msra.mxu0 %v3310_v24  ;;  %v3354_v39 = vld [vmem:[#allocation2 + $0xd8] sm:$0xff]  ;;  %v3358_v40 = vld [vmem:[#allocation2 + $0xc0] sm:$0xff]  ;;  %v3360_v41 = vld [vmem:[#allocation2 + $0xd0] sm:$0xff] }
  0x39   : > { %404 = vmatpush1.msra.mxu1 %v3312_v25  ;;  %334 = vmatprep.subr.mxu0 %v3316_v26  ;;  %v3365_v42 = vld [vmem:[#allocation2 + $0xa8] sm:$0xff]  ;;  %v3367_v43 = vld [vmem:[#allocation2 + $0xb8] sm:$0xff]  ;;  %v3371_v44 = vld [vmem:[#allocation2 + $0xa0] sm:$0xff] }
  0x3a   : > { %405 = vmatprep.subr.mxu1 %v3318_v27  ;;  %335 = vmatpush1.msra.mxu0 %v3322_v28  ;;  %4836 = vst [vmem:[#allocation10_spill] sm:$0xff] %v3365_v42  ;;  %4837 = vst [vmem:[#allocation11_spill] sm:$0xff] %v3367_v43  ;;  %v3373_v45 = vld [vmem:[#allocation2 + $0xb0] sm:$0xff]  ;;  %v3377_v46 = vld [vmem:[#allocation2 + $0x88] sm:$0xff] }
  0x3b   : > { %406 = vmatpush1.msra.mxu1 %v3324_v29  ;;  %336 = vmatprep.subr.mxu0 %v3328_v30  ;;  %4838 = vst [vmem:[#allocation12_spill] sm:$0xff] %v3371_v44  ;;  %4839 = vst [vmem:[#allocation13_spill] sm:$0xff] %v3373_v45  ;;  %v3379_v47 = vld [vmem:[#allocation2 + $0x98] sm:$0xff]  ;;  %v3383_v48 = vld [vmem:[#allocation2 + $0x80] sm:$0xff] }
  0x3c   : > { %407 = vmatprep.subr.mxu1 %v3330_v31  ;;  %337 = vmatpush1.msra.mxu0 %v3334_v32  ;;  %4840 = vst [vmem:[#allocation14_spill] sm:$0xff] %v3377_v46  ;;  %4841 = vst [vmem:[#allocation15_spill] sm:$0xff] %v3379_v47  ;;  %v3385_v49 = vld [vmem:[#allocation2 + $0x90] sm:$0xff]  ;;  %v3394_v50 = vld [vmem:[#allocation2 + $0x68] sm:$0xff] }
  0x3d   : > { %408 = vmatpush1.msra.mxu1 %v3336_v33  ;;  %338 = vmatprep.subr.mxu0 %v3340_v34  ;;  %4842 = vst [vmem:[#allocation16_spill] sm:$0xff] %v3383_v48  ;;  %4843 = vst [vmem:[#allocation17_spill] sm:$0xff] %v3385_v49  ;;  %v3396_v51 = vld [vmem:[#allocation2 + $0x78] sm:$0xff]  ;;  %v3400_v52 = vld [vmem:[#allocation2 + $0x60] sm:$0xff] }
  0x3e   : > { %409 = vmatprep.subr.mxu1 %v3342_v35  ;;  %339 = vmatpush1.msra.mxu0 %v3346_v36  ;;  %4844 = vst [vmem:[#allocation18_spill] sm:$0xff] %v3394_v50  ;;  %4845 = vst [vmem:[#allocation19_spill] sm:$0xff] %v3396_v51  ;;  %v3402_v53 = vld [vmem:[#allocation2 + $0x70] sm:$0xff]  ;;  %v3406_v54 = vld [vmem:[#allocation2 + $0x48] sm:$0xff] }
  0x3f   : > { %410 = vmatpush1.msra.mxu1 %v3348_v37  ;;  %340 = vmatprep.subr.mxu0 %v3352_v38  ;;  %4846 = vst [vmem:[#allocation20_spill] sm:$0xff] %v3400_v52  ;;  %4847 = vst [vmem:[#allocation21_spill] sm:$0xff] %v3402_v53  ;;  %v3408_v55 = vld [vmem:[#allocation2 + $0x58] sm:$0xff]  ;;  %v3412_v56 = vld [vmem:[#allocation2 + $0x40] sm:$0xff] }
  0x40   : > { %411 = vmatprep.subr.mxu1 %v3354_v39  ;;  %341 = vmatpush1.msra.mxu0 %v3358_v40  ;;  %4848 = vst [vmem:[#allocation22_spill] sm:$0xff] %v3406_v54  ;;  %4849 = vst [vmem:[#allocation23_spill] sm:$0xff] %v3408_v55  ;;  %v3414_v57 = vld [vmem:[#allocation2 + $0x50] sm:$0xff]  ;;  %v3419_v58 = vld [vmem:[#allocation2 + $0x28] sm:$0xff] }
  0x41   : > { %412 = vmatpush1.msra.mxu1 %v3360_v41  ;;  %342 = vmatprep.subr.mxu0 %v3365_v42  ;;  %4850 = vst [vmem:[#allocation24_spill] sm:$0xff] %v3412_v56  ;;  %4851 = vst [vmem:[#allocation25_spill] sm:$0xff] %v3414_v57  ;;  %v3421_v59 = vld [vmem:[#allocation2 + $0x38] sm:$0xff]  ;;  %v3425_v60 = vld [vmem:[#allocation2 + $0x20] sm:$0xff] }
  0x42   : > { %413 = vmatprep.subr.mxu1 %v3367_v43  ;;  %343 = vmatpush1.msra.mxu0 %v3371_v44  ;;  %4852 = vst [vmem:[#allocation26_spill] sm:$0xff] %v3419_v58  ;;  %4853 = vst [vmem:[#allocation27_spill] sm:$0xff] %v3421_v59  ;;  %v3427_v61 = vld [vmem:[#allocation2 + $0x30] sm:$0xff]  ;;  %v3431_v62 = vld [vmem:[#allocation2 + $0x8] sm:$0xff] }
  0x43   : > { %414 = vmatpush1.msra.mxu1 %v3373_v45  ;;  %344 = vmatprep.subr.mxu0 %v3377_v46  ;;  %4854 = vst [vmem:[#allocation28_spill] sm:$0xff] %v3425_v60  ;;  %4855 = vst [vmem:[#allocation29_spill] sm:$0xff] %v3427_v61  ;;  %v3433_v63 = vld [vmem:[#allocation2 + $0x18] sm:$0xff]  ;;  %v3444_v1 = vld [vmem:[#allocation2] sm:$0xff] }
  0x44   : > { %415 = vmatprep.subr.mxu1 %v3379_v47  ;;  %345 = vmatpush1.msra.mxu0 %v3383_v48  ;;  %4856 = vst [vmem:[#allocation30_spill] sm:$0xff] %v3431_v62  ;;  %4857 = vst [vmem:[#allocation31_spill] sm:$0xff] %v3433_v63  ;;  %v3446_v0 = vld [vmem:[#allocation2 + $0x10] sm:$0xff] }
  0x45   : > { %416 = vmatpush1.msra.mxu1 %v3385_v49  ;;  %346 = vmatprep.subr.mxu0 %v3394_v50  ;;  %4858 = vst [vmem:[#allocation32_spill] sm:$0xff] %v3444_v1  ;;  %4859 = vst [vmem:[#allocation33_spill] sm:$0xff] %v3446_v0 }
  0x46   : > { %417 = vmatprep.subr.mxu1 %v3396_v51  ;;  %347 = vmatpush1.msra.mxu0 %v3400_v52 }
  0x47   : > { %418 = vmatpush1.msra.mxu1 %v3402_v53  ;;  %348 = vmatprep.subr.mxu0 %v3406_v54 }
  0x48   : > { %419 = vmatprep.subr.mxu1 %v3408_v55  ;;  %349 = vmatpush1.msra.mxu0 %v3412_v56 }
  0x49   : > { %420 = vmatpush1.msra.mxu1 %v3414_v57  ;;  %350 = vmatprep.subr.mxu0 %v3419_v58  ;;  %v3453_v57 = vld [vmem:[%s3440_s6] sm:$0xff]  ;;  %v4861_v58 = vmov 0.0  }
  0x4a   : > { %421 = vmatprep.subr.mxu1 %v3421_v59  ;;  %351 = vmatpush1.msra.mxu0 %v3425_v60  ;;  %4860 = vst [vmem:[#allocation34_spill] sm:$0xff] %v3453_v57 }
  0x4b   : > { %422 = vmatpush1.msra.mxu1 %v3427_v61  ;;  %352 = vmatprep.subr.mxu0 %v3431_v62 }
  0x4c   : > { %423 = vmatprep.subr.mxu1 %v3433_v63  ;;  %353 = vmatpush1.msra.mxu0 %v3444_v1 }
  0x4d   : > { %424 = vmatpush1.msra.mxu1 %v3446_v0  ;;  %387 = vmatmul.mubr.f32.vlgmr.msra.gmra.mxu0 %v4861_v58 }
  0x4e   : > { %458 = vmatmul.mubr.f32.vlgmr.msra.gmra.mxu1 %v4861_v58  ;;  %205 = vperm.xlu0 %2761, %v3453_v57  }
  0x4f   : > { %507 = vmatprep.subr.mxu0 %v3248_v2  ;;  %578 = vmatprep.subr.mxu1 %v3250_v3 }
  0x50   : > { %508 = vmatpush1.msra.mxu0 %v3252_v4  ;;  %579 = vmatpush1.msra.mxu1 %v3256_v5 }
  0x51   : > { %509 = vmatprep.subr.mxu0 %v3258_v6  ;;  %580 = vmatprep.subr.mxu1 %v3260_v7 }
  0x52   : > { %510 = vmatpush1.msra.mxu0 %v3264_v8  ;;  %581 = vmatpush1.msra.mxu1 %v3266_v9 }
  0x53   : > { %511 = vmatprep.subr.mxu0 %v3268_v10  ;;  %582 = vmatprep.subr.mxu1 %v3272_v11 }
  0x54   : > { %512 = vmatpush1.msra.mxu0 %v3274_v12  ;;  %583 = vmatpush1.msra.mxu1 %v3276_v13 }
  0x55   : > { %513 = vmatprep.subr.mxu0 %v3280_v14  ;;  %584 = vmatprep.subr.mxu1 %v3282_v15 }
  0x56   : > { %514 = vmatpush1.msra.mxu0 %v3286_v16  ;;  %585 = vmatpush1.msra.mxu1 %v3288_v17 }
  0x57   : > { %515 = vmatprep.subr.mxu0 %v3292_v18  ;;  %586 = vmatprep.subr.mxu1 %v3294_v19 }
  0x58   : > { %516 = vmatpush1.msra.mxu0 %v3298_v20  ;;  %587 = vmatpush1.msra.mxu1 %v3300_v21 }
  0x59   : > { %517 = vmatprep.subr.mxu0 %v3304_v22  ;;  %588 = vmatprep.subr.mxu1 %v3306_v23 }
  0x5a   : > { %518 = vmatpush1.msra.mxu0 %v3310_v24  ;;  %589 = vmatpush1.msra.mxu1 %v3312_v25 }
  0x5b   : > { %519 = vmatprep.subr.mxu0 %v3316_v26  ;;  %590 = vmatprep.subr.mxu1 %v3318_v27 }
  0x5c   : > { %520 = vmatpush1.msra.mxu0 %v3322_v28  ;;  %591 = vmatpush1.msra.mxu1 %v3324_v29 }
  0x5d   : > { %521 = vmatprep.subr.mxu0 %v3328_v30  ;;  %592 = vmatprep.subr.mxu1 %v3330_v31 }
  0x5e   : > { %522 = vmatpush1.msra.mxu0 %v3334_v32  ;;  %593 = vmatpush1.msra.mxu1 %v3336_v33 }
  0x5f   : > { %523 = vmatprep.subr.mxu0 %v3340_v34  ;;  %594 = vmatprep.subr.mxu1 %v3342_v35 }
  0x60   : > { %524 = vmatpush1.msra.mxu0 %v3346_v36  ;;  %595 = vmatpush1.msra.mxu1 %v3348_v37 }
  0x61   : > { %525 = vmatprep.subr.mxu0 %v3352_v38  ;;  %596 = vmatprep.subr.mxu1 %v3354_v39 }
  0x62   : > { %526 = vmatpush1.msra.mxu0 %v3358_v40  ;;  %597 = vmatpush1.msra.mxu1 %v3360_v41 }
  0x63   : > { %527 = vmatprep.subr.mxu0 %v3365_v42  ;;  %598 = vmatprep.subr.mxu1 %v3367_v43 }
  0x64   : > { %528 = vmatpush1.msra.mxu0 %v3371_v44  ;;  %599 = vmatpush1.msra.mxu1 %v3373_v45 }
  0x65   : > { %529 = vmatprep.subr.mxu0 %v3377_v46  ;;  %600 = vmatprep.subr.mxu1 %v3379_v47  ;;  %v4862_v46 = vld [vmem:[#allocation25_spill] sm:$0xff]  ;;  %v4863_v47 = vld [vmem:[#allocation26_spill] sm:$0xff] }
  0x66   : > { %530 = vmatpush1.msra.mxu0 %v3383_v48  ;;  %601 = vmatpush1.msra.mxu1 %v3385_v49 }
  0x67   : > { %531 = vmatprep.subr.mxu0 %v3394_v50  ;;  %602 = vmatprep.subr.mxu1 %v3396_v51 }
  0x68   : > { %532 = vmatpush1.msra.mxu0 %v3400_v52  ;;  %603 = vmatpush1.msra.mxu1 %v3402_v53 }
  0x69   : > { %533 = vmatprep.subr.mxu0 %v3406_v54  ;;  %604 = vmatprep.subr.mxu1 %v3408_v55 }
  0x6a   : > { %534 = vmatpush1.msra.mxu0 %v3412_v56  ;;  %605 = vmatpush1.msra.mxu1 %v4862_v46  ;;  %v202_v56 = vld [vmem:[#allocation2 + $0x45] ss:$8 sm:$0xf] }
  0x6b   : > { %535 = vmatprep.subr.mxu0 %v4863_v47  ;;  %606 = vmatprep.subr.mxu1 %v3421_v59  ;;  %v3167_v59 = vmov 1  }
  0x6c   : > { %536 = vmatpush1.msra.mxu0 %v3425_v60  ;;  %607 = vmatpush1.msra.mxu1 %v3427_v61  ;;  %v196_v61 = vlaneseq }
  0x6d   : > { %537 = vmatprep.subr.mxu0 %v3431_v62  ;;  %608 = vmatprep.subr.mxu1 %v3433_v63  ;;  %v200_v63 = vld [vmem:[#allocation2 + $0x44] ss:$8 sm:$0xf] }
  0x6e   : > { %538 = vmatpush1.msra.mxu0 %v3444_v1  ;;  %571 = vmatprep.mubr.f32.mxu0 %v4861_v58  ;;  %v210_v62 = vshrl.u32 %v196_v61, 7 }
  0x6f   : > { %609 = vmatpush1.msra.mxu1 %v3446_v0  ;;  %642 = vmatprep.mubr.f32.mxu1 %v4861_v58 }
  0x70   : > { %691 = vmatprep.subr.mxu0 %v3248_v2  ;;  %762 = vmatprep.subr.mxu1 %v3250_v3  ;;  %v211_v60 = vsub.s32 0, %v210_v62  ;;  %v215_v47 = vsub.s32 1, %v210_v62  ;;  %v219_v50 = vsub.s32 2, %v210_v62 }
  0x71   : > { %2762 = vset.pattern.permute.xlu0 %v3167_v59 }
  0x72   : > { %496 = vperm.xlu0 %2762, %v3453_v57   ;;  %v3529_v1 = vrot.slane %v200_v63, %v211_v60  ;;  %v3531_v0 = vrot.slane %v200_v63, %v215_v47  ;;  %v3534_v2 = vrot.slane %v202_v56, %v211_v60  ;;  %v3537_v59 = vrot.slane %v202_v56, %v215_v47 }
  0x73   : > { %v223_v57 = vsub.s32 3, %v210_v62  ;;  %v3546_v44 = vrot.slane %v200_v63, %v219_v50 }
  0x74   : > { %4864 = vst [vmem:[#allocation35_spill] sm:$0xff] %v3529_v1  ;;  %4865 = vst [vmem:[#allocation36_spill] sm:$0xff] %v3531_v0 }
  0x75   : > { %4866 = vst [vmem:[#allocation37_spill] sm:$0xff] %v3537_v59  ;;  %v3541_v52 = vrot.slane %v200_v63, %v223_v57 }
  0xc9   : > { %v206_v46 = vpop.permute.xlu0 %205 }
  0xca   : > { %v229_v58 = vmul.f32 %v3529_v1, %v206_v46  ;;  %v230_v3 = vmul.f32 %v3531_v0, %v206_v46  ;;  %v232_v60 = vmul.f32 %v3541_v52, %v206_v46  ;;  %v3544_v1 = vrot.slane %v202_v56, %v223_v57 }
  0xcc   : > { %v254_v55 = vadd.f32 %v3534_v2, %v229_v58  ;;  %v255_v54 = vadd.f32 %v3537_v59, %v230_v3  ;;  %4867 = vst [vmem:[#allocation38_spill] sm:$0xff] %v3544_v1  ;;  %v257_v3 = vadd.f32 %v3544_v1, %v232_v60  ;;  %v231_v59 = vmul.f32 %v3546_v44, %v206_v46 }
  0xcd   : > { %v3553_v60 = vand.u32 127, %v196_v61  ;;  %v4869_v61 = vld [vmem:[#allocation12_spill] sm:$0xff] }
  0xcf   : > { %4868 = vst [vmem:[#allocation39_spill] sm:$0xff] %v3553_v60  ;;  %vm489_vm0 = vcmp.lt.s32.totalorder %v3553_v60, 4  ;;  %vm673_vm1 = vcmp.lt.s32.totalorder %v3553_v60, 8  ;;  %vm857_vm2 = vcmp.lt.s32.totalorder %v3553_v60, 12  ;;  %vm1041_vm3 = vcmp.lt.s32.totalorder %v3553_v60, 16  ;;  %v3968_v60 = vld [vmem:[#allocation2 + $0x58] sm:$0xff] }
 0x10d   : > { %v388_v53 = vpop.f32.mrf.mxu0 }
 0x10e   : > { %v389_v51 = vadd.f32 %v388_v53, %v254_v55  ;;  %v459_v47 = vpop.f32.mrf.mxu1  ;;  %v3550_v53 = vrot.slane %v202_v56, %v219_v50 }
 0x10f   : > { %v390_v49 = vpop.f32.mrf.mxu0 }
 0x110   : > { %v2625_v48 = vmul.f32 -1.442695, %v389_v51  ;;  %v391_v45 = vadd.f32 %v390_v49, %v255_v54  ;;  %v461_v58 = vpop.f32.mrf.mxu1  ;;  %v256_v49 = vadd.f32 %v3550_v53, %v231_v59 }
 0x111   : > { %v462_v55 = vadd.f32 %v461_v58, %v257_v3 }
 0x112   : > { %2770 = vpow2.f32 %v2625_v48  ;;  %v2626_v0 = vmul.f32 -1.442695, %v391_v45  ;;  %v460_v57 = vadd.f32 %v459_v47, %v256_v49 }
 0x113   : > { %v2627_v51 = vmul.f32 -1.442695, %v462_v55 }
 0x114   : > { %2772 = vpow2.f32 %v2626_v0 }
 0x115   : > { %2774 = vpow2.f32 %v2627_v51 }
 0x11f   : > { %v2771_v54 = vpop.eup %2770 }
 0x120   : > { %v467_v62 = vadd.f32 1.0, %v2771_v54 }
 0x121   : > { %v2773_v48 = vpop.eup %2772 }
 0x122   : > { %2776 = vrcp.f32 %v467_v62  ;;  %v473_v45 = vadd.f32 1.0, %v2773_v48  ;;  %v2775_v0 = vpop.eup %2774  ;;  %v4871_v62 = vld [vmem:[#allocation14_spill] sm:$0xff]  ;;  %v4872_v48 = vld [vmem:[#allocation15_spill] sm:$0xff] }
 0x123   : > { %2778 = vtanh.f32 %v460_v57  ;;  %v480_v56 = vadd.f32 1.0, %v2775_v0  ;;  %v4870_v57 = vld [vmem:[#allocation13_spill] sm:$0xff] }
 0x124   : > { %2780 = vrcp.f32 %v473_v45  ;;  %v4873_v45 = vld [vmem:[#allocation16_spill] sm:$0xff]  ;;  %v4874_v0 = vld [vmem:[#allocation17_spill] sm:$0xff] }
 0x125   : > { %2782 = vrcp.f32 %v480_v56  ;;  %v4878_v56 = vld [vmem:[#allocation21_spill] sm:$0xff] }
 0x12f   : > { %v2777_v63 = vpop.eup %2776 }
 0x130   : > { %v2779_v46 = vpop.eup %2778 }
 0x131   : > { %v2781_v50 = vpop.eup %2780  ;;  %v484_v58 = vmul.f32 %v2779_v46, %v2777_v63  ;;  %v4875_v63 = vld [vmem:[#allocation18_spill] sm:$0xff]  ;;  %v4876_v46 = vld [vmem:[#allocation19_spill] sm:$0xff] }
 0x132   : > { %v483_v3 = vmul.f32 0.0, %v2781_v50  ;;  %v2783_v55 = vpop.eup %2782  ;;  %v4877_v50 = vld [vmem:[#allocation20_spill] sm:$0xff] }
 0x134   : > { %v485_v59 = vadd.f32 %v484_v58, %v483_v3  ;;  %v4879_v3 = vld [vmem:[#allocation22_spill] sm:$0xff]  ;;  %v4880_v58 = vld [vmem:[#allocation23_spill] sm:$0xff] }
 0x136   : > { %2784 = vtanh.f32 %v485_v59  ;;  %v3556_v47 = vsel %vm489_vm0, %v485_v59, 0.0  ;;  %v4881_v59 = vld [vmem:[#allocation24_spill] sm:$0xff] }
 0x143   : > { %v2785_v49 = vpop.eup %2784 }
 0x144   : > { %v487_v51 = vmul.f32 %v2785_v49, %v2783_v55  ;;  %v4882_v55 = vld [vmem:[#allocation25_spill] sm:$0xff]  ;;  %v4883_v49 = vld [vmem:[#allocation26_spill] sm:$0xff] }
 0x146   : > { %2628 = vmatmul.mubr.msk.f32.vlgmr.msra.gmra.mxu0 %vm489_vm0, %v487_v51  ;;  %2629 = vmatmul.mubr.msk.f32.vlgmr.msra.gmra.mxu1 %vm489_vm0, %v487_v51  ;;  %v3558_v54 = vsel %vm489_vm0, %v487_v51, 0.0  ;;  %v4884_v51 = vld [vmem:[#allocation27_spill] sm:$0xff] }
 0x147   : > { %692 = vmatpush1.msra.mxu0 %v3252_v4  ;;  %763 = vmatpush1.msra.mxu1 %v3256_v5 }
 0x148   : > { %693 = vmatprep.subr.mxu0 %v3258_v6  ;;  %764 = vmatprep.subr.mxu1 %v3260_v7 }
 0x149   : > { %694 = vmatpush1.msra.mxu0 %v3264_v8  ;;  %765 = vmatpush1.msra.mxu1 %v3266_v9 }
 0x14a   : > { %695 = vmatprep.subr.mxu0 %v3268_v10  ;;  %766 = vmatprep.subr.mxu1 %v3272_v11 }
 0x14b   : > { %696 = vmatpush1.msra.mxu0 %v3274_v12  ;;  %767 = vmatpush1.msra.mxu1 %v3276_v13 }
 0x14c   : > { %697 = vmatprep.subr.mxu0 %v3280_v14  ;;  %768 = vmatprep.subr.mxu1 %v3282_v15 }
 0x14d   : > { %698 = vmatpush1.msra.mxu0 %v3286_v16  ;;  %769 = vmatpush1.msra.mxu1 %v3288_v17 }
 0x14e   : > { %699 = vmatprep.subr.mxu0 %v3292_v18  ;;  %770 = vmatprep.subr.mxu1 %v3294_v19 }
 0x14f   : > { %700 = vmatpush1.msra.mxu0 %v3298_v20  ;;  %771 = vmatpush1.msra.mxu1 %v3300_v21 }
 0x150   : > { %701 = vmatprep.subr.mxu0 %v3304_v22  ;;  %772 = vmatprep.subr.mxu1 %v3306_v23 }
 0x151   : > { %702 = vmatpush1.msra.mxu0 %v3310_v24  ;;  %773 = vmatpush1.msra.mxu1 %v3312_v25 }
 0x152   : > { %703 = vmatprep.subr.mxu0 %v3316_v26  ;;  %774 = vmatprep.subr.mxu1 %v3318_v27 }
 0x153   : > { %704 = vmatpush1.msra.mxu0 %v3322_v28  ;;  %775 = vmatpush1.msra.mxu1 %v3324_v29 }
 0x154   : > { %705 = vmatprep.subr.mxu0 %v3328_v30  ;;  %776 = vmatprep.subr.mxu1 %v3330_v31 }
 0x155   : > { %706 = vmatpush1.msra.mxu0 %v3334_v32  ;;  %777 = vmatpush1.msra.mxu1 %v3336_v33 }
 0x156   : > { %707 = vmatprep.subr.mxu0 %v3340_v34  ;;  %778 = vmatprep.subr.mxu1 %v3342_v35 }
 0x157   : > { %708 = vmatpush1.msra.mxu0 %v3346_v36  ;;  %779 = vmatpush1.msra.mxu1 %v3348_v37 }
 0x158   : > { %709 = vmatprep.subr.mxu0 %v3352_v38  ;;  %780 = vmatprep.subr.mxu1 %v3354_v39 }
 0x159   : > { %710 = vmatpush1.msra.mxu0 %v3358_v40  ;;  %781 = vmatpush1.msra.mxu1 %v3360_v41 }
 0x15a   : > { %711 = vmatprep.subr.mxu0 %v3365_v42  ;;  %782 = vmatprep.subr.mxu1 %v3367_v43 }
 0x15b   : > { %712 = vmatpush1.msra.mxu0 %v4869_v61  ;;  %783 = vmatpush1.msra.mxu1 %v4870_v57 }
 0x15c   : > { %713 = vmatprep.subr.mxu0 %v4871_v62  ;;  %784 = vmatprep.subr.mxu1 %v4872_v48  ;;  %v4897_v48 = vld [vmem:[#allocation37_spill] sm:$0xff] }
 0x15d   : > { %714 = vmatpush1.msra.mxu0 %v4873_v45  ;;  %785 = vmatpush1.msra.mxu1 %v4874_v0  ;;  %v4885_v0 = vld [vmem:[#allocation28_spill] sm:$0xff] }
 0x15e   : > { %715 = vmatprep.subr.mxu0 %v4875_v63  ;;  %786 = vmatprep.subr.mxu1 %v4876_v46  ;;  %v4886_v63 = vld [vmem:[#allocation29_spill] sm:$0xff]  ;;  %v4887_v46 = vld [vmem:[#allocation30_spill] sm:$0xff] }
 0x15f   : > { %716 = vmatpush1.msra.mxu0 %v4877_v50  ;;  %787 = vmatpush1.msra.mxu1 %v4878_v56  ;;  %v4888_v50 = vld [vmem:[#allocation31_spill] sm:$0xff]  ;;  %v4889_v56 = vld [vmem:[#allocation32_spill] sm:$0xff] }
 0x160   : > { %717 = vmatprep.subr.mxu0 %v4879_v3  ;;  %788 = vmatprep.subr.mxu1 %v4880_v58  ;;  %v4890_v3 = vmov 0.0   ;;  %v4891_v58 = vld [vmem:[#allocation33_spill] sm:$0xff] }
 0x161   : > { %718 = vmatpush1.msra.mxu0 %v4881_v59  ;;  %789 = vmatpush1.msra.mxu1 %v4882_v55  ;;  %v4892_v55 = vld [vmem:[#allocation8_spill] sm:$0xff] }
 0x162   : > { %719 = vmatprep.subr.mxu0 %v4883_v49  ;;  %790 = vmatprep.subr.mxu1 %v4884_v51  ;;  %v4893_v49 = vld [vmem:[#allocation9_spill] sm:$0xff]  ;;  %v3168_v51 = vmov 2  }
 0x163   : > { %720 = vmatpush1.msra.mxu0 %v4885_v0  ;;  %791 = vmatpush1.msra.mxu1 %v4886_v63  ;;  %v4894_v0 = vld [vmem:[#allocation34_spill] sm:$0xff]  ;;  %v497_v63 = vpop.permute.xlu0 %496 }
 0x164   : > { %721 = vmatprep.subr.mxu0 %v4887_v46  ;;  %792 = vmatprep.subr.mxu1 %v4888_v50  ;;  %v4895_v46 = vld [vmem:[#allocation35_spill] sm:$0xff]  ;;  %v4896_v50 = vld [vmem:[#allocation36_spill] sm:$0xff] }
 0x165   : > { %722 = vmatpush1.msra.mxu0 %v4889_v56  ;;  %755 = vmatprep.mubr.f32.mxu0 %v4890_v3  ;;  %v499_v59 = vmul.f32 %v497_v63, %v4895_v46  ;;  %v500_v45 = vmul.f32 %v497_v63, %v4896_v50  ;;  %v501_v50 = vmul.f32 %v497_v63, %v3546_v44 }
 0x166   : > { %793 = vmatpush1.msra.mxu1 %v4891_v58  ;;  %826 = vmatprep.mubr.f32.mxu1 %v4890_v3 }
 0x167   : > { %875 = vmatprep.subr.mxu0 %v4892_v55  ;;  %946 = vmatprep.subr.mxu1 %v4893_v49  ;;  %v503_v56 = vadd.f32 %v499_v59, %v3534_v2  ;;  %v504_v62 = vadd.f32 %v500_v45, %v4897_v48  ;;  %v502_v49 = vmul.f32 %v497_v63, %v3541_v52 }
 0x168   : > { %2763 = vset.pattern.permute.xlu1 %v3168_v51  ;;  %v505_v59 = vadd.f32 %v501_v50, %v3550_v53 }
 0x169   : > { %680 = vperm.xlu1 %2763, %v4894_v0   ;;  %v506_v0 = vadd.f32 %v502_v49, %v3544_v1 }
 0x206   : > { %v573_v58 = vpop.f32.mrf.mxu0  ;;  %v644_v51 = vpop.f32.mrf.mxu1 }
 0x207   : > { %v574_v57 = vadd.f32 %v573_v58, %v503_v56  ;;  %v645_v56 = vadd.f32 %v644_v51, %v505_v59 }
 0x208   : > { %v575_v3 = vpop.f32.mrf.mxu0  ;;  %v646_v46 = vpop.f32.mrf.mxu1 }
 0x209   : > { %v2630_v61 = vmul.f32 -1.442695, %v574_v57  ;;  %v576_v55 = vadd.f32 %v575_v3, %v504_v62  ;;  %v647_v42 = vadd.f32 %v646_v46, %v506_v0 }
 0x20b   : > { %2786 = vpow2.f32 %v2630_v61  ;;  %v2631_v43 = vmul.f32 -1.442695, %v576_v55  ;;  %v2632_v45 = vmul.f32 -1.442695, %v647_v42 }
 0x20d   : > { %2788 = vpow2.f32 %v2631_v43 }
 0x20e   : > { %2790 = vpow2.f32 %v2632_v45  ;;  %v4900_v45 = vld [vmem:[#allocation12_spill] sm:$0xff] }
 0x218   : > { %v2787_v48 = vpop.eup %2786 }
 0x219   : > { %v652_v58 = vadd.f32 1.0, %v2787_v48 }
 0x21a   : > { %v2789_v57 = vpop.eup %2788 }
 0x21b   : > { %2792 = vrcp.f32 %v652_v58  ;;  %v658_v62 = vadd.f32 1.0, %v2789_v57  ;;  %v2791_v61 = vpop.eup %2790  ;;  %v4902_v58 = vld [vmem:[#allocation14_spill] sm:$0xff]  ;;  %v4903_v57 = vld [vmem:[#allocation15_spill] sm:$0xff] }
 0x21c   : > { %2794 = vtanh.f32 %v645_v56  ;;  %v665_v49 = vadd.f32 1.0, %v2791_v61  ;;  %v4901_v56 = vld [vmem:[#allocation13_spill] sm:$0xff] }
 0x21d   : > { %2796 = vrcp.f32 %v658_v62  ;;  %v4904_v62 = vld [vmem:[#allocation16_spill] sm:$0xff]  ;;  %v4905_v61 = vld [vmem:[#allocation17_spill] sm:$0xff] }
 0x21e   : > { %2798 = vrcp.f32 %v665_v49  ;;  %v4909_v49 = vld [vmem:[#allocation21_spill] sm:$0xff] }
 0x228   : > { %v2793_v43 = vpop.eup %2792 }
 0x229   : > { %v2795_v3 = vpop.eup %2794 }
 0x22a   : > { %v2797_v55 = vpop.eup %2796  ;;  %v669_v0 = vmul.f32 %v2795_v3, %v2793_v43  ;;  %v4906_v43 = vld [vmem:[#allocation18_spill] sm:$0xff]  ;;  %v4907_v3 = vld [vmem:[#allocation19_spill] sm:$0xff] }
 0x22b   : > { %v668_v63 = vmul.f32 %v2797_v55, %v3556_v47  ;;  %v2799_v46 = vpop.eup %2798  ;;  %v4908_v55 = vld [vmem:[#allocation20_spill] sm:$0xff] }
 0x22d   : > { %v670_v42 = vadd.f32 %v669_v0, %v668_v63  ;;  %v4910_v63 = vld [vmem:[#allocation22_spill] sm:$0xff]  ;;  %v4911_v0 = vld [vmem:[#allocation23_spill] sm:$0xff] }
 0x22f   : > { %2800 = vtanh.f32 %v670_v42  ;;  %v3638_v48 = vsel %vm673_vm1, %v670_v42, %v3556_v47  ;;  %v4898_v47 = vld [vmem:[#allocation10_spill] sm:$0xff]  ;;  %v4912_v42 = vld [vmem:[#allocation24_spill] sm:$0xff] }
 0x23c   : > { %v2801_v50 = vpop.eup %2800 }
 0x23d   : > { %v672_v51 = vmul.f32 %v2801_v50, %v2799_v46  ;;  %v4913_v46 = vld [vmem:[#allocation25_spill] sm:$0xff]  ;;  %v4914_v50 = vld [vmem:[#allocation26_spill] sm:$0xff] }
 0x23f   : > { %v3641_v59 = vsel %vm673_vm1, %v672_v51, %v3558_v54  ;;  %v4899_v54 = vld [vmem:[#allocation11_spill] sm:$0xff] }
 0x240   : > { %756 = vmatmul.mubr.f32.vlgmr.msra.gmra.mxu0 %v3641_v59  ;;  %827 = vmatmul.mubr.f32.vlgmr.msra.gmra.mxu1 %v3641_v59  ;;  %v4915_v51 = vld [vmem:[#allocation27_spill] sm:$0xff] }
 0x241   : > { %876 = vmatpush1.msra.mxu0 %v3252_v4  ;;  %947 = vmatpush1.msra.mxu1 %v3256_v5 }
 0x242   : > { %877 = vmatprep.subr.mxu0 %v3258_v6  ;;  %948 = vmatprep.subr.mxu1 %v3260_v7 }
 0x243   : > { %878 = vmatpush1.msra.mxu0 %v3264_v8  ;;  %949 = vmatpush1.msra.mxu1 %v3266_v9 }
 0x244   : > { %879 = vmatprep.subr.mxu0 %v3268_v10  ;;  %950 = vmatprep.subr.mxu1 %v3272_v11 }
 0x245   : > { %880 = vmatpush1.msra.mxu0 %v3274_v12  ;;  %951 = vmatpush1.msra.mxu1 %v3276_v13 }
 0x246   : > { %881 = vmatprep.subr.mxu0 %v3280_v14  ;;  %952 = vmatprep.subr.mxu1 %v3282_v15 }
 0x247   : > { %882 = vmatpush1.msra.mxu0 %v3286_v16  ;;  %953 = vmatpush1.msra.mxu1 %v3288_v17 }
 0x248   : > { %883 = vmatprep.subr.mxu0 %v3292_v18  ;;  %954 = vmatprep.subr.mxu1 %v3294_v19 }
 0x249   : > { %884 = vmatpush1.msra.mxu0 %v3298_v20  ;;  %955 = vmatpush1.msra.mxu1 %v3300_v21 }
 0x24a   : > { %885 = vmatprep.subr.mxu0 %v3304_v22  ;;  %956 = vmatprep.subr.mxu1 %v3306_v23 }
 0x24b   : > { %886 = vmatpush1.msra.mxu0 %v3310_v24  ;;  %957 = vmatpush1.msra.mxu1 %v3312_v25 }
 0x24c   : > { %887 = vmatprep.subr.mxu0 %v3316_v26  ;;  %958 = vmatprep.subr.mxu1 %v3318_v27 }
 0x24d   : > { %888 = vmatpush1.msra.mxu0 %v3322_v28  ;;  %959 = vmatpush1.msra.mxu1 %v3324_v29 }
 0x24e   : > { %889 = vmatprep.subr.mxu0 %v3328_v30  ;;  %960 = vmatprep.subr.mxu1 %v3330_v31 }
 0x24f   : > { %890 = vmatpush1.msra.mxu0 %v3334_v32  ;;  %961 = vmatpush1.msra.mxu1 %v3336_v33 }
 0x250   : > { %891 = vmatprep.subr.mxu0 %v3340_v34  ;;  %962 = vmatprep.subr.mxu1 %v3342_v35 }
 0x251   : > { %892 = vmatpush1.msra.mxu0 %v3346_v36  ;;  %963 = vmatpush1.msra.mxu1 %v3348_v37 }
 0x252   : > { %893 = vmatprep.subr.mxu0 %v3352_v38  ;;  %964 = vmatprep.subr.mxu1 %v3354_v39 }
 0x253   : > { %894 = vmatpush1.msra.mxu0 %v3358_v40  ;;  %965 = vmatpush1.msra.mxu1 %v3360_v41 }
 0x254   : > { %895 = vmatprep.subr.mxu0 %v4898_v47  ;;  %966 = vmatprep.subr.mxu1 %v4899_v54 }
 0x255   : > { %896 = vmatpush1.msra.mxu0 %v4900_v45  ;;  %967 = vmatpush1.msra.mxu1 %v4901_v56 }
 0x256   : > { %897 = vmatprep.subr.mxu0 %v4902_v58  ;;  %968 = vmatprep.subr.mxu1 %v4903_v57  ;;  %v4928_v57 = vld [vmem:[#allocation37_spill] sm:$0xff] }
 0x257   : > { %898 = vmatpush1.msra.mxu0 %v4904_v62  ;;  %969 = vmatpush1.msra.mxu1 %v4905_v61  ;;  %v4916_v61 = vld [vmem:[#allocation28_spill] sm:$0xff] }
 0x258   : > { %899 = vmatprep.subr.mxu0 %v4906_v43  ;;  %970 = vmatprep.subr.mxu1 %v4907_v3  ;;  %v4917_v43 = vld [vmem:[#allocation29_spill] sm:$0xff]  ;;  %v4918_v3 = vld [vmem:[#allocation30_spill] sm:$0xff] }
 0x259   : > { %900 = vmatpush1.msra.mxu0 %v4908_v55  ;;  %971 = vmatpush1.msra.mxu1 %v4909_v49  ;;  %v4919_v55 = vld [vmem:[#allocation31_spill] sm:$0xff]  ;;  %v4920_v49 = vld [vmem:[#allocation32_spill] sm:$0xff] }
 0x25a   : > { %901 = vmatprep.subr.mxu0 %v4910_v63  ;;  %972 = vmatprep.subr.mxu1 %v4911_v0  ;;  %v4921_v63 = vmov 0.0   ;;  %v4922_v0 = vld [vmem:[#allocation33_spill] sm:$0xff] }
 0x25b   : > { %902 = vmatpush1.msra.mxu0 %v4912_v42  ;;  %973 = vmatpush1.msra.mxu1 %v4913_v46  ;;  %v4923_v46 = vld [vmem:[#allocation8_spill] sm:$0xff] }
 0x25c   : > { %903 = vmatprep.subr.mxu0 %v4914_v50  ;;  %974 = vmatprep.subr.mxu1 %v4915_v51  ;;  %v4924_v50 = vld [vmem:[#allocation9_spill] sm:$0xff]  ;;  %v3169_v51 = vmov 3  }
 0x25d   : > { %904 = vmatpush1.msra.mxu0 %v4916_v61  ;;  %975 = vmatpush1.msra.mxu1 %v4917_v43  ;;  %v4925_v61 = vld [vmem:[#allocation34_spill] sm:$0xff]  ;;  %v681_v43 = vpop.permute.xlu1 %680 }
 0x25e   : > { %905 = vmatprep.subr.mxu0 %v4918_v3  ;;  %976 = vmatprep.subr.mxu1 %v4919_v55  ;;  %v4926_v3 = vld [vmem:[#allocation35_spill] sm:$0xff]  ;;  %v4927_v55 = vld [vmem:[#allocation36_spill] sm:$0xff] }
 0x25f   : > { %906 = vmatpush1.msra.mxu0 %v4920_v49  ;;  %939 = vmatprep.mubr.f32.mxu0 %v4921_v63  ;;  %v683_v42 = vmul.f32 %v681_v43, %v4926_v3  ;;  %v684_v62 = vmul.f32 %v681_v43, %v4927_v55  ;;  %v685_v55 = vmul.f32 %v681_v43, %v3546_v44 }
 0x260   : > { %977 = vmatpush1.msra.mxu1 %v4922_v0  ;;  %1010 = vmatprep.mubr.f32.mxu1 %v4921_v63 }
 0x261   : > { %1059 = vmatprep.subr.mxu0 %v4923_v46  ;;  %1130 = vmatprep.subr.mxu1 %v4924_v50  ;;  %v687_v49 = vadd.f32 %v683_v42, %v3534_v2  ;;  %v688_v58 = vadd.f32 %v684_v62, %v4928_v57  ;;  %v686_v50 = vmul.f32 %v681_v43, %v3541_v52 }
 0x262   : > { %2764 = vset.pattern.permute.xlu1 %v3169_v51  ;;  %v689_v42 = vadd.f32 %v685_v55, %v3550_v53 }
 0x263   : > { %864 = vperm.xlu1 %2764, %v4925_v61   ;;  %v690_v61 = vadd.f32 %v686_v50, %v3544_v1 }
 0x300   : > { %v757_v0 = vpop.f32.mrf.mxu0  ;;  %v828_v51 = vpop.f32.mrf.mxu1 }
 0x301   : > { %v758_v56 = vadd.f32 %v757_v0, %v687_v49  ;;  %v829_v49 = vadd.f32 %v828_v51, %v689_v42 }
 0x302   : > { %v759_v63 = vpop.f32.mrf.mxu0  ;;  %v830_v3 = vpop.f32.mrf.mxu1 }
 0x303   : > { %v2633_v45 = vmul.f32 -1.442695, %v758_v56  ;;  %v760_v46 = vadd.f32 %v759_v63, %v688_v58  ;;  %v831_v47 = vadd.f32 %v830_v3, %v690_v61 }
 0x305   : > { %2802 = vpow2.f32 %v2633_v45  ;;  %v2634_v54 = vmul.f32 -1.442695, %v760_v46  ;;  %v2635_v62 = vmul.f32 -1.442695, %v831_v47 }
 0x307   : > { %2804 = vpow2.f32 %v2634_v54 }
 0x308   : > { %2806 = vpow2.f32 %v2635_v62 }
 0x312   : > { %v2803_v57 = vpop.eup %2802 }
 0x313   : > { %v836_v0 = vadd.f32 1.0, %v2803_v57 }
 0x314   : > { %v2805_v56 = vpop.eup %2804 }
 0x315   : > { %2808 = vrcp.f32 %v836_v0  ;;  %v842_v58 = vadd.f32 1.0, %v2805_v56  ;;  %v2807_v45 = vpop.eup %2806 }
 0x316   : > { %2810 = vtanh.f32 %v829_v49  ;;  %v849_v50 = vadd.f32 1.0, %v2807_v45 }
 0x317   : > { %2812 = vrcp.f32 %v842_v58 }
 0x318   : > { %2814 = vrcp.f32 %v849_v50 }
 0x322   : > { %v2809_v54 = vpop.eup %2808 }
 0x323   : > { %v2811_v63 = vpop.eup %2810 }
 0x324   : > { %v2813_v46 = vpop.eup %2812  ;;  %v853_v61 = vmul.f32 %v2811_v63, %v2809_v54 }
 0x325   : > { %v852_v43 = vmul.f32 %v2813_v46, %v3638_v48  ;;  %v2815_v3 = vpop.eup %2814 }
 0x327   : > { %v854_v47 = vadd.f32 %v853_v61, %v852_v43 }
 0x329   : > { %2816 = vtanh.f32 %v854_v47  ;;  %v3723_v57 = vsel %vm857_vm2, %v854_v47, %v3638_v48 }
 0x336   : > { %v2817_v55 = vpop.eup %2816 }
 0x337   : > { %v856_v51 = vmul.f32 %v2817_v55, %v2815_v3 }
 0x339   : > { %v3726_v42 = vsel %vm857_vm2, %v856_v51, %v3641_v59 }
 0x33a   : > { %940 = vmatmul.mubr.f32.vlgmr.msra.gmra.mxu0 %v3726_v42  ;;  %1011 = vmatmul.mubr.f32.vlgmr.msra.gmra.mxu1 %v3726_v42 }
 0x33b   : > { %1060 = vmatpush1.msra.mxu0 %v3252_v4  ;;  %1131 = vmatpush1.msra.mxu1 %v3256_v5  ;;  %v4929_v4 = vld [vmem:[#allocation10_spill] sm:$0xff]  ;;  %v4930_v5 = vld [vmem:[#allocation11_spill] sm:$0xff] }
 0x33c   : > { %1061 = vmatprep.subr.mxu0 %v3258_v6  ;;  %1132 = vmatprep.subr.mxu1 %v3260_v7  ;;  %v4931_v6 = vld [vmem:[#allocation12_spill] sm:$0xff]  ;;  %v4932_v7 = vld [vmem:[#allocation13_spill] sm:$0xff] }
 0x33d   : > { %1062 = vmatpush1.msra.mxu0 %v3264_v8  ;;  %1133 = vmatpush1.msra.mxu1 %v3266_v9  ;;  %v4933_v8 = vld [vmem:[#allocation14_spill] sm:$0xff]  ;;  %v4934_v9 = vld [vmem:[#allocation15_spill] sm:$0xff] }
 0x33e   : > { %1063 = vmatprep.subr.mxu0 %v3268_v10  ;;  %1134 = vmatprep.subr.mxu1 %v3272_v11  ;;  %v4935_v10 = vld [vmem:[#allocation16_spill] sm:$0xff]  ;;  %v4936_v11 = vld [vmem:[#allocation17_spill] sm:$0xff] }
 0x33f   : > { %1064 = vmatpush1.msra.mxu0 %v3274_v12  ;;  %1135 = vmatpush1.msra.mxu1 %v3276_v13  ;;  %v4937_v12 = vld [vmem:[#allocation18_spill] sm:$0xff]  ;;  %v4938_v13 = vld [vmem:[#allocation19_spill] sm:$0xff] }
 0x340   : > { %1065 = vmatprep.subr.mxu0 %v3280_v14  ;;  %1136 = vmatprep.subr.mxu1 %v3282_v15  ;;  %v4939_v14 = vld [vmem:[#allocation20_spill] sm:$0xff]  ;;  %v4940_v15 = vld [vmem:[#allocation21_spill] sm:$0xff] }
 0x341   : > { %1066 = vmatpush1.msra.mxu0 %v3286_v16  ;;  %1137 = vmatpush1.msra.mxu1 %v3288_v17  ;;  %v4941_v16 = vld [vmem:[#allocation22_spill] sm:$0xff]  ;;  %v4942_v17 = vld [vmem:[#allocation23_spill] sm:$0xff]  ;;  %4971 = vst [vmem:[#allocation21_spill] sm:$0xff] %v3968_v60 }
 0x342   : > { %1067 = vmatprep.subr.mxu0 %v3292_v18  ;;  %1138 = vmatprep.subr.mxu1 %v3294_v19  ;;  %v4943_v18 = vld [vmem:[#allocation24_spill] sm:$0xff]  ;;  %v4944_v19 = vld [vmem:[#allocation25_spill] sm:$0xff] }
 0x343   : > { %1068 = vmatpush1.msra.mxu0 %v3298_v20  ;;  %1139 = vmatpush1.msra.mxu1 %v3300_v21  ;;  %v4945_v20 = vld [vmem:[#allocation26_spill] sm:$0xff]  ;;  %v4946_v21 = vld [vmem:[#allocation27_spill] sm:$0xff] }
 0x344   : > { %1069 = vmatprep.subr.mxu0 %v3304_v22  ;;  %1140 = vmatprep.subr.mxu1 %v3306_v23  ;;  %v4947_v22 = vld [vmem:[#allocation28_spill] sm:$0xff]  ;;  %v4948_v23 = vld [vmem:[#allocation29_spill] sm:$0xff] }
 0x345   : > { %1070 = vmatpush1.msra.mxu0 %v3310_v24  ;;  %1141 = vmatpush1.msra.mxu1 %v3312_v25  ;;  %v4949_v24 = vld [vmem:[#allocation30_spill] sm:$0xff]  ;;  %v4950_v25 = vld [vmem:[#allocation31_spill] sm:$0xff] }
 0x346   : > { %1071 = vmatprep.subr.mxu0 %v3316_v26  ;;  %1142 = vmatprep.subr.mxu1 %v3318_v27  ;;  %v4951_v26 = vld [vmem:[#allocation32_spill] sm:$0xff]  ;;  %v4952_v27 = vmov 0.0  }
 0x347   : > { %1072 = vmatpush1.msra.mxu0 %v3322_v28  ;;  %1143 = vmatpush1.msra.mxu1 %v3324_v29  ;;  %v4953_v28 = vld [vmem:[#allocation33_spill] sm:$0xff] }
 0x348   : > { %1073 = vmatprep.subr.mxu0 %v3328_v30  ;;  %1144 = vmatprep.subr.mxu1 %v3330_v31  ;;  %v3794_v29 = vld [vmem:[#allocation2 + $0x1e8] sm:$0xff]  ;;  %v3797_v30 = vld [vmem:[#allocation2 + $0x1f8] sm:$0xff]  ;;  %v3170_v31 = vmov 4  }
 0x349   : > { %1074 = vmatpush1.msra.mxu0 %v3334_v32  ;;  %1145 = vmatpush1.msra.mxu1 %v3336_v33  ;;  %4954 = vst [vmem:[#allocation8_spill] sm:$0xff] %v3794_v29  ;;  %4955 = vst [vmem:[#allocation9_spill] sm:$0xff] %v3797_v30  ;;  %v4956_v32 = vld [vmem:[#allocation34_spill] sm:$0xff]  ;;  %v865_v33 = vpop.permute.xlu1 %864 }
 0x34a   : > { %1075 = vmatprep.subr.mxu0 %v3340_v34  ;;  %1146 = vmatprep.subr.mxu1 %v3342_v35  ;;  %v4957_v34 = vld [vmem:[#allocation35_spill] sm:$0xff]  ;;  %v870_v0 = vmul.f32 %v865_v33, %v3541_v52  ;;  %v869_v63 = vmul.f32 %v865_v33, %v3546_v44 }
 0x34b   : > { %1076 = vmatpush1.msra.mxu0 %v3346_v36  ;;  %1147 = vmatpush1.msra.mxu1 %v3348_v37  ;;  %v867_v35 = vmul.f32 %v865_v33, %v4957_v34  ;;  %v4958_v36 = vld [vmem:[#allocation36_spill] sm:$0xff] }
 0x34c   : > { %1077 = vmatprep.subr.mxu0 %v3352_v38  ;;  %1148 = vmatprep.subr.mxu1 %v3354_v39  ;;  %v868_v37 = vmul.f32 %v865_v33, %v4958_v36  ;;  %v4959_v39 = vld [vmem:[#allocation37_spill] sm:$0xff]  ;;  %v874_v45 = vadd.f32 %v870_v0, %v3544_v1  ;;  %v873_v50 = vadd.f32 %v869_v63, %v3550_v53  ;;  %v3860_v33 = vld [vmem:[#allocation2 + $0x178] sm:$0xff]  ;;  %v3890_v0 = vld [vmem:[#allocation2 + $0x130] sm:$0xff] }
 0x34d   : > { %1078 = vmatpush1.msra.mxu0 %v3358_v40  ;;  %1149 = vmatpush1.msra.mxu1 %v3360_v41  ;;  %v871_v38 = vadd.f32 %v867_v35, %v3534_v2  ;;  %v3863_v35 = vld [vmem:[#allocation2 + $0x160] sm:$0xff]  ;;  %v3905_v63 = vld [vmem:[#allocation2 + $0xe8] sm:$0xff] }
 0x34e   : > { %1079 = vmatprep.subr.mxu0 %v4929_v4  ;;  %1150 = vmatprep.subr.mxu1 %v4930_v5  ;;  %v872_v40 = vadd.f32 %v868_v37, %v4959_v39  ;;  %v3866_v37 = vld [vmem:[#allocation2 + $0x170] sm:$0xff] }
 0x34f   : > { %1080 = vmatpush1.msra.mxu0 %v4931_v6  ;;  %1151 = vmatpush1.msra.mxu1 %v4932_v7 }
 0x350   : > { %1081 = vmatprep.subr.mxu0 %v4933_v8  ;;  %1152 = vmatprep.subr.mxu1 %v4934_v9 }
 0x351   : > { %1082 = vmatpush1.msra.mxu0 %v4935_v10  ;;  %1153 = vmatpush1.msra.mxu1 %v4936_v11 }
 0x352   : > { %1083 = vmatprep.subr.mxu0 %v4937_v12  ;;  %1154 = vmatprep.subr.mxu1 %v4938_v13 }
 0x353   : > { %1084 = vmatpush1.msra.mxu0 %v4939_v14  ;;  %1155 = vmatpush1.msra.mxu1 %v4940_v15 }
 0x354   : > { %1085 = vmatprep.subr.mxu0 %v4941_v16  ;;  %1156 = vmatprep.subr.mxu1 %v4942_v17  ;;  %v3815_v17 = vld [vmem:[#allocation2 + $0x1e0] sm:$0xff] }
 0x355   : > { %1086 = vmatpush1.msra.mxu0 %v4943_v18  ;;  %1157 = vmatpush1.msra.mxu1 %v4944_v19  ;;  %v3818_v18 = vld [vmem:[#allocation2 + $0x1f0] sm:$0xff]  ;;  %v3821_v19 = vld [vmem:[#allocation2 + $0x1c8] sm:$0xff] }
 0x356   : > { %1087 = vmatprep.subr.mxu0 %v4945_v20  ;;  %1158 = vmatprep.subr.mxu1 %v4946_v21  ;;  %v3827_v20 = vld [vmem:[#allocation2 + $0x1c0] sm:$0xff]  ;;  %v3833_v21 = vld [vmem:[#allocation2 + $0x1a8] sm:$0xff] }
 0x357   : > { %1088 = vmatpush1.msra.mxu0 %v4947_v22  ;;  %1159 = vmatpush1.msra.mxu1 %v4948_v23  ;;  %v3836_v22 = vld [vmem:[#allocation2 + $0x1b8] sm:$0xff]  ;;  %v3839_v23 = vld [vmem:[#allocation2 + $0x1a0] sm:$0xff] }
 0x358   : > { %1089 = vmatprep.subr.mxu0 %v4949_v24  ;;  %1160 = vmatprep.subr.mxu1 %v4950_v25  ;;  %v3842_v24 = vld [vmem:[#allocation2 + $0x1b0] sm:$0xff]  ;;  %v3845_v25 = vld [vmem:[#allocation2 + $0x188] sm:$0xff] }
 0x359   : > { %1090 = vmatpush1.msra.mxu0 %v4951_v26  ;;  %1123 = vmatprep.mubr.f32.mxu0 %v4952_v27  ;;  %v3848_v26 = vld [vmem:[#allocation2 + $0x198] sm:$0xff] }
 0x35a   : > { %1161 = vmatpush1.msra.mxu1 %v4953_v28  ;;  %1194 = vmatprep.mubr.f32.mxu1 %v4952_v27  ;;  %v3851_v28 = vld [vmem:[#allocation2 + $0x180] sm:$0xff] }
 0x35b   : > { %1237 = vmatprep.subr.mxu0 %v3794_v29  ;;  %1308 = vmatprep.subr.mxu1 %v3797_v30 }
 0x35c   : > { %2765 = vset.pattern.permute.xlu1 %v3170_v31  ;;  %v3854_v31 = vld [vmem:[#allocation2 + $0x190] sm:$0xff] }
 0x35d   : > { %1048 = vperm.xlu1 %2765, %v4956_v32   ;;  %v3857_v32 = vld [vmem:[#allocation2 + $0x168] sm:$0xff] }
 0x3fa   : > { %v941_v41 = vpop.f32.mrf.mxu0  ;;  %v1012_v56 = vpop.f32.mrf.mxu1 }
 0x3fb   : > { %v942_v48 = vadd.f32 %v941_v41, %v871_v38  ;;  %v1013_v47 = vadd.f32 %v1012_v56, %v873_v50  ;;  %v3869_v38 = vld [vmem:[#allocation2 + $0x148] sm:$0xff]  ;;  %v3875_v41 = vld [vmem:[#allocation2 + $0x140] sm:$0xff] }
 0x3fc   : > { %v943_v59 = vpop.f32.mrf.mxu0  ;;  %v1014_v54 = vpop.f32.mrf.mxu1  ;;  %v3893_v56 = vld [vmem:[#allocation2 + $0x108] sm:$0xff]  ;;  %v3911_v50 = vld [vmem:[#allocation2 + $0xe0] sm:$0xff] }
 0x3fd   : > { %v2636_v62 = vmul.f32 -1.442695, %v942_v48  ;;  %v944_v49 = vadd.f32 %v943_v59, %v872_v40  ;;  %v1015_v46 = vadd.f32 %v1014_v54, %v874_v45  ;;  %v3872_v40 = vld [vmem:[#allocation2 + $0x158] sm:$0xff]  ;;  %v3878_v48 = vld [vmem:[#allocation2 + $0x150] sm:$0xff]  ;;  %v3881_v59 = vld [vmem:[#allocation2 + $0x128] sm:$0xff] }
 0x3fe   : > { %v3899_v45 = vld [vmem:[#allocation2 + $0x100] sm:$0xff]  ;;  %v3902_v54 = vld [vmem:[#allocation2 + $0x110] sm:$0xff] }
 0x3ff   : > { %2818 = vpow2.f32 %v2636_v62  ;;  %v2637_v58 = vmul.f32 -1.442695, %v944_v49  ;;  %v2638_v43 = vmul.f32 -1.442695, %v1015_v46  ;;  %v3884_v62 = vld [vmem:[#allocation2 + $0x138] sm:$0xff]  ;;  %v3887_v49 = vld [vmem:[#allocation2 + $0x120] sm:$0xff] }
 0x400   : > { %v3908_v46 = vld [vmem:[#allocation2 + $0xf8] sm:$0xff] }
 0x401   : > { %2820 = vpow2.f32 %v2637_v58  ;;  %v3896_v58 = vld [vmem:[#allocation2 + $0x118] sm:$0xff] }
 0x402   : > { %2822 = vpow2.f32 %v2638_v43  ;;  %v3914_v43 = vld [vmem:[#allocation2 + $0xf0] sm:$0xff] }
 0x40c   : > { %v2819_v61 = vpop.eup %2818 }
 0x40d   : > { %v1020_v3 = vadd.f32 1.0, %v2819_v61  ;;  %v3917_v61 = vld [vmem:[#allocation2 + $0xc8] sm:$0xff] }
 0x40e   : > { %v2821_v55 = vpop.eup %2820 }
 0x40f   : > { %2824 = vrcp.f32 %v1020_v3  ;;  %v1026_v51 = vadd.f32 1.0, %v2821_v55  ;;  %v2823_v4 = vpop.eup %2822  ;;  %v3923_v3 = vld [vmem:[#allocation2 + $0xc0] sm:$0xff]  ;;  %v3926_v55 = vld [vmem:[#allocation2 + $0xd0] sm:$0xff] }
 0x410   : > { %2826 = vtanh.f32 %v1013_v47  ;;  %v1033_v8 = vadd.f32 1.0, %v2823_v4  ;;  %v3920_v47 = vld [vmem:[#allocation2 + $0xd8] sm:$0xff] }
 0x411   : > { %2828 = vrcp.f32 %v1026_v51  ;;  %v3929_v51 = vld [vmem:[#allocation2 + $0xa8] sm:$0xff]  ;;  %v3932_v4 = vld [vmem:[#allocation2 + $0xb8] sm:$0xff] }
 0x412   : > { %2830 = vrcp.f32 %v1033_v8  ;;  %v3944_v8 = vld [vmem:[#allocation2 + $0x98] sm:$0xff] }
 0x413   : > { %4963 = vst [vmem:[#allocation13_spill] sm:$0xff] %v3944_v8 }
 0x41c   : > { %v2825_v5 = vpop.eup %2824 }
 0x41d   : > { %v2827_v6 = vpop.eup %2826 }
 0x41e   : > { %v2829_v7 = vpop.eup %2828  ;;  %v1037_v10 = vmul.f32 %v2827_v6, %v2825_v5  ;;  %v3935_v5 = vld [vmem:[#allocation2 + $0xa0] sm:$0xff]  ;;  %v3938_v6 = vld [vmem:[#allocation2 + $0xb0] sm:$0xff] }
 0x41f   : > { %v1036_v9 = vmul.f32 %v2829_v7, %v3723_v57  ;;  %v2831_v13 = vpop.eup %2830  ;;  %4960 = vst [vmem:[#allocation10_spill] sm:$0xff] %v3935_v5  ;;  %4961 = vst [vmem:[#allocation11_spill] sm:$0xff] %v3938_v6  ;;  %v3941_v7 = vld [vmem:[#allocation2 + $0x88] sm:$0xff] }
 0x420   : > { %4962 = vst [vmem:[#allocation12_spill] sm:$0xff] %v3941_v7 }
 0x421   : > { %v1038_v11 = vadd.f32 %v1037_v10, %v1036_v9  ;;  %v3947_v9 = vld [vmem:[#allocation2 + $0x80] sm:$0xff]  ;;  %v3950_v10 = vld [vmem:[#allocation2 + $0x90] sm:$0xff] }
 0x422   : > { %4964 = vst [vmem:[#allocation14_spill] sm:$0xff] %v3947_v9  ;;  %4965 = vst [vmem:[#allocation15_spill] sm:$0xff] %v3950_v10 }
 0x423   : > { %2832 = vtanh.f32 %v1038_v11  ;;  %v3812_v12 = vsel %vm1041_vm3, %v1038_v11, %v3723_v57  ;;  %v3824_v57 = vld [vmem:[#allocation2 + $0x1d8] sm:$0xff]  ;;  %v3953_v11 = vld [vmem:[#allocation2 + $0x68] sm:$0xff] }
 0x424   : > { %4966 = vst [vmem:[#allocation16_spill] sm:$0xff] %v3953_v11 }
 0x430   : > { %v2833_v14 = vpop.eup %2832 }
 0x431   : > { %v1040_v15 = vmul.f32 %v2833_v14, %v2831_v13  ;;  %v3956_v13 = vld [vmem:[#allocation2 + $0x78] sm:$0xff]  ;;  %v3959_v14 = vld [vmem:[#allocation2 + $0x60] sm:$0xff] }
 0x432   : > { %4967 = vst [vmem:[#allocation17_spill] sm:$0xff] %v3956_v13  ;;  %4968 = vst [vmem:[#allocation18_spill] sm:$0xff] %v3959_v14 }
 0x433   : > { %v1046_v16 = vsel %vm1041_vm3, %v1040_v15, %v3726_v42  ;;  %v3830_v42 = vld [vmem:[#allocation2 + $0x1d0] sm:$0xff] }
 0x434   : > { %1124 = vmatmul.mubr.f32.vlgmr.msra.gmra.mxu0 %v1046_v16  ;;  %1195 = vmatmul.mubr.f32.vlgmr.msra.gmra.mxu1 %v1046_v16  ;;  %v3962_v15 = vld [vmem:[#allocation2 + $0x70] sm:$0xff]  ;;  %v3965_v16 = vld [vmem:[#allocation2 + $0x48] sm:$0xff] }
 0x435   : > { %1238 = vmatpush1.msra.mxu0 %v3815_v17  ;;  %1309 = vmatpush1.msra.mxu1 %v3818_v18  ;;  %4969 = vst [vmem:[#allocation19_spill] sm:$0xff] %v3962_v15  ;;  %4970 = vst [vmem:[#allocation20_spill] sm:$0xff] %v3965_v16 }
 0x436   : > { %1239 = vmatprep.subr.mxu0 %v3821_v19  ;;  %1310 = vmatprep.subr.mxu1 %v3824_v57 }
 0x437   : > { %1240 = vmatpush1.msra.mxu0 %v3827_v20  ;;  %1311 = vmatpush1.msra.mxu1 %v3830_v42 }
 0x438   : > { %1241 = vmatprep.subr.mxu0 %v3833_v21  ;;  %1312 = vmatprep.subr.mxu1 %v3836_v22 }
 0x439   : > { %1242 = vmatpush1.msra.mxu0 %v3839_v23  ;;  %1313 = vmatpush1.msra.mxu1 %v3842_v24 }
 0x43a   : > { %1243 = vmatprep.subr.mxu0 %v3845_v25  ;;  %1314 = vmatprep.subr.mxu1 %v3848_v26 }
 0x43b   : > { %1244 = vmatpush1.msra.mxu0 %v3851_v28  ;;  %1315 = vmatpush1.msra.mxu1 %v3854_v31 }
 0x43c   : > { %1245 = vmatprep.subr.mxu0 %v3857_v32  ;;  %1316 = vmatprep.subr.mxu1 %v3860_v33 }
 0x43d   : > { %1246 = vmatpush1.msra.mxu0 %v3863_v35  ;;  %1317 = vmatpush1.msra.mxu1 %v3866_v37 }
 0x43e   : > { %1247 = vmatprep.subr.mxu0 %v3869_v38  ;;  %1318 = vmatprep.subr.mxu1 %v3872_v40 }
 0x43f   : > { %1248 = vmatpush1.msra.mxu0 %v3875_v41  ;;  %1319 = vmatpush1.msra.mxu1 %v3878_v48 }
 0x440   : > { %1249 = vmatprep.subr.mxu0 %v3881_v59  ;;  %1320 = vmatprep.subr.mxu1 %v3884_v62 }
 0x441   : > { %1250 = vmatpush1.msra.mxu0 %v3887_v49  ;;  %1321 = vmatpush1.msra.mxu1 %v3890_v0 }
 0x442   : > { %1251 = vmatprep.subr.mxu0 %v3893_v56  ;;  %1322 = vmatprep.subr.mxu1 %v3896_v58 }
 0x443   : > { %1252 = vmatpush1.msra.mxu0 %v3899_v45  ;;  %1323 = vmatpush1.msra.mxu1 %v3902_v54 }
 0x444   : > { %1253 = vmatprep.subr.mxu0 %v3905_v63  ;;  %1324 = vmatprep.subr.mxu1 %v3908_v46 }
 0x445   : > { %1254 = vmatpush1.msra.mxu0 %v3911_v50  ;;  %1325 = vmatpush1.msra.mxu1 %v3914_v43 }
 0x446   : > { %1255 = vmatprep.subr.mxu0 %v3917_v61  ;;  %1326 = vmatprep.subr.mxu1 %v3920_v47 }
 0x447   : > { %1256 = vmatpush1.msra.mxu0 %v3923_v3  ;;  %1327 = vmatpush1.msra.mxu1 %v3926_v55 }
 0x448   : > { %1257 = vmatprep.subr.mxu0 %v3929_v51  ;;  %1328 = vmatprep.subr.mxu1 %v3932_v4 }
 0x449   : > { %1258 = vmatpush1.msra.mxu0 %v3935_v5  ;;  %1329 = vmatpush1.msra.mxu1 %v3938_v6 }
 0x44a   : > { %1259 = vmatprep.subr.mxu0 %v3941_v7  ;;  %1330 = vmatprep.subr.mxu1 %v3944_v8 }
 0x44b   : > { %1260 = vmatpush1.msra.mxu0 %v3947_v9  ;;  %1331 = vmatpush1.msra.mxu1 %v3950_v10 }
 0x44c   : > { %1261 = vmatprep.subr.mxu0 %v3953_v11  ;;  %1332 = vmatprep.subr.mxu1 %v3956_v13  ;;  %v3971_v11 = vld [vmem:[#allocation2 + $0x40] sm:$0xff]  ;;  %v3974_v13 = vld [vmem:[#allocation2 + $0x50] sm:$0xff] }
 0x44d   : > { %1262 = vmatpush1.msra.mxu0 %v3959_v14  ;;  %1333 = vmatpush1.msra.mxu1 %v3962_v15  ;;  %4972 = vst [vmem:[#allocation22_spill] sm:$0xff] %v3971_v11  ;;  %4973 = vst [vmem:[#allocation23_spill] sm:$0xff] %v3974_v13  ;;  %v3977_v14 = vld [vmem:[#allocation2 + $0x28] sm:$0xff]  ;;  %v3980_v15 = vld [vmem:[#allocation2 + $0x38] sm:$0xff] }
 0x44e   : > { %1263 = vmatprep.subr.mxu0 %v3965_v16  ;;  %1334 = vmatprep.subr.mxu1 %v3968_v60  ;;  %4974 = vst [vmem:[#allocation24_spill] sm:$0xff] %v3977_v14  ;;  %4975 = vst [vmem:[#allocation25_spill] sm:$0xff] %v3980_v15  ;;  %v3983_v16 = vld [vmem:[#allocation2 + $0x20] sm:$0xff]  ;;  %v3986_v60 = vld [vmem:[#allocation2 + $0x30] sm:$0xff] }
 0x44f   : > { %1264 = vmatpush1.msra.mxu0 %v3971_v11  ;;  %1335 = vmatpush1.msra.mxu1 %v3974_v13  ;;  %4976 = vst [vmem:[#allocation26_spill] sm:$0xff] %v3983_v16  ;;  %4977 = vst [vmem:[#allocation27_spill] sm:$0xff] %v3986_v60  ;;  %v3989_v11 = vld [vmem:[#allocation2 + $0x8] sm:$0xff]  ;;  %v3992_v13 = vld [vmem:[#allocation2 + $0x18] sm:$0xff] }
 0x450   : > { %1265 = vmatprep.subr.mxu0 %v3977_v14  ;;  %1336 = vmatprep.subr.mxu1 %v3980_v15  ;;  %4978 = vst [vmem:[#allocation28_spill] sm:$0xff] %v3989_v11  ;;  %4979 = vst [vmem:[#allocation29_spill] sm:$0xff] %v3992_v13  ;;  %v3995_v14 = vld [vmem:[#allocation2] sm:$0xff] }
 0x451   : > { %1266 = vmatpush1.msra.mxu0 %v3983_v16  ;;  %1337 = vmatpush1.msra.mxu1 %v3986_v60  ;;  %4980 = vst [vmem:[#allocation30_spill] sm:$0xff] %v3995_v14  ;;  %v3999_v16 = vld [vmem:[#allocation2 + $0x10] sm:$0xff]  ;;  %v4006_v60 = vld [vmem:[%s3440_s6] sm:$0xff] }
 0x452   : > { %1267 = vmatprep.subr.mxu0 %v3989_v11  ;;  %1338 = vmatprep.subr.mxu1 %v3992_v13  ;;  %4981 = vst [vmem:[#allocation31_spill] sm:$0xff] %v3999_v16  ;;  %v3171_v11 = vmov 5   ;;  %4982 = vst [vmem:[#allocation32_spill] sm:$0xff] %v4006_v60  ;;  %v1049_v13 = vpop.permute.xlu1 %1048 }
 0x453   : > { %1268 = vmatpush1.msra.mxu0 %v3995_v14  ;;  %1301 = vmatprep.mubr.f32.mxu0 %v4952_v27  ;;  %v1051_v14 = vmul.f32 %v1049_v13, %v4957_v34  ;;  %v1052_v15 = vmul.f32 %v1049_v13, %v4958_v36  ;;  %v1053_v36 = vmul.f32 %v1049_v13, %v3546_v44 }
 0x454   : > { %1339 = vmatpush1.msra.mxu1 %v3999_v16  ;;  %1372 = vmatprep.mubr.f32.mxu1 %v4952_v27 }
 0x455   : > { %1415 = vmatprep.subr.mxu0 %v3794_v29  ;;  %1486 = vmatprep.subr.mxu1 %v3797_v30  ;;  %v1055_v10 = vadd.f32 %v1051_v14, %v3534_v2  ;;  %v1056_v16 = vadd.f32 %v1052_v15, %v4959_v39  ;;  %v1057_v14 = vadd.f32 %v1053_v36, %v3550_v53 }
 0x456   : > { %2766 = vset.pattern.permute.xlu0 %v3171_v11  ;;  %v1054_v11 = vmul.f32 %v1049_v13, %v3541_v52  ;;  %v4986_v13 = vld [vmem:[#allocation13_spill] sm:$0xff] }
 0x457   : > { %1226 = vperm.xlu0 %2766, %v4006_v60  }
 0x458   : > { %v1058_v60 = vadd.f32 %v1054_v11, %v3544_v1 }
 0x4f4   : > { %v1125_v27 = vpop.f32.mrf.mxu0  ;;  %v1196_v7 = vpop.f32.mrf.mxu1 }
 0x4f5   : > { %v1126_v9 = vadd.f32 %v1125_v27, %v1055_v10  ;;  %v1197_v27 = vadd.f32 %v1196_v7, %v1057_v14  ;;  %v4985_v7 = vld [vmem:[#allocation12_spill] sm:$0xff]  ;;  %v4987_v14 = vld [vmem:[#allocation14_spill] sm:$0xff] }
 0x4f6   : > { %v1127_v29 = vpop.f32.mrf.mxu0  ;;  %v1198_v34 = vpop.f32.mrf.mxu1 }
 0x4f7   : > { %v2639_v8 = vmul.f32 -1.442695, %v1126_v9  ;;  %v1128_v30 = vadd.f32 %v1127_v29, %v1056_v16  ;;  %v1199_v5 = vadd.f32 %v1198_v34, %v1058_v60 }
 0x4f9   : > { %2834 = vpow2.f32 %v2639_v8  ;;  %v2640_v6 = vmul.f32 -1.442695, %v1128_v30  ;;  %v2641_v15 = vmul.f32 -1.442695, %v1199_v5 }
 0x4fb   : > { %2836 = vpow2.f32 %v2640_v6 }
 0x4fc   : > { %2838 = vpow2.f32 %v2641_v15  ;;  %v4988_v15 = vld [vmem:[#allocation15_spill] sm:$0xff] }
 0x506   : > { %v2835_v39 = vpop.eup %2834 }
 0x507   : > { %v1204_v10 = vadd.f32 1.0, %v2835_v39 }
 0x508   : > { %v2837_v9 = vpop.eup %2836 }
 0x509   : > { %2840 = vrcp.f32 %v1204_v10  ;;  %v1210_v29 = vadd.f32 1.0, %v2837_v9  ;;  %v2839_v30 = vpop.eup %2838  ;;  %v4990_v10 = vld [vmem:[#allocation17_spill] sm:$0xff]  ;;  %v4991_v9 = vld [vmem:[#allocation18_spill] sm:$0xff] }
 0x50a   : > { %2842 = vtanh.f32 %v1197_v27  ;;  %v1217_v11 = vadd.f32 1.0, %v2839_v30  ;;  %v4989_v27 = vld [vmem:[#allocation16_spill] sm:$0xff] }
 0x50b   : > { %2844 = vrcp.f32 %v1210_v29  ;;  %v4992_v29 = vld [vmem:[#allocation19_spill] sm:$0xff]  ;;  %v4993_v30 = vld [vmem:[#allocation20_spill] sm:$0xff] }
 0x50c   : > { %2846 = vrcp.f32 %v1217_v11  ;;  %v4997_v11 = vld [vmem:[#allocation24_spill] sm:$0xff] }
 0x516   : > { %v2841_v6 = vpop.eup %2840 }
 0x517   : > { %v2843_v8 = vpop.eup %2842 }
 0x518   : > { %v2845_v16 = vpop.eup %2844  ;;  %v1221_v1 = vmul.f32 %v2843_v8, %v2841_v6  ;;  %v4994_v6 = vld [vmem:[#allocation21_spill] sm:$0xff]  ;;  %v4995_v8 = vld [vmem:[#allocation22_spill] sm:$0xff] }
 0x519   : > { %v1220_v60 = vmul.f32 %v2845_v16, %v3812_v12  ;;  %v2847_v36 = vpop.eup %2846  ;;  %v4984_v12 = vld [vmem:[#allocation11_spill] sm:$0xff] }
 0x51a   : > { %v4996_v16 = vld [vmem:[#allocation23_spill] sm:$0xff] }
 0x51b   : > { %v4018_v34 = vadd.f32 %v1221_v1, %v1220_v60  ;;  %v4983_v1 = vld [vmem:[#allocation10_spill] sm:$0xff]  ;;  %v4998_v60 = vld [vmem:[#allocation25_spill] sm:$0xff] }
 0x51d   : > { %2848 = vtanh.f32 %v4018_v34 }
 0x52a   : > { %v2849_v39 = vpop.eup %2848 }
 0x52b   : > { %v1224_v5 = vmul.f32 %v2849_v39, %v2847_v36  ;;  %v4999_v36 = vld [vmem:[#allocation26_spill] sm:$0xff]  ;;  %v5000_v39 = vld [vmem:[#allocation27_spill] sm:$0xff] }
 0x52d   : > { %1302 = vmatmul.mubr.f32.vlgmr.msra.gmra.mxu0 %v1224_v5  ;;  %1373 = vmatmul.mubr.f32.vlgmr.msra.gmra.mxu1 %v1224_v5  ;;  %v5001_v5 = vld [vmem:[#allocation28_spill] sm:$0xff] }
 0x52e   : > { %1416 = vmatpush1.msra.mxu0 %v3815_v17  ;;  %1487 = vmatpush1.msra.mxu1 %v3818_v18 }
 0x52f   : > { %1417 = vmatprep.subr.mxu0 %v3821_v19  ;;  %1488 = vmatprep.subr.mxu1 %v3824_v57 }
 0x530   : > { %1418 = vmatpush1.msra.mxu0 %v3827_v20  ;;  %1489 = vmatpush1.msra.mxu1 %v3830_v42 }
 0x531   : > { %1419 = vmatprep.subr.mxu0 %v3833_v21  ;;  %1490 = vmatprep.subr.mxu1 %v3836_v22 }
 0x532   : > { %1420 = vmatpush1.msra.mxu0 %v3839_v23  ;;  %1491 = vmatpush1.msra.mxu1 %v3842_v24 }
 0x533   : > { %1421 = vmatprep.subr.mxu0 %v3845_v25  ;;  %1492 = vmatprep.subr.mxu1 %v3848_v26 }
 0x534   : > { %1422 = vmatpush1.msra.mxu0 %v3851_v28  ;;  %1493 = vmatpush1.msra.mxu1 %v3854_v31 }
 0x535   : > { %1423 = vmatprep.subr.mxu0 %v3857_v32  ;;  %1494 = vmatprep.subr.mxu1 %v3860_v33 }
 0x536   : > { %1424 = vmatpush1.msra.mxu0 %v3863_v35  ;;  %1495 = vmatpush1.msra.mxu1 %v3866_v37 }
 0x537   : > { %1425 = vmatprep.subr.mxu0 %v3869_v38  ;;  %1496 = vmatprep.subr.mxu1 %v3872_v40 }
 0x538   : > { %1426 = vmatpush1.msra.mxu0 %v3875_v41  ;;  %1497 = vmatpush1.msra.mxu1 %v3878_v48 }
 0x539   : > { %1427 = vmatprep.subr.mxu0 %v3881_v59  ;;  %1498 = vmatprep.subr.mxu1 %v3884_v62 }
 0x53a   : > { %1428 = vmatpush1.msra.mxu0 %v3887_v49  ;;  %1499 = vmatpush1.msra.mxu1 %v3890_v0 }
 0x53b   : > { %1429 = vmatprep.subr.mxu0 %v3893_v56  ;;  %1500 = vmatprep.subr.mxu1 %v3896_v58 }
 0x53c   : > { %1430 = vmatpush1.msra.mxu0 %v3899_v45  ;;  %1501 = vmatpush1.msra.mxu1 %v3902_v54 }
 0x53d   : > { %1431 = vmatprep.subr.mxu0 %v3905_v63  ;;  %1502 = vmatprep.subr.mxu1 %v3908_v46 }
 0x53e   : > { %1432 = vmatpush1.msra.mxu0 %v3911_v50  ;;  %1503 = vmatpush1.msra.mxu1 %v3914_v43 }
 0x53f   : > { %1433 = vmatprep.subr.mxu0 %v3917_v61  ;;  %1504 = vmatprep.subr.mxu1 %v3920_v47 }
 0x540   : > { %1434 = vmatpush1.msra.mxu0 %v3923_v3  ;;  %1505 = vmatpush1.msra.mxu1 %v3926_v55 }
 0x541   : > { %1435 = vmatprep.subr.mxu0 %v3929_v51  ;;  %1506 = vmatprep.subr.mxu1 %v3932_v4 }
 0x542   : > { %1436 = vmatpush1.msra.mxu0 %v4983_v1  ;;  %1507 = vmatpush1.msra.mxu1 %v4984_v12 }
 0x543   : > { %1437 = vmatprep.subr.mxu0 %v4985_v7  ;;  %1508 = vmatprep.subr.mxu1 %v4986_v13 }
 0x544   : > { %1438 = vmatpush1.msra.mxu0 %v4987_v14  ;;  %1509 = vmatpush1.msra.mxu1 %v4988_v15 }
 0x545   : > { %1439 = vmatprep.subr.mxu0 %v4989_v27  ;;  %1510 = vmatprep.subr.mxu1 %v4990_v10  ;;  %v5011_v27 = vld [vmem:[#allocation37_spill] sm:$0xff] }
 0x546   : > { %1440 = vmatpush1.msra.mxu0 %v4991_v9  ;;  %1511 = vmatpush1.msra.mxu1 %v4992_v29  ;;  %v5002_v9 = vld [vmem:[#allocation29_spill] sm:$0xff]  ;;  %v5003_v29 = vld [vmem:[#allocation30_spill] sm:$0xff] }
 0x547   : > { %1441 = vmatprep.subr.mxu0 %v4993_v30  ;;  %1512 = vmatprep.subr.mxu1 %v4994_v6  ;;  %v5004_v30 = vmov 0.0   ;;  %v5005_v6 = vld [vmem:[#allocation31_spill] sm:$0xff] }
 0x548   : > { %1442 = vmatpush1.msra.mxu0 %v4995_v8  ;;  %1513 = vmatpush1.msra.mxu1 %v4996_v16  ;;  %v5006_v16 = vld [vmem:[#allocation8_spill] sm:$0xff] }
 0x549   : > { %1443 = vmatprep.subr.mxu0 %v4997_v11  ;;  %1514 = vmatprep.subr.mxu1 %v4998_v60  ;;  %v5007_v11 = vld [vmem:[#allocation9_spill] sm:$0xff]  ;;  %v3172_v60 = vmov 6  }
 0x54a   : > { %1444 = vmatpush1.msra.mxu0 %v4999_v36  ;;  %1515 = vmatpush1.msra.mxu1 %v5000_v39  ;;  %v5008_v36 = vld [vmem:[#allocation32_spill] sm:$0xff]  ;;  %v1227_v39 = vpop.permute.xlu0 %1226 }
 0x54b   : > { %1445 = vmatprep.subr.mxu0 %v5001_v5  ;;  %1516 = vmatprep.subr.mxu1 %v5002_v9  ;;  %v5009_v5 = vld [vmem:[#allocation35_spill] sm:$0xff]  ;;  %v5010_v9 = vld [vmem:[#allocation36_spill] sm:$0xff] }
 0x54c   : > { %1446 = vmatpush1.msra.mxu0 %v5003_v29  ;;  %1479 = vmatprep.mubr.f32.mxu0 %v5004_v30  ;;  %v1229_v8 = vmul.f32 %v1227_v39, %v5009_v5  ;;  %v1230_v10 = vmul.f32 %v1227_v39, %v5010_v9  ;;  %v1231_v9 = vmul.f32 %v1227_v39, %v3546_v44 }
 0x54d   : > { %1517 = vmatpush1.msra.mxu1 %v5005_v6  ;;  %1550 = vmatprep.mubr.f32.mxu1 %v5004_v30 }
 0x54e   : > { %1593 = vmatprep.subr.mxu0 %v5006_v16  ;;  %1664 = vmatprep.subr.mxu1 %v5007_v11  ;;  %v1233_v29 = vadd.f32 %v1229_v8, %v3534_v2  ;;  %v1234_v15 = vadd.f32 %v1230_v10, %v5011_v27  ;;  %v1232_v11 = vmul.f32 %v1227_v39, %v3541_v52 }
 0x54f   : > { %2767 = vset.pattern.permute.xlu1 %v3172_v60  ;;  %v1235_v8 = vadd.f32 %v1231_v9, %v3550_v53 }
 0x550   : > { %1404 = vperm.xlu1 %2767, %v5008_v36   ;;  %v5012_v36 = vld [vmem:[#allocation38_spill] sm:$0xff] }
 0x551   : > { %v1236_v12 = vadd.f32 %v1232_v11, %v5012_v36 }
 0x5ed   : > { %v1303_v6 = vpop.f32.mrf.mxu0  ;;  %v1374_v60 = vpop.f32.mrf.mxu1 }
 0x5ee   : > { %v1304_v14 = vadd.f32 %v1303_v6, %v1233_v29  ;;  %v1375_v29 = vadd.f32 %v1374_v60, %v1235_v8  ;;  %v5016_v60 = vld [vmem:[#allocation13_spill] sm:$0xff]  ;;  %v5017_v8 = vld [vmem:[#allocation14_spill] sm:$0xff] }
 0x5ef   : > { %v1305_v30 = vpop.f32.mrf.mxu0  ;;  %v1376_v5 = vpop.f32.mrf.mxu1 }
 0x5f0   : > { %v2642_v13 = vmul.f32 -1.442695, %v1304_v14  ;;  %v1306_v16 = vadd.f32 %v1305_v30, %v1234_v15  ;;  %v1377_v1 = vadd.f32 %v1376_v5, %v1236_v12  ;;  %v5015_v5 = vld [vmem:[#allocation12_spill] sm:$0xff] }
 0x5f2   : > { %2850 = vpow2.f32 %v2642_v13  ;;  %v2643_v7 = vmul.f32 -1.442695, %v1306_v16  ;;  %v2644_v10 = vmul.f32 -1.442695, %v1377_v1 }
 0x5f4   : > { %2852 = vpow2.f32 %v2643_v7 }
 0x5f5   : > { %2854 = vpow2.f32 %v2644_v10  ;;  %v5018_v10 = vld [vmem:[#allocation15_spill] sm:$0xff] }
 0x5ff   : > { %v2851_v27 = vpop.eup %2850 }
 0x600   : > { %v1382_v6 = vadd.f32 1.0, %v2851_v27 }
 0x601   : > { %v2853_v14 = vpop.eup %2852 }
 0x602   : > { %2856 = vrcp.f32 %v1382_v6  ;;  %v1388_v15 = vadd.f32 1.0, %v2853_v14  ;;  %v2855_v13 = vpop.eup %2854  ;;  %v5020_v6 = vld [vmem:[#allocation17_spill] sm:$0xff]  ;;  %v5021_v14 = vld [vmem:[#allocation18_spill] sm:$0xff] }
 0x603   : > { %2858 = vtanh.f32 %v1375_v29  ;;  %v1395_v11 = vadd.f32 1.0, %v2855_v13  ;;  %v5019_v29 = vld [vmem:[#allocation16_spill] sm:$0xff] }
 0x604   : > { %2860 = vrcp.f32 %v1388_v15  ;;  %v5022_v15 = vld [vmem:[#allocation19_spill] sm:$0xff]  ;;  %v5023_v13 = vld [vmem:[#allocation20_spill] sm:$0xff] }
 0x605   : > { %2862 = vrcp.f32 %v1395_v11  ;;  %v5027_v11 = vld [vmem:[#allocation24_spill] sm:$0xff] }
 0x60f   : > { %v2857_v7 = vpop.eup %2856 }
 0x610   : > { %v2859_v30 = vpop.eup %2858 }
 0x611   : > { %v2861_v16 = vpop.eup %2860  ;;  %v1399_v36 = vmul.f32 %v2859_v30, %v2857_v7  ;;  %v5024_v7 = vld [vmem:[#allocation21_spill] sm:$0xff]  ;;  %v5025_v30 = vld [vmem:[#allocation22_spill] sm:$0xff] }
 0x612   : > { %v1398_v12 = vmul.f32 %v2861_v16, %v4018_v34  ;;  %v2863_v1 = vpop.eup %2862  ;;  %v5013_v34 = vld [vmem:[#allocation10_spill] sm:$0xff]  ;;  %v5026_v16 = vld [vmem:[#allocation23_spill] sm:$0xff] }
 0x614   : > { %v4097_v39 = vadd.f32 %v1399_v36, %v1398_v12  ;;  %v5014_v36 = vld [vmem:[#allocation11_spill] sm:$0xff]  ;;  %v5028_v12 = vld [vmem:[#allocation25_spill] sm:$0xff] }
 0x616   : > { %2864 = vtanh.f32 %v4097_v39 }
 0x623   : > { %v2865_v27 = vpop.eup %2864 }
 0x624   : > { %v1402_v9 = vmul.f32 %v2865_v27, %v2863_v1  ;;  %v5029_v1 = vld [vmem:[#allocation26_spill] sm:$0xff]  ;;  %v5030_v27 = vld [vmem:[#allocation27_spill] sm:$0xff] }
 0x626   : > { %1480 = vmatmul.mubr.f32.vlgmr.msra.gmra.mxu0 %v1402_v9  ;;  %1551 = vmatmul.mubr.f32.vlgmr.msra.gmra.mxu1 %v1402_v9  ;;  %v5031_v9 = vld [vmem:[#allocation28_spill] sm:$0xff] }
 0x627   : > { %1594 = vmatpush1.msra.mxu0 %v3815_v17  ;;  %1665 = vmatpush1.msra.mxu1 %v3818_v18 }
 0x628   : > { %1595 = vmatprep.subr.mxu0 %v3821_v19  ;;  %1666 = vmatprep.subr.mxu1 %v3824_v57 }
 0x629   : > { %1596 = vmatpush1.msra.mxu0 %v3827_v20  ;;  %1667 = vmatpush1.msra.mxu1 %v3830_v42 }
 0x62a   : > { %1597 = vmatprep.subr.mxu0 %v3833_v21  ;;  %1668 = vmatprep.subr.mxu1 %v3836_v22 }
 0x62b   : > { %1598 = vmatpush1.msra.mxu0 %v3839_v23  ;;  %1669 = vmatpush1.msra.mxu1 %v3842_v24 }
 0x62c   : > { %1599 = vmatprep.subr.mxu0 %v3845_v25  ;;  %1670 = vmatprep.subr.mxu1 %v3848_v26 }
 0x62d   : > { %1600 = vmatpush1.msra.mxu0 %v3851_v28  ;;  %1671 = vmatpush1.msra.mxu1 %v3854_v31 }
 0x62e   : > { %1601 = vmatprep.subr.mxu0 %v3857_v32  ;;  %1672 = vmatprep.subr.mxu1 %v3860_v33 }
 0x62f   : > { %1602 = vmatpush1.msra.mxu0 %v3863_v35  ;;  %1673 = vmatpush1.msra.mxu1 %v3866_v37 }
 0x630   : > { %1603 = vmatprep.subr.mxu0 %v3869_v38  ;;  %1674 = vmatprep.subr.mxu1 %v3872_v40 }
 0x631   : > { %1604 = vmatpush1.msra.mxu0 %v3875_v41  ;;  %1675 = vmatpush1.msra.mxu1 %v3878_v48 }
 0x632   : > { %1605 = vmatprep.subr.mxu0 %v3881_v59  ;;  %1676 = vmatprep.subr.mxu1 %v3884_v62 }
 0x633   : > { %1606 = vmatpush1.msra.mxu0 %v3887_v49  ;;  %1677 = vmatpush1.msra.mxu1 %v3890_v0 }
 0x634   : > { %1607 = vmatprep.subr.mxu0 %v3893_v56  ;;  %1678 = vmatprep.subr.mxu1 %v3896_v58 }
 0x635   : > { %1608 = vmatpush1.msra.mxu0 %v3899_v45  ;;  %1679 = vmatpush1.msra.mxu1 %v3902_v54 }
 0x636   : > { %1609 = vmatprep.subr.mxu0 %v3905_v63  ;;  %1680 = vmatprep.subr.mxu1 %v3908_v46 }
 0x637   : > { %1610 = vmatpush1.msra.mxu0 %v3911_v50  ;;  %1681 = vmatpush1.msra.mxu1 %v3914_v43 }
 0x638   : > { %1611 = vmatprep.subr.mxu0 %v3917_v61  ;;  %1682 = vmatprep.subr.mxu1 %v3920_v47 }
 0x639   : > { %1612 = vmatpush1.msra.mxu0 %v3923_v3  ;;  %1683 = vmatpush1.msra.mxu1 %v3926_v55 }
 0x63a   : > { %1613 = vmatprep.subr.mxu0 %v3929_v51  ;;  %1684 = vmatprep.subr.mxu1 %v3932_v4 }
 0x63b   : > { %1614 = vmatpush1.msra.mxu0 %v5013_v34  ;;  %1685 = vmatpush1.msra.mxu1 %v5014_v36 }
 0x63c   : > { %1615 = vmatprep.subr.mxu0 %v5015_v5  ;;  %1686 = vmatprep.subr.mxu1 %v5016_v60 }
 0x63d   : > { %1616 = vmatpush1.msra.mxu0 %v5017_v8  ;;  %1687 = vmatpush1.msra.mxu1 %v5018_v10 }
 0x63e   : > { %1617 = vmatprep.subr.mxu0 %v5019_v29  ;;  %1688 = vmatprep.subr.mxu1 %v5020_v6  ;;  %v5041_v29 = vld [vmem:[#allocation37_spill] sm:$0xff] }
 0x63f   : > { %1618 = vmatpush1.msra.mxu0 %v5021_v14  ;;  %1689 = vmatpush1.msra.mxu1 %v5022_v15  ;;  %v5032_v14 = vld [vmem:[#allocation29_spill] sm:$0xff]  ;;  %v5033_v15 = vld [vmem:[#allocation30_spill] sm:$0xff] }
 0x640   : > { %1619 = vmatprep.subr.mxu0 %v5023_v13  ;;  %1690 = vmatprep.subr.mxu1 %v5024_v7  ;;  %v5034_v13 = vmov 0.0   ;;  %v5035_v7 = vld [vmem:[#allocation31_spill] sm:$0xff] }
 0x641   : > { %1620 = vmatpush1.msra.mxu0 %v5025_v30  ;;  %1691 = vmatpush1.msra.mxu1 %v5026_v16  ;;  %v5036_v16 = vld [vmem:[#allocation8_spill] sm:$0xff] }
 0x642   : > { %1621 = vmatprep.subr.mxu0 %v5027_v11  ;;  %1692 = vmatprep.subr.mxu1 %v5028_v12  ;;  %v5037_v11 = vld [vmem:[#allocation9_spill] sm:$0xff]  ;;  %v3173_v12 = vmov 7   ;;  %v5040_v30 = vld [vmem:[#allocation36_spill] sm:$0xff] }
 0x643   : > { %1622 = vmatpush1.msra.mxu0 %v5029_v1  ;;  %1693 = vmatpush1.msra.mxu1 %v5030_v27  ;;  %v5038_v27 = vld [vmem:[#allocation32_spill] sm:$0xff]  ;;  %v5039_v1 = vld [vmem:[#allocation35_spill] sm:$0xff] }
 0x644   : > { %1623 = vmatprep.subr.mxu0 %v5031_v9  ;;  %1694 = vmatprep.subr.mxu1 %v5032_v14  ;;  %v1405_v9 = vpop.permute.xlu1 %1404 }
 0x645   : > { %1624 = vmatpush1.msra.mxu0 %v5033_v15  ;;  %1657 = vmatprep.mubr.f32.mxu0 %v5034_v13  ;;  %v1407_v14 = vmul.f32 %v1405_v9, %v5039_v1  ;;  %v1408_v15 = vmul.f32 %v1405_v9, %v5040_v30  ;;  %v1409_v30 = vmul.f32 %v1405_v9, %v3546_v44 }
 0x646   : > { %1695 = vmatpush1.msra.mxu1 %v5035_v7  ;;  %1728 = vmatprep.mubr.f32.mxu1 %v5034_v13 }
 0x647   : > { %1759 = vmatprep.subr.mxu0 %v5036_v16  ;;  %1830 = vmatprep.subr.mxu1 %v5037_v11  ;;  %v1411_v6 = vadd.f32 %v1407_v14, %v3534_v2  ;;  %v1412_v7 = vadd.f32 %v1408_v15, %v5041_v29  ;;  %v1410_v11 = vmul.f32 %v1405_v9, %v3541_v52  ;;  %v5044_v9 = vld [vmem:[#allocation11_spill] sm:$0xff] }
 0x648   : > { %2768 = vset.pattern.permute.xlu1 %v3173_v12  ;;  %2769 = vset.pattern.permute.xlu0 %v3173_v12  ;;  %v1413_v14 = vadd.f32 %v1409_v30, %v3550_v53 }
 0x649   : > { %1582 = vperm.xlu1 %2768, %v5038_v27   ;;  %v5042_v27 = vld [vmem:[#allocation38_spill] sm:$0xff] }
 0x64a   : > { %v1414_v36 = vadd.f32 %v1410_v11, %v5042_v27 }
 0x6e6   : > { %v1481_v10 = vpop.f32.mrf.mxu0  ;;  %v1552_v12 = vpop.f32.mrf.mxu1 }
 0x6e7   : > { %v1482_v13 = vadd.f32 %v1481_v10, %v1411_v6  ;;  %v1553_v10 = vadd.f32 %v1552_v12, %v1413_v14  ;;  %v5045_v12 = vld [vmem:[#allocation12_spill] sm:$0xff]  ;;  %v5047_v14 = vld [vmem:[#allocation14_spill] sm:$0xff] }
 0x6e8   : > { %v1483_v8 = vpop.f32.mrf.mxu0  ;;  %v1554_v1 = vpop.f32.mrf.mxu1 }
 0x6e9   : > { %v2645_v16 = vmul.f32 -1.442695, %v1482_v13  ;;  %v1484_v60 = vadd.f32 %v1483_v8, %v1412_v7  ;;  %v1555_v34 = vadd.f32 %v1554_v1, %v1414_v36 }
 0x6eb   : > { %2866 = vpow2.f32 %v2645_v16  ;;  %v2646_v5 = vmul.f32 -1.442695, %v1484_v60  ;;  %v2647_v15 = vmul.f32 -1.442695, %v1555_v34 }
 0x6ed   : > { %2868 = vpow2.f32 %v2646_v5 }
 0x6ee   : > { %2870 = vpow2.f32 %v2647_v15  ;;  %v5048_v15 = vld [vmem:[#allocation15_spill] sm:$0xff] }
 0x6f8   : > { %v2867_v29 = vpop.eup %2866 }
 0x6f9   : > { %v1560_v6 = vadd.f32 1.0, %v2867_v29 }
 0x6fa   : > { %v2869_v13 = vpop.eup %2868 }
 0x6fb   : > { %2872 = vrcp.f32 %v1560_v6  ;;  %v1566_v8 = vadd.f32 1.0, %v2869_v13  ;;  %v2871_v60 = vpop.eup %2870  ;;  %v5050_v6 = vld [vmem:[#allocation17_spill] sm:$0xff]  ;;  %v5051_v13 = vld [vmem:[#allocation18_spill] sm:$0xff] }
 0x6fc   : > { %2874 = vtanh.f32 %v1553_v10  ;;  %v1573_v11 = vadd.f32 1.0, %v2871_v60  ;;  %v5049_v10 = vld [vmem:[#allocation16_spill] sm:$0xff] }
 0x6fd   : > { %2876 = vrcp.f32 %v1566_v8  ;;  %v5052_v8 = vld [vmem:[#allocation19_spill] sm:$0xff]  ;;  %v5053_v60 = vld [vmem:[#allocation20_spill] sm:$0xff] }
 0x6fe   : > { %2878 = vrcp.f32 %v1573_v11  ;;  %v5057_v11 = vld [vmem:[#allocation24_spill] sm:$0xff] }
 0x708   : > { %v2873_v5 = vpop.eup %2872 }
 0x709   : > { %v2875_v7 = vpop.eup %2874 }
 0x70a   : > { %v2877_v16 = vpop.eup %2876  ;;  %v1577_v27 = vmul.f32 %v2875_v7, %v2873_v5  ;;  %v5054_v5 = vld [vmem:[#allocation21_spill] sm:$0xff]  ;;  %v5055_v7 = vld [vmem:[#allocation22_spill] sm:$0xff] }
 0x70b   : > { %v1576_v36 = vmul.f32 %v2877_v16, %v4097_v39  ;;  %v2879_v34 = vpop.eup %2878  ;;  %v5043_v39 = vld [vmem:[#allocation10_spill] sm:$0xff]  ;;  %v5056_v16 = vld [vmem:[#allocation23_spill] sm:$0xff] }
 0x70d   : > { %v4176_v1 = vadd.f32 %v1577_v27, %v1576_v36  ;;  %v5046_v27 = vld [vmem:[#allocation13_spill] sm:$0xff] }
 0x70e   : > { %v5058_v36 = vld [vmem:[#allocation25_spill] sm:$0xff] }
 0x70f   : > { %2880 = vtanh.f32 %v4176_v1 }
 0x71c   : > { %v2881_v29 = vpop.eup %2880 }
 0x71d   : > { %v1580_v30 = vmul.f32 %v2881_v29, %v2879_v34  ;;  %v5059_v34 = vld [vmem:[#allocation26_spill] sm:$0xff]  ;;  %v5060_v29 = vld [vmem:[#allocation27_spill] sm:$0xff] }
 0x71f   : > { %1658 = vmatmul.mubr.f32.vlgmr.msra.gmra.mxu0 %v1580_v30  ;;  %1729 = vmatmul.mubr.f32.vlgmr.msra.gmra.mxu1 %v1580_v30  ;;  %v5061_v30 = vld [vmem:[#allocation28_spill] sm:$0xff] }
 0x720   : > { %1760 = vmatpush1.msra.mxu0 %v3815_v17  ;;  %1831 = vmatpush1.msra.mxu1 %v3818_v18 }
 0x721   : > { %1761 = vmatprep.subr.mxu0 %v3821_v19  ;;  %1832 = vmatprep.subr.mxu1 %v3824_v57 }
 0x722   : > { %1762 = vmatpush1.msra.mxu0 %v3827_v20  ;;  %1833 = vmatpush1.msra.mxu1 %v3830_v42 }
 0x723   : > { %1763 = vmatprep.subr.mxu0 %v3833_v21  ;;  %1834 = vmatprep.subr.mxu1 %v3836_v22 }
 0x724   : > { %1764 = vmatpush1.msra.mxu0 %v3839_v23  ;;  %1835 = vmatpush1.msra.mxu1 %v3842_v24 }
 0x725   : > { %1765 = vmatprep.subr.mxu0 %v3845_v25  ;;  %1836 = vmatprep.subr.mxu1 %v3848_v26 }
 0x726   : > { %1766 = vmatpush1.msra.mxu0 %v3851_v28  ;;  %1837 = vmatpush1.msra.mxu1 %v3854_v31 }
 0x727   : > { %1767 = vmatprep.subr.mxu0 %v3857_v32  ;;  %1838 = vmatprep.subr.mxu1 %v3860_v33 }
 0x728   : > { %1768 = vmatpush1.msra.mxu0 %v3863_v35  ;;  %1839 = vmatpush1.msra.mxu1 %v3866_v37 }
 0x729   : > { %1769 = vmatprep.subr.mxu0 %v3869_v38  ;;  %1840 = vmatprep.subr.mxu1 %v3872_v40 }
 0x72a   : > { %1770 = vmatpush1.msra.mxu0 %v3875_v41  ;;  %1841 = vmatpush1.msra.mxu1 %v3878_v48 }
 0x72b   : > { %1771 = vmatprep.subr.mxu0 %v3881_v59  ;;  %1842 = vmatprep.subr.mxu1 %v3884_v62 }
 0x72c   : > { %1772 = vmatpush1.msra.mxu0 %v3887_v49  ;;  %1843 = vmatpush1.msra.mxu1 %v3890_v0 }
 0x72d   : > { %1773 = vmatprep.subr.mxu0 %v3893_v56  ;;  %1844 = vmatprep.subr.mxu1 %v3896_v58 }
 0x72e   : > { %1774 = vmatpush1.msra.mxu0 %v3899_v45  ;;  %1845 = vmatpush1.msra.mxu1 %v3902_v54 }
 0x72f   : > { %1775 = vmatprep.subr.mxu0 %v3905_v63  ;;  %1846 = vmatprep.subr.mxu1 %v3908_v46 }
 0x730   : > { %1776 = vmatpush1.msra.mxu0 %v3911_v50  ;;  %1847 = vmatpush1.msra.mxu1 %v3914_v43 }
 0x731   : > { %1777 = vmatprep.subr.mxu0 %v3917_v61  ;;  %1848 = vmatprep.subr.mxu1 %v3920_v47 }
 0x732   : > { %1778 = vmatpush1.msra.mxu0 %v3923_v3  ;;  %1849 = vmatpush1.msra.mxu1 %v3926_v55 }
 0x733   : > { %1779 = vmatprep.subr.mxu0 %v3929_v51  ;;  %1850 = vmatprep.subr.mxu1 %v3932_v4 }
 0x734   : > { %1780 = vmatpush1.msra.mxu0 %v5043_v39  ;;  %1851 = vmatpush1.msra.mxu1 %v5044_v9 }
 0x735   : > { %1781 = vmatprep.subr.mxu0 %v5045_v12  ;;  %1852 = vmatprep.subr.mxu1 %v5046_v27 }
 0x736   : > { %1782 = vmatpush1.msra.mxu0 %v5047_v14  ;;  %1853 = vmatpush1.msra.mxu1 %v5048_v15 }
 0x737   : > { %1783 = vmatprep.subr.mxu0 %v5049_v10  ;;  %1854 = vmatprep.subr.mxu1 %v5050_v6 }
 0x738   : > { %1784 = vmatpush1.msra.mxu0 %v5051_v13  ;;  %1855 = vmatpush1.msra.mxu1 %v5052_v8  ;;  %v5062_v13 = vld [vmem:[#allocation29_spill] sm:$0xff]  ;;  %v5063_v8 = vld [vmem:[#allocation30_spill] sm:$0xff] }
 0x739   : > { %1785 = vmatprep.subr.mxu0 %v5053_v60  ;;  %1856 = vmatprep.subr.mxu1 %v5054_v5  ;;  %v5064_v60 = vmov 0.0   ;;  %v5065_v5 = vld [vmem:[#allocation31_spill] sm:$0xff] }
 0x73a   : > { %1786 = vmatpush1.msra.mxu0 %v5055_v7  ;;  %1857 = vmatpush1.msra.mxu1 %v5056_v16  ;;  %v5066_v16 = vld [vmem:[#allocation8_spill] sm:$0xff] }
 0x73b   : > { %1787 = vmatprep.subr.mxu0 %v5057_v11  ;;  %1858 = vmatprep.subr.mxu1 %v5058_v36  ;;  %v5067_v11 = vld [vmem:[#allocation9_spill] sm:$0xff]  ;;  %v1583_v36 = vpop.permute.xlu1 %1582 }
 0x73c   : > { %1788 = vmatpush1.msra.mxu0 %v5059_v34  ;;  %1859 = vmatpush1.msra.mxu1 %v5060_v29  ;;  %v5068_v34 = vld [vmem:[#allocation35_spill] sm:$0xff]  ;;  %v5069_v29 = vld [vmem:[#allocation36_spill] sm:$0xff] }
 0x73d   : > { %1789 = vmatprep.subr.mxu0 %v5061_v30  ;;  %1860 = vmatprep.subr.mxu1 %v5062_v13  ;;  %v1585_v7 = vmul.f32 %v1583_v36, %v5068_v34  ;;  %v1586_v6 = vmul.f32 %v1583_v36, %v5069_v29  ;;  %v5070_v13 = vld [vmem:[#allocation37_spill] sm:$0xff]  ;;  %v1587_v29 = vmul.f32 %v1583_v36, %v3546_v44 }
 0x73e   : > { %1790 = vmatpush1.msra.mxu0 %v5063_v8  ;;  %1823 = vmatprep.mubr.f32.mxu0 %v5064_v60 }
 0x73f   : > { %1861 = vmatpush1.msra.mxu1 %v5065_v5  ;;  %1894 = vmatprep.mubr.f32.mxu1 %v5064_v60  ;;  %v1589_v30 = vadd.f32 %v1585_v7, %v3534_v2  ;;  %v1590_v10 = vadd.f32 %v1586_v6, %v5070_v13  ;;  %v1588_v60 = vmul.f32 %v1583_v36, %v3541_v52 }
 0x740   : > { %1932 = vmatprep.subr.mxu0 %v5066_v16  ;;  %2003 = vmatprep.subr.mxu1 %v5067_v11  ;;  %v5071_v11 = vld [vmem:[#allocation38_spill] sm:$0xff]  ;;  %v1591_v7 = vadd.f32 %v1587_v29, %v3550_v53 }
 0x741   : > { %v1592_v9 = vadd.f32 %v1588_v60, %v5071_v11 }
 0x7df   : > { %v1659_v8 = vpop.f32.mrf.mxu0  ;;  %v1730_v16 = vpop.f32.mrf.mxu1 }
 0x7e0   : > { %v1660_v15 = vadd.f32 %v1659_v8, %v1589_v30  ;;  %v1731_v8 = vadd.f32 %v1730_v16, %v1591_v7  ;;  %v5096_v7 = vld [vmem:[#allocation39_spill] sm:$0xff] }
 0x7e1   : > { %v1661_v14 = vpop.f32.mrf.mxu0  ;;  %v1732_v34 = vpop.f32.mrf.mxu1  ;;  %vm1925_vm4 = vcmp.ge.s32.totalorder %v5096_v7, 4  ;;  %vm1926_vm5 = vcmp.lt.s32.totalorder %v5096_v7, 20  ;;  %vm2098_vm7 = vcmp.ge.s32.totalorder %v5096_v7, 8  ;;  %vm2270_vm9 = vcmp.ge.s32.totalorder %v5096_v7, 12 }
 0x7e2   : > { %v2648_v27 = vmul.f32 -1.442695, %v1660_v15  ;;  %v1662_v5 = vadd.f32 %v1661_v14, %v1590_v10  ;;  %v1733_v39 = vadd.f32 %v1732_v34, %v1592_v9  ;;  %vm1927_vm6 = vmand %vm1925_vm4, %vm1926_vm5  ;;  %vm2442_vm12 = vcmp.ge.s32.totalorder %v5096_v7, 16 }
 0x7e3   : > { %vm2099_vm8 = vmand %vm2098_vm7, %vm1926_vm5 }
 0x7e4   : > { %2882 = vpow2.f32 %v2648_v27  ;;  %v2649_v12 = vmul.f32 -1.442695, %v1662_v5  ;;  %v2650_v6 = vmul.f32 -1.442695, %v1733_v39  ;;  %vm4627_vm10 = vmand %vm2270_vm9, %vm1926_vm5 }
 0x7e5   : > { %vm2443_vm13 = vmand %vm2442_vm12, %vm1926_vm5 }
 0x7e6   : > { %2884 = vpow2.f32 %v2649_v12 }
 0x7e7   : > { %2886 = vpow2.f32 %v2650_v6 }
 0x7f1   : > { %v2883_v13 = vpop.eup %2882 }
 0x7f2   : > { %v1738_v30 = vadd.f32 1.0, %v2883_v13 }
 0x7f3   : > { %v2885_v15 = vpop.eup %2884 }
 0x7f4   : > { %2888 = vrcp.f32 %v1738_v30  ;;  %v1744_v52 = vadd.f32 1.0, %v2885_v15  ;;  %v2887_v27 = vpop.eup %2886 }
 0x7f5   : > { %2890 = vtanh.f32 %v1731_v8  ;;  %v1751_v60 = vadd.f32 1.0, %v2887_v27 }
 0x7f6   : > { %2892 = vrcp.f32 %v1744_v52 }
 0x7f7   : > { %2894 = vrcp.f32 %v1751_v60 }
 0x801   : > { %v2889_v12 = vpop.eup %2888 }
 0x802   : > { %v2891_v14 = vpop.eup %2890 }
 0x803   : > { %v2893_v10 = vpop.eup %2892  ;;  %v1755_v5 = vmul.f32 %v2891_v14, %v2889_v12 }
 0x804   : > { %v1754_v44 = vmul.f32 %v2893_v10, %v4176_v1  ;;  %v2895_v39 = vpop.eup %2894 }
 0x806   : > { %v4254_v9 = vadd.f32 %v1755_v5, %v1754_v44  ;;  %v4348_v5 = vld [vmem:[#allocation2 + $0x1e0] sm:$0xff]  ;;  %v4351_v44 = vld [vmem:[#allocation2 + $0x1f0] sm:$0xff] }
 0x808   : > { %2896 = vtanh.f32 %v4254_v9 }
 0x815   : > { %v2897_v13 = vpop.eup %2896 }
 0x816   : > { %v4257_v36 = vmul.f32 %v2897_v13, %v2895_v39  ;;  %v4357_v39 = vld [vmem:[#allocation2 + $0x1d8] sm:$0xff]  ;;  %v4360_v13 = vld [vmem:[#allocation2 + $0x1c0] sm:$0xff] }
 0x818   : > { %1824 = vmatmul.mubr.f32.vlgmr.msra.gmra.mxu0 %v4257_v36  ;;  %1895 = vmatmul.mubr.f32.vlgmr.msra.gmra.mxu1 %v4257_v36 }
 0x819   : > { %1933 = vmatpush1.msra.mxu0 %v3815_v17  ;;  %2004 = vmatpush1.msra.mxu1 %v3818_v18  ;;  %v5072_v17 = vld [vmem:[#allocation10_spill] sm:$0xff]  ;;  %v5073_v18 = vld [vmem:[#allocation11_spill] sm:$0xff] }
 0x81a   : > { %1934 = vmatprep.subr.mxu0 %v3821_v19  ;;  %2005 = vmatprep.subr.mxu1 %v3824_v57  ;;  %v5074_v19 = vld [vmem:[#allocation12_spill] sm:$0xff]  ;;  %v5075_v57 = vld [vmem:[#allocation13_spill] sm:$0xff] }
 0x81b   : > { %1935 = vmatpush1.msra.mxu0 %v3827_v20  ;;  %2006 = vmatpush1.msra.mxu1 %v3830_v42  ;;  %v5076_v20 = vld [vmem:[#allocation14_spill] sm:$0xff]  ;;  %v5077_v42 = vld [vmem:[#allocation15_spill] sm:$0xff] }
 0x81c   : > { %1936 = vmatprep.subr.mxu0 %v3833_v21  ;;  %2007 = vmatprep.subr.mxu1 %v3836_v22  ;;  %v5078_v21 = vld [vmem:[#allocation16_spill] sm:$0xff]  ;;  %v5079_v22 = vld [vmem:[#allocation17_spill] sm:$0xff] }
 0x81d   : > { %1937 = vmatpush1.msra.mxu0 %v3839_v23  ;;  %2008 = vmatpush1.msra.mxu1 %v3842_v24  ;;  %v5080_v23 = vld [vmem:[#allocation18_spill] sm:$0xff]  ;;  %v5081_v24 = vld [vmem:[#allocation19_spill] sm:$0xff] }
 0x81e   : > { %1938 = vmatprep.subr.mxu0 %v3845_v25  ;;  %2009 = vmatprep.subr.mxu1 %v3848_v26  ;;  %v5082_v25 = vld [vmem:[#allocation20_spill] sm:$0xff]  ;;  %v5083_v26 = vld [vmem:[#allocation21_spill] sm:$0xff] }
 0x81f   : > { %1939 = vmatpush1.msra.mxu0 %v3851_v28  ;;  %2010 = vmatpush1.msra.mxu1 %v3854_v31  ;;  %v5084_v28 = vld [vmem:[#allocation22_spill] sm:$0xff]  ;;  %v5085_v31 = vld [vmem:[#allocation23_spill] sm:$0xff] }
 0x820   : > { %1940 = vmatprep.subr.mxu0 %v3857_v32  ;;  %2011 = vmatprep.subr.mxu1 %v3860_v33  ;;  %v5086_v32 = vld [vmem:[#allocation24_spill] sm:$0xff]  ;;  %v5087_v33 = vld [vmem:[#allocation25_spill] sm:$0xff] }
 0x821   : > { %1941 = vmatpush1.msra.mxu0 %v3863_v35  ;;  %2012 = vmatpush1.msra.mxu1 %v3866_v37  ;;  %v5088_v35 = vld [vmem:[#allocation26_spill] sm:$0xff]  ;;  %v5089_v37 = vld [vmem:[#allocation27_spill] sm:$0xff] }
 0x822   : > { %1942 = vmatprep.subr.mxu0 %v3869_v38  ;;  %2013 = vmatprep.subr.mxu1 %v3872_v40  ;;  %v5090_v38 = vld [vmem:[#allocation28_spill] sm:$0xff]  ;;  %v5091_v40 = vld [vmem:[#allocation29_spill] sm:$0xff] }
 0x823   : > { %1943 = vmatpush1.msra.mxu0 %v3875_v41  ;;  %2014 = vmatpush1.msra.mxu1 %v3878_v48  ;;  %v5092_v41 = vld [vmem:[#allocation30_spill] sm:$0xff]  ;;  %v5093_v48 = vmov 0.0  }
 0x824   : > { %1944 = vmatprep.subr.mxu0 %v3881_v59  ;;  %2015 = vmatprep.subr.mxu1 %v3884_v62  ;;  %v5094_v59 = vld [vmem:[#allocation31_spill] sm:$0xff]  ;;  %v4325_v62 = vld [vmem:[#allocation2 + $0x1e8] sm:$0xff] }
 0x825   : > { %1945 = vmatpush1.msra.mxu0 %v3887_v49  ;;  %2016 = vmatpush1.msra.mxu1 %v3890_v0  ;;  %v4328_v49 = vld [vmem:[#allocation2 + $0x1f8] sm:$0xff] }
 0x826   : > { %1946 = vmatprep.subr.mxu0 %v3893_v56  ;;  %2017 = vmatprep.subr.mxu1 %v3896_v58 }
 0x827   : > { %1947 = vmatpush1.msra.mxu0 %v3899_v45  ;;  %2018 = vmatpush1.msra.mxu1 %v3902_v54  ;;  %v5095_v54 = vld [vmem:[#allocation37_spill] sm:$0xff] }
 0x828   : > { %1948 = vmatprep.subr.mxu0 %v3905_v63  ;;  %2019 = vmatprep.subr.mxu1 %v3908_v46 }
 0x829   : > { %1949 = vmatpush1.msra.mxu0 %v3911_v50  ;;  %2020 = vmatpush1.msra.mxu1 %v3914_v43 }
 0x82a   : > { %1950 = vmatprep.subr.mxu0 %v3917_v61  ;;  %2021 = vmatprep.subr.mxu1 %v3920_v47 }
 0x82b   : > { %1951 = vmatpush1.msra.mxu0 %v3923_v3  ;;  %2022 = vmatpush1.msra.mxu1 %v3926_v55 }
 0x82c   : > { %1952 = vmatprep.subr.mxu0 %v3929_v51  ;;  %2023 = vmatprep.subr.mxu1 %v3932_v4 }
 0x82d   : > { %1953 = vmatpush1.msra.mxu0 %v5072_v17  ;;  %2024 = vmatpush1.msra.mxu1 %v5073_v18  ;;  %v4366_v17 = vld [vmem:[#allocation2 + $0x1a8] sm:$0xff]  ;;  %v4369_v18 = vld [vmem:[#allocation2 + $0x1b8] sm:$0xff] }
 0x82e   : > { %1954 = vmatprep.subr.mxu0 %v5074_v19  ;;  %2025 = vmatprep.subr.mxu1 %v5075_v57  ;;  %v4372_v19 = vld [vmem:[#allocation2 + $0x1a0] sm:$0xff]  ;;  %v4375_v57 = vld [vmem:[#allocation2 + $0x1b0] sm:$0xff] }
 0x82f   : > { %1955 = vmatpush1.msra.mxu0 %v5076_v20  ;;  %2026 = vmatpush1.msra.mxu1 %v5077_v42  ;;  %v4378_v20 = vld [vmem:[#allocation2 + $0x188] sm:$0xff]  ;;  %v4381_v42 = vld [vmem:[#allocation2 + $0x198] sm:$0xff] }
 0x830   : > { %1956 = vmatprep.subr.mxu0 %v5078_v21  ;;  %2027 = vmatprep.subr.mxu1 %v5079_v22  ;;  %v4384_v21 = vld [vmem:[#allocation2 + $0x180] sm:$0xff]  ;;  %v4387_v22 = vld [vmem:[#allocation2 + $0x190] sm:$0xff] }
 0x831   : > { %1957 = vmatpush1.msra.mxu0 %v5080_v23  ;;  %2028 = vmatpush1.msra.mxu1 %v5081_v24  ;;  %v4390_v23 = vld [vmem:[#allocation2 + $0x168] sm:$0xff]  ;;  %v4393_v24 = vld [vmem:[#allocation2 + $0x178] sm:$0xff] }
 0x832   : > { %1958 = vmatprep.subr.mxu0 %v5082_v25  ;;  %2029 = vmatprep.subr.mxu1 %v5083_v26  ;;  %v4396_v25 = vld [vmem:[#allocation2 + $0x160] sm:$0xff]  ;;  %v4399_v26 = vld [vmem:[#allocation2 + $0x170] sm:$0xff] }
 0x833   : > { %1959 = vmatpush1.msra.mxu0 %v5084_v28  ;;  %2030 = vmatpush1.msra.mxu1 %v5085_v31  ;;  %v4402_v28 = vld [vmem:[#allocation2 + $0x148] sm:$0xff]  ;;  %v4405_v31 = vld [vmem:[#allocation2 + $0x158] sm:$0xff] }
 0x834   : > { %1960 = vmatprep.subr.mxu0 %v5086_v32  ;;  %2031 = vmatprep.subr.mxu1 %v5087_v33  ;;  %v4408_v32 = vld [vmem:[#allocation2 + $0x140] sm:$0xff]  ;;  %v4411_v33 = vld [vmem:[#allocation2 + $0x150] sm:$0xff] }
 0x835   : > { %1961 = vmatpush1.msra.mxu0 %v5088_v35  ;;  %2032 = vmatpush1.msra.mxu1 %v5089_v37  ;;  %v4414_v35 = vld [vmem:[#allocation2 + $0x128] sm:$0xff]  ;;  %v4417_v37 = vld [vmem:[#allocation2 + $0x138] sm:$0xff] }
 0x836   : > { %1962 = vmatprep.subr.mxu0 %v5090_v38  ;;  %2033 = vmatprep.subr.mxu1 %v5091_v40  ;;  %v4420_v38 = vld [vmem:[#allocation2 + $0x120] sm:$0xff]  ;;  %v4423_v40 = vld [vmem:[#allocation2 + $0x130] sm:$0xff] }
 0x837   : > { %1963 = vmatpush1.msra.mxu0 %v5092_v41  ;;  %1996 = vmatprep.mubr.f32.mxu0 %v5093_v48  ;;  %v4426_v41 = vld [vmem:[#allocation2 + $0x108] sm:$0xff] }
 0x838   : > { %2034 = vmatpush1.msra.mxu1 %v5094_v59  ;;  %2067 = vmatprep.mubr.f32.mxu1 %v5093_v48  ;;  %v4429_v59 = vld [vmem:[#allocation2 + $0x118] sm:$0xff] }
 0x839   : > { %2104 = vmatprep.subr.mxu0 %v4325_v62  ;;  %2175 = vmatprep.subr.mxu1 %v4328_v49 }
 0x8d8   : > { %v1825_v0 = vpop.f32.mrf.mxu0  ;;  %v1896_v46 = vpop.f32.mrf.mxu1 }
 0x8d9   : > { %v1826_v56 = vadd.f32 %v1825_v0, %v3534_v2  ;;  %v1897_v55 = vadd.f32 %v1896_v46, %v3550_v53  ;;  %v4432_v0 = vld [vmem:[#allocation2 + $0x100] sm:$0xff]  ;;  %v4447_v46 = vld [vmem:[#allocation2 + $0xf0] sm:$0xff] }
 0x8da   : > { %v1827_v58 = vpop.f32.mrf.mxu0  ;;  %v1898_v43 = vpop.f32.mrf.mxu1 }
 0x8db   : > { %v2651_v45 = vmul.f32 -1.442695, %v1826_v56  ;;  %v1828_v63 = vadd.f32 %v1827_v58, %v5095_v54  ;;  %v1899_v61 = vadd.f32 %v1898_v43, %v5071_v11  ;;  %v4435_v56 = vld [vmem:[#allocation2 + $0x110] sm:$0xff]  ;;  %v4438_v58 = vld [vmem:[#allocation2 + $0xe8] sm:$0xff]  ;;  %v4453_v43 = vld [vmem:[#allocation2 + $0xd8] sm:$0xff] }
 0x8dd   : > { %2898 = vpow2.f32 %v2651_v45  ;;  %v2652_v50 = vmul.f32 -1.442695, %v1828_v63  ;;  %v2653_v47 = vmul.f32 -1.442695, %v1899_v61  ;;  %v4441_v45 = vld [vmem:[#allocation2 + $0xf8] sm:$0xff]  ;;  %v4444_v63 = vld [vmem:[#allocation2 + $0xe0] sm:$0xff] }
 0x8de   : > { %v4456_v61 = vld [vmem:[#allocation2 + $0xc0] sm:$0xff] }
 0x8df   : > { %2900 = vpow2.f32 %v2652_v50  ;;  %v4450_v50 = vld [vmem:[#allocation2 + $0xc8] sm:$0xff] }
 0x8e0   : > { %2902 = vpow2.f32 %v2653_v47  ;;  %v4459_v47 = vld [vmem:[#allocation2 + $0xd0] sm:$0xff] }
 0x8ea   : > { %v2899_v3 = vpop.eup %2898 }
 0x8eb   : > { %v1904_v51 = vadd.f32 1.0, %v2899_v3  ;;  %v4462_v3 = vld [vmem:[#allocation2 + $0xa8] sm:$0xff] }
 0x8ec   : > { %v2901_v4 = vpop.eup %2900 }
 0x8ed   : > { %2904 = vrcp.f32 %v1904_v51  ;;  %v1910_v1 = vadd.f32 1.0, %v2901_v4  ;;  %v2903_v16 = vpop.eup %2902  ;;  %v4468_v51 = vld [vmem:[#allocation2 + $0xa0] sm:$0xff]  ;;  %v4471_v4 = vld [vmem:[#allocation2 + $0xb0] sm:$0xff] }
 0x8ee   : > { %2906 = vtanh.f32 %v1897_v55  ;;  %v1917_v8 = vadd.f32 1.0, %v2903_v16  ;;  %v4465_v55 = vld [vmem:[#allocation2 + $0xb8] sm:$0xff] }
 0x8ef   : > { %2908 = vrcp.f32 %v1910_v1  ;;  %v4474_v1 = vld [vmem:[#allocation2 + $0x88] sm:$0xff]  ;;  %v4477_v16 = vld [vmem:[#allocation2 + $0x98] sm:$0xff] }
 0x8f0   : > { %2910 = vrcp.f32 %v1917_v8  ;;  %5097 = vst [vmem:[#allocation33_spill] sm:$0xff] %v4477_v16  ;;  %v4489_v8 = vld [vmem:[#allocation2 + $0x78] sm:$0xff] }
 0x8f1   : > { %5101 = vst [vmem:[#allocation9_spill] sm:$0xff] %v4489_v8 }
 0x8fa   : > { %v2905_v34 = vpop.eup %2904 }
 0x8fb   : > { %v2907_v29 = vpop.eup %2906 }
 0x8fc   : > { %v2909_v6 = vpop.eup %2908  ;;  %v1921_v15 = vmul.f32 %v2907_v29, %v2905_v34  ;;  %v4480_v34 = vld [vmem:[#allocation2 + $0x80] sm:$0xff]  ;;  %v4483_v29 = vld [vmem:[#allocation2 + $0x90] sm:$0xff] }
 0x8fd   : > { %v1920_v30 = vmul.f32 %v2909_v6, %v4254_v9  ;;  %v2911_v12 = vpop.eup %2910  ;;  %5098 = vst [vmem:[#allocation34_spill] sm:$0xff] %v4480_v34  ;;  %5099 = vst [vmem:[#allocation32_spill] sm:$0xff] %v4483_v29  ;;  %v4486_v6 = vld [vmem:[#allocation2 + $0x68] sm:$0xff] }
 0x8fe   : > { %5100 = vst [vmem:[#allocation8_spill] sm:$0xff] %v4486_v6 }
 0x8ff   : > { %v1922_v52 = vadd.f32 %v1921_v15, %v1920_v30  ;;  %v4492_v30 = vld [vmem:[#allocation2 + $0x60] sm:$0xff]  ;;  %v4495_v15 = vld [vmem:[#allocation2 + $0x70] sm:$0xff] }
 0x900   : > { %5102 = vst [vmem:[#allocation35_spill] sm:$0xff] %v4492_v30  ;;  %5103 = vst [vmem:[#allocation36_spill] sm:$0xff] %v4495_v15 }
 0x901   : > { %2912 = vtanh.f32 %v1922_v52  ;;  %v4341_v27 = vsel %vm1927_vm6, %v1922_v52, %v4254_v9  ;;  %v4354_v9 = vld [vmem:[#allocation2 + $0x1c8] sm:$0xff] }
 0x902   : > { %v4498_v52 = vld [vmem:[#allocation2 + $0x48] sm:$0xff] }
 0x903   : > { %5104 = vst [vmem:[#allocation38_spill] sm:$0xff] %v4498_v52 }
 0x90e   : > { %v2913_v14 = vpop.eup %2912 }
 0x90f   : > { %v1924_v10 = vmul.f32 %v2913_v14, %v2911_v12  ;;  %v4501_v12 = vld [vmem:[#allocation2 + $0x58] sm:$0xff]  ;;  %v4504_v14 = vld [vmem:[#allocation2 + $0x40] sm:$0xff] }
 0x910   : > { %5105 = vst [vmem:[#allocation10_spill] sm:$0xff] %v4501_v12  ;;  %5106 = vst [vmem:[#allocation11_spill] sm:$0xff] %v4504_v14 }
 0x911   : > { %v4344_v60 = vsel %vm1927_vm6, %v1924_v10, %v4257_v36  ;;  %v4363_v36 = vld [vmem:[#allocation2 + $0x1d0] sm:$0xff] }
 0x912   : > { %1997 = vmatmul.mubr.f32.vlgmr.msra.gmra.mxu0 %v4344_v60  ;;  %2068 = vmatmul.mubr.f32.vlgmr.msra.gmra.mxu1 %v4344_v60  ;;  %v4507_v10 = vld [vmem:[#allocation2 + $0x50] sm:$0xff] }
 0x913   : > { %2105 = vmatpush1.msra.mxu0 %v4348_v5  ;;  %2176 = vmatpush1.msra.mxu1 %v4351_v44  ;;  %5107 = vst [vmem:[#allocation12_spill] sm:$0xff] %v4507_v10 }
 0x914   : > { %2106 = vmatprep.subr.mxu0 %v4354_v9  ;;  %2177 = vmatprep.subr.mxu1 %v4357_v39 }
 0x915   : > { %2107 = vmatpush1.msra.mxu0 %v4360_v13  ;;  %2178 = vmatpush1.msra.mxu1 %v4363_v36 }
 0x916   : > { %2108 = vmatprep.subr.mxu0 %v4366_v17  ;;  %2179 = vmatprep.subr.mxu1 %v4369_v18 }
 0x917   : > { %2109 = vmatpush1.msra.mxu0 %v4372_v19  ;;  %2180 = vmatpush1.msra.mxu1 %v4375_v57 }
 0x918   : > { %2110 = vmatprep.subr.mxu0 %v4378_v20  ;;  %2181 = vmatprep.subr.mxu1 %v4381_v42 }
 0x919   : > { %2111 = vmatpush1.msra.mxu0 %v4384_v21  ;;  %2182 = vmatpush1.msra.mxu1 %v4387_v22 }
 0x91a   : > { %2112 = vmatprep.subr.mxu0 %v4390_v23  ;;  %2183 = vmatprep.subr.mxu1 %v4393_v24 }
 0x91b   : > { %2113 = vmatpush1.msra.mxu0 %v4396_v25  ;;  %2184 = vmatpush1.msra.mxu1 %v4399_v26 }
 0x91c   : > { %2114 = vmatprep.subr.mxu0 %v4402_v28  ;;  %2185 = vmatprep.subr.mxu1 %v4405_v31 }
 0x91d   : > { %2115 = vmatpush1.msra.mxu0 %v4408_v32  ;;  %2186 = vmatpush1.msra.mxu1 %v4411_v33 }
 0x91e   : > { %2116 = vmatprep.subr.mxu0 %v4414_v35  ;;  %2187 = vmatprep.subr.mxu1 %v4417_v37 }
 0x91f   : > { %2117 = vmatpush1.msra.mxu0 %v4420_v38  ;;  %2188 = vmatpush1.msra.mxu1 %v4423_v40 }
 0x920   : > { %2118 = vmatprep.subr.mxu0 %v4426_v41  ;;  %2189 = vmatprep.subr.mxu1 %v4429_v59 }
 0x921   : > { %2119 = vmatpush1.msra.mxu0 %v4432_v0  ;;  %2190 = vmatpush1.msra.mxu1 %v4435_v56 }
 0x922   : > { %2120 = vmatprep.subr.mxu0 %v4438_v58  ;;  %2191 = vmatprep.subr.mxu1 %v4441_v45 }
 0x923   : > { %2121 = vmatpush1.msra.mxu0 %v4444_v63  ;;  %2192 = vmatpush1.msra.mxu1 %v4447_v46 }
 0x924   : > { %2122 = vmatprep.subr.mxu0 %v4450_v50  ;;  %2193 = vmatprep.subr.mxu1 %v4453_v43 }
 0x925   : > { %2123 = vmatpush1.msra.mxu0 %v4456_v61  ;;  %2194 = vmatpush1.msra.mxu1 %v4459_v47 }
 0x926   : > { %2124 = vmatprep.subr.mxu0 %v4462_v3  ;;  %2195 = vmatprep.subr.mxu1 %v4465_v55 }
 0x927   : > { %2125 = vmatpush1.msra.mxu0 %v4468_v51  ;;  %2196 = vmatpush1.msra.mxu1 %v4471_v4 }
 0x928   : > { %2126 = vmatprep.subr.mxu0 %v4474_v1  ;;  %2197 = vmatprep.subr.mxu1 %v4477_v16 }
 0x929   : > { %2127 = vmatpush1.msra.mxu0 %v4480_v34  ;;  %2198 = vmatpush1.msra.mxu1 %v4483_v29 }
 0x92a   : > { %2128 = vmatprep.subr.mxu0 %v4486_v6  ;;  %2199 = vmatprep.subr.mxu1 %v4489_v8 }
 0x92b   : > { %2129 = vmatpush1.msra.mxu0 %v4492_v30  ;;  %2200 = vmatpush1.msra.mxu1 %v4495_v15  ;;  %v4510_v30 = vld [vmem:[#allocation2 + $0x28] sm:$0xff]  ;;  %v4513_v15 = vld [vmem:[#allocation2 + $0x38] sm:$0xff] }
 0x92c   : > { %2130 = vmatprep.subr.mxu0 %v4498_v52  ;;  %2201 = vmatprep.subr.mxu1 %v4501_v12  ;;  %5108 = vst [vmem:[#allocation13_spill] sm:$0xff] %v4510_v30  ;;  %5109 = vst [vmem:[#allocation14_spill] sm:$0xff] %v4513_v15  ;;  %v4516_v52 = vld [vmem:[#allocation2 + $0x20] sm:$0xff]  ;;  %v4519_v12 = vld [vmem:[#allocation2 + $0x30] sm:$0xff] }
 0x92d   : > { %2131 = vmatpush1.msra.mxu0 %v4504_v14  ;;  %2202 = vmatpush1.msra.mxu1 %v4507_v10  ;;  %5110 = vst [vmem:[#allocation15_spill] sm:$0xff] %v4516_v52  ;;  %5111 = vst [vmem:[#allocation16_spill] sm:$0xff] %v4519_v12  ;;  %v4522_v14 = vld [vmem:[#allocation2 + $0x8] sm:$0xff]  ;;  %v4525_v10 = vld [vmem:[#allocation2 + $0x18] sm:$0xff] }
 0x92e   : > { %2132 = vmatprep.subr.mxu0 %v4510_v30  ;;  %2203 = vmatprep.subr.mxu1 %v4513_v15  ;;  %5112 = vst [vmem:[#allocation17_spill] sm:$0xff] %v4522_v14  ;;  %5113 = vst [vmem:[#allocation18_spill] sm:$0xff] %v4525_v10  ;;  %v4528_v30 = vld [vmem:[#allocation2] sm:$0xff]  ;;  %v4532_v15 = vld [vmem:[#allocation2 + $0x10] sm:$0xff] }
 0x92f   : > { %2133 = vmatpush1.msra.mxu0 %v4516_v52  ;;  %2204 = vmatpush1.msra.mxu1 %v4519_v12  ;;  %5114 = vst [vmem:[#allocation19_spill] sm:$0xff] %v4528_v30  ;;  %5115 = vst [vmem:[#allocation20_spill] sm:$0xff] %v4532_v15 }
 0x930   : > { %2134 = vmatprep.subr.mxu0 %v4522_v14  ;;  %2205 = vmatprep.subr.mxu1 %v4525_v10 }
 0x931   : > { %2135 = vmatpush1.msra.mxu0 %v4528_v30  ;;  %2168 = vmatprep.mubr.f32.mxu0 %v5093_v48 }
 0x932   : > { %2206 = vmatpush1.msra.mxu1 %v4532_v15  ;;  %2239 = vmatprep.mubr.f32.mxu1 %v5093_v48 }
 0x933   : > { %2276 = vmatprep.subr.mxu0 %v4325_v62  ;;  %2347 = vmatprep.subr.mxu1 %v4328_v49 }
 0x9d2   : > { %v1998_v14 = vpop.f32.mrf.mxu0  ;;  %v2069_v30 = vpop.f32.mrf.mxu1 }
 0x9d3   : > { %v1999_v12 = vadd.f32 %v1998_v14, %v3534_v2  ;;  %v2070_v62 = vadd.f32 %v2069_v30, %v3550_v53 }
 0x9d4   : > { %v2000_v10 = vpop.f32.mrf.mxu0  ;;  %v2071_v29 = vpop.f32.mrf.mxu1 }
 0x9d5   : > { %v2654_v52 = vmul.f32 -1.442695, %v1999_v12  ;;  %v2001_v8 = vadd.f32 %v2000_v10, %v5095_v54  ;;  %v2072_v15 = vadd.f32 %v2071_v29, %v5071_v11 }
 0x9d7   : > { %2914 = vpow2.f32 %v2654_v52  ;;  %v2655_v6 = vmul.f32 -1.442695, %v2001_v8  ;;  %v2656_v34 = vmul.f32 -1.442695, %v2072_v15 }
 0x9d9   : > { %2916 = vpow2.f32 %v2655_v6 }
 0x9da   : > { %2918 = vpow2.f32 %v2656_v34 }
 0x9e4   : > { %v2915_v48 = vpop.eup %2914 }
 0x9e5   : > { %v2077_v16 = vadd.f32 1.0, %v2915_v48 }
 0x9e6   : > { %v2917_v49 = vpop.eup %2916 }
 0x9e7   : > { %2920 = vrcp.f32 %v2077_v16  ;;  %v2083_v14 = vadd.f32 1.0, %v2917_v49  ;;  %v2919_v12 = vpop.eup %2918 }
 0x9e8   : > { %2922 = vtanh.f32 %v2070_v62  ;;  %v2090_v8 = vadd.f32 1.0, %v2919_v12 }
 0x9e9   : > { %2924 = vrcp.f32 %v2083_v14 }
 0x9ea   : > { %2926 = vrcp.f32 %v2090_v8  ;;  %v2462_v8 = vld [vmem:[#allocation4 + $0x70] sm:$0xff] }
 0x9f4   : > { %v2921_v10 = vpop.eup %2920 }
 0x9f5   : > { %v2923_v52 = vpop.eup %2922 }
 0x9f6   : > { %v2925_v6 = vpop.eup %2924  ;;  %v2094_v15 = vmul.f32 %v2923_v52, %v2921_v10 }
 0x9f7   : > { %v2093_v29 = vmul.f32 %v2925_v6, %v4341_v27  ;;  %v2927_v34 = vpop.eup %2926  ;;  %v2463_v6 = vld [vmem:[#allocation4 + $0x78] sm:$0xff] }
 0x9f9   : > { %v2095_v48 = vadd.f32 %v2094_v15, %v2093_v29  ;;  %v2461_v29 = vld [vmem:[#allocation4 + $0x68] sm:$0xff]  ;;  %v2460_v15 = vld [vmem:[#allocation4 + $0x60] sm:$0xff] }
 0x9fb   : > { %2928 = vtanh.f32 %v2095_v48  ;;  %v4547_v16 = vsel %vm2099_vm8, %v2095_v48, %v4341_v27  ;;  %v5116_v27 = vld [vmem:[#allocation33_spill] sm:$0xff]  ;;  %v2459_v48 = vld [vmem:[#allocation4 + $0x58] sm:$0xff] }
 0xa08   : > { %v2929_v30 = vpop.eup %2928 }
 0xa09   : > { %v2097_v62 = vmul.f32 %v2929_v30, %v2927_v34  ;;  %v2458_v34 = vld [vmem:[#allocation4 + $0x50] sm:$0xff]  ;;  %v2457_v30 = vld [vmem:[#allocation4 + $0x48] sm:$0xff] }
 0xa0b   : > { %v4550_v49 = vsel %vm2099_vm8, %v2097_v62, %v4344_v60  ;;  %v5117_v60 = vld [vmem:[#allocation34_spill] sm:$0xff]  ;;  %v2456_v62 = vld [vmem:[#allocation4 + $0x40] sm:$0xff] }
 0xa0c   : > { %2169 = vmatmul.mubr.f32.vlgmr.msra.gmra.mxu0 %v4550_v49  ;;  %2240 = vmatmul.mubr.f32.vlgmr.msra.gmra.mxu1 %v4550_v49 }
 0xa0d   : > { %2277 = vmatpush1.msra.mxu0 %v4348_v5  ;;  %2348 = vmatpush1.msra.mxu1 %v4351_v44  ;;  %v5118_v5 = vld [vmem:[#allocation32_spill] sm:$0xff] }
 0xa0e   : > { %2278 = vmatprep.subr.mxu0 %v4354_v9  ;;  %2349 = vmatprep.subr.mxu1 %v4357_v39  ;;  %v5119_v44 = vld [vmem:[#allocation8_spill] sm:$0xff]  ;;  %v5120_v9 = vld [vmem:[#allocation9_spill] sm:$0xff]  ;;  %v5121_v39 = vld [vmem:[#allocation35_spill] sm:$0xff] }
 0xa0f   : > { %2279 = vmatpush1.msra.mxu0 %v4360_v13  ;;  %2350 = vmatpush1.msra.mxu1 %v4363_v36  ;;  %v5122_v13 = vld [vmem:[#allocation36_spill] sm:$0xff]  ;;  %v5123_v36 = vld [vmem:[#allocation38_spill] sm:$0xff] }
 0xa10   : > { %2280 = vmatprep.subr.mxu0 %v4366_v17  ;;  %2351 = vmatprep.subr.mxu1 %v4369_v18  ;;  %v5124_v17 = vld [vmem:[#allocation10_spill] sm:$0xff]  ;;  %v5125_v18 = vld [vmem:[#allocation11_spill] sm:$0xff] }
 0xa11   : > { %2281 = vmatpush1.msra.mxu0 %v4372_v19  ;;  %2352 = vmatpush1.msra.mxu1 %v4375_v57  ;;  %v5126_v19 = vld [vmem:[#allocation12_spill] sm:$0xff]  ;;  %v5127_v57 = vld [vmem:[#allocation13_spill] sm:$0xff] }
 0xa12   : > { %2282 = vmatprep.subr.mxu0 %v4378_v20  ;;  %2353 = vmatprep.subr.mxu1 %v4381_v42  ;;  %v5128_v20 = vld [vmem:[#allocation14_spill] sm:$0xff]  ;;  %v5129_v42 = vld [vmem:[#allocation15_spill] sm:$0xff] }
 0xa13   : > { %2283 = vmatpush1.msra.mxu0 %v4384_v21  ;;  %2354 = vmatpush1.msra.mxu1 %v4387_v22  ;;  %v5130_v21 = vld [vmem:[#allocation16_spill] sm:$0xff]  ;;  %v5131_v22 = vld [vmem:[#allocation17_spill] sm:$0xff] }
 0xa14   : > { %2284 = vmatprep.subr.mxu0 %v4390_v23  ;;  %2355 = vmatprep.subr.mxu1 %v4393_v24  ;;  %v5132_v23 = vld [vmem:[#allocation18_spill] sm:$0xff]  ;;  %v5133_v24 = vld [vmem:[#allocation19_spill] sm:$0xff] }
 0xa15   : > { %2285 = vmatpush1.msra.mxu0 %v4396_v25  ;;  %2356 = vmatpush1.msra.mxu1 %v4399_v26  ;;  %v5134_v25 = vmov 0.0   ;;  %v5135_v26 = vld [vmem:[#allocation20_spill] sm:$0xff] }
 0xa16   : > { %2286 = vmatprep.subr.mxu0 %v4402_v28  ;;  %2357 = vmatprep.subr.mxu1 %v4405_v31 }
 0xa17   : > { %2287 = vmatpush1.msra.mxu0 %v4408_v32  ;;  %2358 = vmatpush1.msra.mxu1 %v4411_v33 }
 0xa18   : > { %2288 = vmatprep.subr.mxu0 %v4414_v35  ;;  %2359 = vmatprep.subr.mxu1 %v4417_v37 }
 0xa19   : > { %2289 = vmatpush1.msra.mxu0 %v4420_v38  ;;  %2360 = vmatpush1.msra.mxu1 %v4423_v40 }
 0xa1a   : > { %2290 = vmatprep.subr.mxu0 %v4426_v41  ;;  %2361 = vmatprep.subr.mxu1 %v4429_v59 }
 0xa1b   : > { %2291 = vmatpush1.msra.mxu0 %v4432_v0  ;;  %2362 = vmatpush1.msra.mxu1 %v4435_v56 }
 0xa1c   : > { %2292 = vmatprep.subr.mxu0 %v4438_v58  ;;  %2363 = vmatprep.subr.mxu1 %v4441_v45 }
 0xa1d   : > { %2293 = vmatpush1.msra.mxu0 %v4444_v63  ;;  %2364 = vmatpush1.msra.mxu1 %v4447_v46 }
 0xa1e   : > { %2294 = vmatprep.subr.mxu0 %v4450_v50  ;;  %2365 = vmatprep.subr.mxu1 %v4453_v43 }
 0xa1f   : > { %2295 = vmatpush1.msra.mxu0 %v4456_v61  ;;  %2366 = vmatpush1.msra.mxu1 %v4459_v47 }
 0xa20   : > { %2296 = vmatprep.subr.mxu0 %v4462_v3  ;;  %2367 = vmatprep.subr.mxu1 %v4465_v55 }
 0xa21   : > { %2297 = vmatpush1.msra.mxu0 %v4468_v51  ;;  %2368 = vmatpush1.msra.mxu1 %v4471_v4 }
 0xa22   : > { %2298 = vmatprep.subr.mxu0 %v4474_v1  ;;  %2369 = vmatprep.subr.mxu1 %v5116_v27  ;;  %v2454_v27 = vld [vmem:[#allocation4 + $0x30] sm:$0xff] }
 0xa23   : > { %2299 = vmatpush1.msra.mxu0 %v5117_v60  ;;  %2370 = vmatpush1.msra.mxu1 %v5118_v5  ;;  %v2453_v60 = vld [vmem:[#allocation4 + $0x28] sm:$0xff]  ;;  %v2452_v5 = vld [vmem:[#allocation4 + $0x20] sm:$0xff] }
 0xa24   : > { %2300 = vmatprep.subr.mxu0 %v5119_v44  ;;  %2371 = vmatprep.subr.mxu1 %v5120_v9  ;;  %v2451_v44 = vld [vmem:[#allocation4 + $0x18] sm:$0xff]  ;;  %v2450_v9 = vld [vmem:[#allocation4 + $0x10] sm:$0xff] }
 0xa25   : > { %2301 = vmatpush1.msra.mxu0 %v5121_v39  ;;  %2372 = vmatpush1.msra.mxu1 %v5122_v13  ;;  %v2449_v39 = vld [vmem:[#allocation4 + $0x8] sm:$0xff]  ;;  %v2448_v13 = vld [vmem:[#allocation4] sm:$0xff] }
 0xa26   : > { %2302 = vmatprep.subr.mxu0 %v5123_v36  ;;  %2373 = vmatprep.subr.mxu1 %v5124_v17 }
 0xa27   : > { %2303 = vmatpush1.msra.mxu0 %v5125_v18  ;;  %2374 = vmatpush1.msra.mxu1 %v5126_v19 }
 0xa28   : > { %2304 = vmatprep.subr.mxu0 %v5127_v57  ;;  %2375 = vmatprep.subr.mxu1 %v5128_v20 }
 0xa29   : > { %2305 = vmatpush1.msra.mxu0 %v5129_v42  ;;  %2376 = vmatpush1.msra.mxu1 %v5130_v21 }
 0xa2a   : > { %2306 = vmatprep.subr.mxu0 %v5131_v22  ;;  %2377 = vmatprep.subr.mxu1 %v5132_v23 }
 0xa2b   : > { %2307 = vmatpush1.msra.mxu0 %v5133_v24  ;;  %2340 = vmatprep.mubr.f32.mxu0 %v5134_v25 }
 0xa2c   : > { %2378 = vmatpush1.msra.mxu1 %v5135_v26  ;;  %2411 = vmatprep.mubr.f32.mxu1 %v5134_v25 }
 0xa2d   : > { %2683 = vmatprep.subr.mxu0 %v5134_v25 }
 0xacc   : > { %v2170_v28 = vpop.f32.mrf.mxu0  ;;  %v2241_v37 = vpop.f32.mrf.mxu1 }
 0xacd   : > { %v2171_v31 = vadd.f32 %v2170_v28, %v3534_v2  ;;  %v2242_v56 = vadd.f32 %v2241_v37, %v3550_v53 }
 0xace   : > { %v2172_v32 = vpop.f32.mrf.mxu0  ;;  %v2243_v40 = vpop.f32.mrf.mxu1 }
 0xacf   : > { %v2657_v33 = vmul.f32 -1.442695, %v2171_v31  ;;  %v2173_v35 = vadd.f32 %v2172_v32, %v5095_v54  ;;  %v2244_v41 = vadd.f32 %v2243_v40, %v5071_v11 }
 0xad1   : > { %2930 = vpow2.f32 %v2657_v33  ;;  %v2658_v38 = vmul.f32 -1.442695, %v2173_v35  ;;  %v2659_v59 = vmul.f32 -1.442695, %v2244_v41 }
 0xad3   : > { %2932 = vpow2.f32 %v2658_v38 }
 0xad4   : > { %2934 = vpow2.f32 %v2659_v59 }
 0xade   : > { %v2931_v0 = vpop.eup %2930 }
 0xadf   : > { %v2249_v58 = vadd.f32 1.0, %v2931_v0  ;;  %v2663_v0 = vld [vmem:[#allocation4 + $0x14] ss:$0 sm:$0xff] }
 0xae0   : > { %v2933_v45 = vpop.eup %2932 }
 0xae1   : > { %2936 = vrcp.f32 %v2249_v58  ;;  %v2255_v63 = vadd.f32 1.0, %v2933_v45  ;;  %v2935_v46 = vpop.eup %2934 }
 0xae2   : > { %2938 = vtanh.f32 %v2242_v56  ;;  %v2262_v47 = vadd.f32 1.0, %v2935_v46 }
 0xae3   : > { %2940 = vrcp.f32 %v2255_v63 }
 0xae4   : > { %2942 = vrcp.f32 %v2262_v47 }
 0xaee   : > { %v2937_v50 = vpop.eup %2936 }
 0xaef   : > { %v2939_v43 = vpop.eup %2938 }
 0xaf0   : > { %v2941_v61 = vpop.eup %2940  ;;  %v2266_v55 = vmul.f32 %v2939_v43, %v2937_v50 }
 0xaf1   : > { %v2265_v3 = vmul.f32 %v2941_v61, %v4547_v16  ;;  %v2943_v14 = vpop.eup %2942 }
 0xaf3   : > { %v4631_v4 = vadd.f32 %v2266_v55, %v2265_v3 }
 0xaf5   : > { %2944 = vtanh.f32 %v4631_v4  ;;  %v2274_v1 = vsel %vm4627_vm10, %v4631_v4, %v4547_v16 }
 0xb02   : > { %v2945_v12 = vpop.eup %2944 }
 0xb03   : > { %v2269_v10 = vmul.f32 %v2945_v12, %v2943_v14 }
 0xb05   : > { %v4641_v52 = vsel %vm4627_vm10, %v2269_v10, %v4550_v49  ;;  %v2455_v49 = vld [vmem:[#allocation4 + $0x38] sm:$0xff] }
 0xb06   : > { %2341 = vmatmul.mubr.f32.vlgmr.msra.gmra.mxu0 %v4641_v52  ;;  %2412 = vmatmul.mubr.f32.vlgmr.msra.gmra.mxu1 %v4641_v52 }
 0xb07   : > { %2684 = vmatpush3.msra.mxu0 %v2463_v6  ;;  %2715 = vmatprep.mubr.msk.f32.mxu0 %vm3174_vm11, %v5134_v25 }
 0xb08   : > { %2685 = vmatprep.subr.mxu0 %v5134_v25 }
 0xb09   : > { %2686 = vmatpush3.msra.mxu0 %v2462_v8 }
 0xb0a   : > { %2687 = vmatprep.subr.mxu0 %v5134_v25 }
 0xb0b   : > { %2688 = vmatpush3.msra.mxu0 %v2461_v29 }
 0xb0c   : > { %2689 = vmatprep.subr.mxu0 %v5134_v25 }
 0xb0d   : > { %2690 = vmatpush3.msra.mxu0 %v2460_v15 }
 0xb0e   : > { %2691 = vmatprep.subr.mxu0 %v5134_v25 }
 0xb0f   : > { %2692 = vmatpush3.msra.mxu0 %v2459_v48 }
 0xb10   : > { %2693 = vmatprep.subr.mxu0 %v5134_v25 }
 0xb11   : > { %2694 = vmatpush3.msra.mxu0 %v2458_v34 }
 0xb12   : > { %2695 = vmatprep.subr.mxu0 %v5134_v25 }
 0xb13   : > { %2696 = vmatpush3.msra.mxu0 %v2457_v30 }
 0xb14   : > { %2697 = vmatprep.subr.mxu0 %v5134_v25 }
 0xb15   : > { %2698 = vmatpush3.msra.mxu0 %v2456_v62 }
 0xb16   : > { %2699 = vmatprep.subr.mxu0 %v5134_v25 }
 0xb17   : > { %2700 = vmatpush3.msra.mxu0 %v2455_v49 }
 0xb18   : > { %2701 = vmatprep.subr.mxu0 %v5134_v25 }
 0xb19   : > { %2702 = vmatpush3.msra.mxu0 %v2454_v27 }
 0xb1a   : > { %2703 = vmatprep.subr.mxu0 %v5134_v25 }
 0xb1b   : > { %2704 = vmatpush3.msra.mxu0 %v2453_v60 }
 0xb1c   : > { %2705 = vmatprep.subr.mxu0 %v5134_v25 }
 0xb1d   : > { %2706 = vmatpush3.msra.mxu0 %v2452_v5 }
 0xb1e   : > { %2707 = vmatprep.subr.mxu0 %v5134_v25 }
 0xb1f   : > { %2708 = vmatpush3.msra.mxu0 %v2451_v44 }
 0xb20   : > { %2709 = vmatprep.subr.mxu0 %v5134_v25 }
 0xb21   : > { %2710 = vmatpush3.msra.mxu0 %v2450_v9 }
 0xb22   : > { %2711 = vmatprep.subr.mxu0 %v5134_v25 }
 0xb23   : > { %2712 = vmatpush3.msra.mxu0 %v2449_v39 }
 0xb24   : > { %2713 = vmatprep.subr.mxu0 %v5134_v25 }
 0xb25   : > { %2714 = vmatpush3.msra.mxu0 %v2448_v13 }
 0xbc6   : > { %v2342_v36 = vpop.f32.mrf.mxu0  ;;  %v2413_v20 = vpop.f32.mrf.mxu1 }
 0xbc7   : > { %v2343_v17 = vadd.f32 %v2342_v36, %v3534_v2  ;;  %v2414_v26 = vadd.f32 %v2413_v20, %v3550_v53 }
 0xbc8   : > { %v2344_v18 = vpop.f32.mrf.mxu0  ;;  %v2415_v21 = vpop.f32.mrf.mxu1 }
 0xbc9   : > { %v2660_v19 = vmul.f32 -1.442695, %v2343_v17  ;;  %v2345_v57 = vadd.f32 %v2344_v18, %v5095_v54  ;;  %v2416_v22 = vadd.f32 %v2415_v21, %v5071_v11 }
 0xbcb   : > { %2946 = vpow2.f32 %v2660_v19  ;;  %v2661_v42 = vmul.f32 -1.442695, %v2345_v57  ;;  %v2662_v23 = vmul.f32 -1.442695, %v2416_v22 }
 0xbcd   : > { %2948 = vpow2.f32 %v2661_v42 }
 0xbce   : > { %2950 = vpow2.f32 %v2662_v23 }
 0xbd8   : > { %v2947_v24 = vpop.eup %2946 }
 0xbd9   : > { %v2421_v25 = vadd.f32 1.0, %v2947_v24 }
 0xbda   : > { %v2949_v28 = vpop.eup %2948 }
 0xbdb   : > { %2952 = vrcp.f32 %v2421_v25  ;;  %v2427_v2 = vadd.f32 1.0, %v2949_v28  ;;  %v2951_v31 = vpop.eup %2950 }
 0xbdc   : > { %2954 = vtanh.f32 %v2414_v26  ;;  %v2434_v35 = vadd.f32 1.0, %v2951_v31 }
 0xbdd   : > { %2956 = vrcp.f32 %v2427_v2 }
 0xbde   : > { %2958 = vrcp.f32 %v2434_v35 }
 0xbe8   : > { %v2953_v54 = vpop.eup %2952 }
 0xbe9   : > { %v2955_v32 = vpop.eup %2954 }
 0xbea   : > { %v2957_v33 = vpop.eup %2956  ;;  %v2438_v37 = vmul.f32 %v2955_v32, %v2953_v54 }
 0xbeb   : > { %v2437_v53 = vmul.f32 %v2957_v33, %v2274_v1  ;;  %v2959_v38 = vpop.eup %2958 }
 0xbed   : > { %v2439_v11 = vadd.f32 %v2438_v37, %v2437_v53 }
 0xbef   : > { %2960 = vtanh.f32 %v2439_v11 }
 0xbfc   : > { %v2961_v40 = vpop.eup %2960 }
 0xbfd   : > { %v2441_v41 = vmul.f32 %v2961_v40, %v2959_v38 }
 0xbff   : > { %v2446_v59 = vsel %vm2443_vm13, %v2441_v41, %v4641_v52 }
 0xc00   : > { %2716 = vmatmul.mubr.f32.vlgmr.msra.gmra.mxu0 %v2446_v59 }
 0xcc0   : > { %v2534_v16 = vpop.f32.mrf.mxu0 }
 0xcc1   : > { %v2535_v56 = vadd.f32 %v2663_v0, %v2534_v16 }
 0xcc2   : > { %v2717_v58 = vpop.f32.mrf.mxu0 }
 0xcc3   : > { %2538 = vst [vmem:[%s195_s9] sm:$0xff] %v2535_v56 }
 0xcc4 PF: > { %s15_s12 = sadd.s32 1, %s3157_s12  }
 0xcc5   : > { %p12_p3 = scmp.ge.s32.totalorder %s15_s12, 4  }
 0xcc7   :  { %14 = sbr.rel (!%p12_p3) target bundleno = 2 (0x2), region = 73 }
 0xccc   :  { %2558 = vsyncpa [#allocation3], 1 }
 0xccd   :  { %2560 = vsyncpa [#allocation3 + $0x1], 1 }
 0xcce   :  { %2561 = vsyncpa [#allocation5], 1 }

</bundles_post_ra>
